<compile_context>
chip_gen: v7x
topology: tpu7x:2x2x1
jax: 0.10.0
libtpu: 0.0.40
codegen_flags: <defaults>
</compile_context>

<pallas_src>
import functools

import jax
import jax.numpy as jnp
from jax.experimental import pallas as pl
from jax.experimental.pallas import tpu as pltpu


def double_lstm_kernel(
    emb_ref, mask_ref,
    wih_fb_ref, b_fb_ref, whh_f_ref, whh_b_ref,
    init_h_ref, init_c_ref,
    wproj_f_ref, wproj_b_ref, bproj_ref,
    wts_ref, bts_ref,
    wnext_h_ref, wnext_t_ref, bnext_ref,
    wih_d_ref, whh_d_ref, b_d_ref,
    wy_ref, by_ref,
    out_ref,
    enc_scratch,
    *, seq_len,
):
    T = seq_len
    TB = out_ref.shape[0]            # batch tile
    H = whh_f_ref.shape[0]           # encoder hidden
    O = wy_ref.shape[0]              # output size

    # ---- hoisted loads: never re-read the same weight ref inside the loops ----
    mask_b = mask_ref[...] > 0.0                       # (T*TB, 1) bool, t-major rows
    whh_f = whh_f_ref[...]
    whh_b = whh_b_ref[...]
    wts = wts_ref[...]
    bts = bts_ref[...]
    wnext_h = wnext_h_ref[...]
    wnext_t = wnext_t_ref[...]
    bnext = bnext_ref[...]
    whh_d = whh_d_ref[...]
    b_d = b_d_ref[...]
    wy = wy_ref[...]
    by = by_ref[...]

    # ---- batched encoder input projection: one (T*TB, E)@(E, 8H) MXU matmul ----
    # bf16 inputs, f32 accumulation; (b_ih + b_hh) for both directions folded in.
    xg_all = jnp.dot(emb_ref[...], wih_fb_ref[...],
                     preferred_element_type=jnp.float32) + b_fb_ref[...]  # (T*TB, 8H)

    def lstm_cell(xg_with_bias, h, c, whh):
        # PyTorch gate order [i, f, g, o]; bias already folded into xg_with_bias.
        gates = xg_with_bias + jnp.dot(h, whh, preferred_element_type=jnp.float32)
        hh = whh.shape[0]
        i = jax.nn.sigmoid(gates[:, 0:hh])
        f = jax.nn.sigmoid(gates[:, hh:2 * hh])
        g = jnp.tanh(gates[:, 2 * hh:3 * hh])
        o = jax.nn.sigmoid(gates[:, 3 * hh:4 * hh])
        c_new = f * c + i * g
        h_new = o * jnp.tanh(c_new)
        return h_new, c_new

    # ---------------- encoder: forward direction ----------------
    h = jnp.broadcast_to(init_h_ref[0:1, :], (TB, H))
    c = jnp.broadcast_to(init_c_ref[0:1, :], (TB, H))
    for t in range(T):
        r0, r1 = t * TB, (t + 1) * TB
        m = mask_b[r0:r1, :]                                        # (TB, 1)
        h_new, c_new = lstm_cell(xg_all[r0:r1, 0:4 * H], h, c, whh_f)
        h = jnp.where(m, h_new, h)                                  # carry past padding
        c = jnp.where(m, c_new, c)
        enc_scratch[r0:r1, 0:H] = jnp.where(m, h_new, 0.0)          # padded rows -> 0
    h_fwd_final = h

    # ---------------- encoder: backward direction ----------------
    h = jnp.broadcast_to(init_h_ref[1:2, :], (TB, H))
    c = jnp.broadcast_to(init_c_ref[1:2, :], (TB, H))
    for t in range(T - 1, -1, -1):
        r0, r1 = t * TB, (t + 1) * TB
        m = mask_b[r0:r1, :]
        h_new, c_new = lstm_cell(xg_all[r0:r1, 4 * H:8 * H], h, c, whh_b)
        h = jnp.where(m, h_new, h)
        c = jnp.where(m, c_new, c)
        enc_scratch[r0:r1, H:2 * H] = jnp.where(m, h_new, 0.0)
    h_bwd_final = h

    # ---------------- decoder init ----------------
    # dec_h = projection(cat(h_fwd_final, h_bwd_final)); the torch module also
    # computes dec_c = projection(enc_final_c) but never uses it (dead code).
    dec_h = (jnp.dot(h_fwd_final, wproj_f_ref[...], preferred_element_type=jnp.float32)
             + jnp.dot(h_bwd_final, wproj_b_ref[...], preferred_element_type=jnp.float32)
             + bproj_ref[...])
    tag = jnp.tanh(jnp.dot(dec_h, wts, preferred_element_type=jnp.float32) + bts)
    dec_h = (jnp.dot(dec_h, wnext_h, preferred_element_type=jnp.float32)
             + jnp.dot(tag, wnext_t, preferred_element_type=jnp.float32)
             + bnext)

    # ---- batched decoder input projection: one (T*TB, 2H)@(2H, 4D) matmul ----
    xg_dec = (jnp.dot(enc_scratch[...], wih_d_ref[...],
                      preferred_element_type=jnp.float32) + b_d)          # (T*TB, 4D)

    # ---------------- decoder time loop ----------------
    for t in range(T):
        r0, r1 = t * TB, (t + 1) * TB
        # torch: dec_h, dec_c = decoder(dec_input, (dec_h, dec_h)); c is discarded.
        h_new, _ = lstm_cell(xg_dec[r0:r1, :], dec_h, dec_h, whh_d)
        dec_h = h_new
        tag = jnp.tanh(jnp.dot(dec_h, wts, preferred_element_type=jnp.float32) + bts)
        step_out = jnp.dot(tag, wy, preferred_element_type=jnp.float32) + by
        # Fill the lane-dense (TB, T*O) output block; HBM writeback is one DMA.
        out_ref[:, t * O:(t + 1) * O] = step_out
        dec_h = (jnp.dot(dec_h, wnext_h, preferred_element_type=jnp.float32)
                 + jnp.dot(tag, wnext_t, preferred_element_type=jnp.float32)
                 + bnext)


def init_params(key, vocab_size, emb_size, enc_hidden, dec_hidden, out_size):
    INIT = 0.01

    def u(k, shape, scale=0.1):
        return jax.random.uniform(k, shape, jnp.float32, -scale, scale)

    ks = iter(jax.random.split(key, 32))
    H, D, O, E = enc_hidden, dec_hidden, out_size, emb_size
    p = {
        "embedding": u(next(ks), (vocab_size, E), 1.0),
        # bidirectional encoder LSTM (forward / backward), weights transposed
        # vs PyTorch so every matmul is x @ W; bias = b_ih + b_hh pre-summed.
        "wih_f": u(next(ks), (E, 4 * H)), "whh_f": u(next(ks), (H, 4 * H)),
        "b_f": u(next(ks), (1, 4 * H)),
        "wih_b": u(next(ks), (E, 4 * H)), "whh_b": u(next(ks), (H, 4 * H)),
        "b_b": u(next(ks), (1, 4 * H)),
        # learned initial encoder states, shape (2, H) like the torch module
        "init_h": u(next(ks), (2, H), INIT),
        "init_c": u(next(ks), (2, H), INIT),
        # projection: Linear(2H -> D), split into fwd/bwd halves
        "wproj_f": u(next(ks), (H, D)), "wproj_b": u(next(ks), (H, D)),
        "bproj": u(next(ks), (1, D)),
        # W_ts: Linear(D -> O)
        "wts": u(next(ks), (D, O)), "bts": u(next(ks), (1, O)),
        # prejection_next_dec_h: Linear(D + O -> D), split into concat halves
        "wnext_h": u(next(ks), (D, D)), "wnext_t": u(next(ks), (O, D)),
        "bnext": u(next(ks), (1, D)),
        # decoder LSTMCell: input is 2H (fwd/bwd halves), hidden D
        "wih_d_f": u(next(ks), (H, 4 * D)), "wih_d_b": u(next(ks), (H, 4 * D)),
        "whh_d": u(next(ks), (D, 4 * D)), "b_d": u(next(ks), (1, 4 * D)),
        # W_y: Linear(O -> O)
        "wy": u(next(ks), (O, O)), "by": u(next(ks), (1, O)),
    }
    return p


@jax.jit
def double_lstm_forward(tokens, lengths, params):
    B, T = tokens.shape
    E = params["embedding"].shape[1]
    H = params["whh_f"].shape[0]
    O = params["wy"].shape[0]

    # Batch tile: whole batch when small, else sublane-aligned chunks of 8.
    TB = B if (B <= 8 or B % 8 != 0) else 8
    nb = B // TB

    # Glue (XLA side): embedding gather + dropout (identity in eval) + validity
    # mask, rearranged t-major per batch tile so per-step rows are contiguous.
    # TODO(synk): move the embedding gather into the kernel via scalar prefetch
    # to avoid the (B,T,E) HBM round trip for large E/T.
    emb = jnp.take(params["embedding"], tokens, axis=0)                    # (B,T,E)
    emb = (emb.reshape(nb, TB, T, E).transpose(0, 2, 1, 3)
              .reshape(nb, T * TB, E).astype(jnp.bfloat16))
    mask = (jnp.arange(T)[None, :] < lengths[:, None]).astype(jnp.float32)  # (B,T)
    mask = (mask.reshape(nb, TB, T).transpose(0, 2, 1)
                .reshape(nb, T * TB, 1))

    # Fuse fwd/bwd encoder input weights along the output dim (E, 8H) and the
    # decoder input weights along the contraction dim (2H, 4D).
    wih_fb = jnp.concatenate([params["wih_f"], params["wih_b"]],
                             axis=1).astype(jnp.bfloat16)                   # (E, 8H)
    b_fb = jnp.concatenate([params["b_f"], params["b_b"]], axis=1)          # (1, 8H)
    wih_d = jnp.concatenate([params["wih_d_f"], params["wih_d_b"]], axis=0)  # (2H,4D)

    weights = (
        wih_fb, b_fb, params["whh_f"], params["whh_b"],
        params["init_h"], params["init_c"],
        params["wproj_f"], params["wproj_b"], params["bproj"],
        params["wts"], params["bts"],
        params["wnext_h"], params["wnext_t"], params["bnext"],
        wih_d, params["whh_d"], params["b_d"],
        params["wy"], params["by"],
    )

    def const_spec(x):
        nd = x.ndim
        return pl.BlockSpec(x.shape, lambda i, _nd=nd: (0,) * _nd)

    in_specs = (
        [pl.BlockSpec((None, T * TB, E), lambda i: (i, 0, 0)),   # emb batch tile
         pl.BlockSpec((None, T * TB, 1), lambda i: (i, 0, 0))]   # mask batch tile
        + [const_spec(w) for w in weights]                       # weights replicated
    )
    out_specs = pl.BlockSpec((None, TB, T * O), lambda i: (i, 0, 0))

    out = pl.pallas_call(
        functools.partial(double_lstm_kernel, seq_len=T),
        grid=(nb,),
        out_shape=jax.ShapeDtypeStruct((nb, TB, T * O), jnp.float32),
        in_specs=in_specs,
        out_specs=out_specs,
        scratch_shapes=[pltpu.VMEM((T * TB, 2 * H), jnp.float32)],  # enc_out scratch
        compiler_params=pltpu.CompilerParams(
            dimension_semantics=("parallel",),        # batch tiles -> megacore on v7x
            vmem_limit_bytes=32 * 1024 * 1024),
    )(emb, mask, *weights)

    return out.reshape(B, T, O)


if __name__ == "__main__":
    # Small shapes consistent with the module's forward.
    VOCAB, EMB, ENC_H, DEC_H, OUT = 50, 32, 32, 32, 16
    B, T = 2, 8

    key = jax.random.PRNGKey(0)
    k_params, k_tok = jax.random.split(key)
    params = init_params(k_params, VOCAB, EMB, ENC_H, DEC_H, OUT)

    tokens = jax.random.randint(k_tok, (B, T), 0, VOCAB, dtype=jnp.int32)
    lengths = jnp.array([T, T - 3], dtype=jnp.int32)  # sorted descending, max == T

    out = double_lstm_forward(tokens, lengths, params)
    out = jax.block_until_ready(out)

    assert out.shape == (B, T, OUT), out.shape
    assert bool(jnp.all(jnp.isfinite(out)))
    print("KERNEL_OK")
</pallas_src>

<mosaic_0001>
module attributes {stable_mosaic.version = 11 : i64} {
  func.func @double_lstm_kernel(%arg0: i32, %arg1: memref<1x16x32xbf16, #tpu.memory_space<vmem>>, %arg2: memref<1x16x1xf32, #tpu.memory_space<vmem>>, %arg3: memref<32x256xbf16, #tpu.memory_space<vmem>>, %arg4: memref<1x256xf32, #tpu.memory_space<vmem>>, %arg5: memref<32x128xf32, #tpu.memory_space<vmem>>, %arg6: memref<32x128xf32, #tpu.memory_space<vmem>>, %arg7: memref<2x32xf32, #tpu.memory_space<vmem>>, %arg8: memref<2x32xf32, #tpu.memory_space<vmem>>, %arg9: memref<32x32xf32, #tpu.memory_space<vmem>>, %arg10: memref<32x32xf32, #tpu.memory_space<vmem>>, %arg11: memref<1x32xf32, #tpu.memory_space<vmem>>, %arg12: memref<32x16xf32, #tpu.memory_space<vmem>>, %arg13: memref<1x16xf32, #tpu.memory_space<vmem>>, %arg14: memref<32x32xf32, #tpu.memory_space<vmem>>, %arg15: memref<16x32xf32, #tpu.memory_space<vmem>>, %arg16: memref<1x32xf32, #tpu.memory_space<vmem>>, %arg17: memref<64x128xf32, #tpu.memory_space<vmem>>, %arg18: memref<32x128xf32, #tpu.memory_space<vmem>>, %arg19: memref<1x128xf32, #tpu.memory_space<vmem>>, %arg20: memref<16x16xf32, #tpu.memory_space<vmem>>, %arg21: memref<1x16xf32, #tpu.memory_space<vmem>>, %arg22: memref<1x2x128xf32, #tpu.memory_space<vmem>>, %arg23: memref<16x64xf32, #tpu.memory_space<vmem>>) attributes {dimension_semantics = [#tpu.dimension_semantics<parallel>], iteration_bounds = array<i64: 1>, scalar_prefetch = 0 : i64, scratch_operands = 1 : i64, tpu.core_type = #tpu.core_type<tc>, window_params = [{transform_indices = @transform_0, window_bounds = array<i64: 1, 16, 32>}, {transform_indices = @transform_1, window_bounds = array<i64: 1, 16, 1>}, {pipeline_mode = #tpu.pipeline_mode<synchronous>, transform_indices = @transform_2, window_bounds = array<i64: 32, 256>}, {pipeline_mode = #tpu.pipeline_mode<synchronous>, transform_indices = @transform_3, window_bounds = array<i64: 1, 256>}, {pipeline_mode = #tpu.pipeline_mode<synchronous>, transform_indices = @transform_4, window_bounds = array<i64: 32, 128>}, {pipeline_mode = #tpu.pipeline_mode<synchronous>, transform_indices = @transform_5, window_bounds = array<i64: 32, 128>}, {pipeline_mode = #tpu.pipeline_mode<synchronous>, transform_indices = @transform_6, window_bounds = array<i64: 2, 32>}, {pipeline_mode = #tpu.pipeline_mode<synchronous>, transform_indices = @transform_7, window_bounds = array<i64: 2, 32>}, {pipeline_mode = #tpu.pipeline_mode<synchronous>, transform_indices = @transform_8, window_bounds = array<i64: 32, 32>}, {pipeline_mode = #tpu.pipeline_mode<synchronous>, transform_indices = @transform_9, window_bounds = array<i64: 32, 32>}, {pipeline_mode = #tpu.pipeline_mode<synchronous>, transform_indices = @transform_10, window_bounds = array<i64: 1, 32>}, {pipeline_mode = #tpu.pipeline_mode<synchronous>, transform_indices = @transform_11, window_bounds = array<i64: 32, 16>}, {pipeline_mode = #tpu.pipeline_mode<synchronous>, transform_indices = @transform_12, window_bounds = array<i64: 1, 16>}, {pipeline_mode = #tpu.pipeline_mode<synchronous>, transform_indices = @transform_13, window_bounds = array<i64: 32, 32>}, {pipeline_mode = #tpu.pipeline_mode<synchronous>, transform_indices = @transform_14, window_bounds = array<i64: 16, 32>}, {pipeline_mode = #tpu.pipeline_mode<synchronous>, transform_indices = @transform_15, window_bounds = array<i64: 1, 32>}, {pipeline_mode = #tpu.pipeline_mode<synchronous>, transform_indices = @transform_16, window_bounds = array<i64: 64, 128>}, {pipeline_mode = #tpu.pipeline_mode<synchronous>, transform_indices = @transform_17, window_bounds = array<i64: 32, 128>}, {pipeline_mode = #tpu.pipeline_mode<synchronous>, transform_indices = @transform_18, window_bounds = array<i64: 1, 128>}, {pipeline_mode = #tpu.pipeline_mode<synchronous>, transform_indices = @transform_19, window_bounds = array<i64: 16, 16>}, {pipeline_mode = #tpu.pipeline_mode<synchronous>, transform_indices = @transform_20, window_bounds = array<i64: 1, 16>}, {transform_indices = @transform_21, window_bounds = array<i64: 1, 2, 128>}]} {
    %c0 = arith.constant 0 : index
    %c0_0 = arith.constant 0 : index
    %c0_1 = arith.constant 0 : index
    %0 = vector.load %arg2[%c0, %c0_0, %c0_1] : memref<1x16x1xf32, #tpu.memory_space<vmem>>, vector<1x16x1xf32>
    %1 = vector.shape_cast %0 : vector<1x16x1xf32> to vector<16x1xf32>
    %cst = arith.constant 0.000000e+00 : f32
    %2 = vector.broadcast %cst : f32 to vector<16x1xf32>
    %3 = arith.cmpf ogt, %1, %2 : vector<16x1xf32>
    %c0_2 = arith.constant 0 : index
    %c0_3 = arith.constant 0 : index
    %4 = vector.load %arg5[%c0_2, %c0_3] : memref<32x128xf32, #tpu.memory_space<vmem>>, vector<32x128xf32>
    %c0_4 = arith.constant 0 : index
    %c0_5 = arith.constant 0 : index
    %5 = vector.load %arg6[%c0_4, %c0_5] : memref<32x128xf32, #tpu.memory_space<vmem>>, vector<32x128xf32>
    %c0_6 = arith.constant 0 : index
    %c0_7 = arith.constant 0 : index
    %6 = vector.load %arg12[%c0_6, %c0_7] : memref<32x16xf32, #tpu.memory_space<vmem>>, vector<32x16xf32>
    %c0_8 = arith.constant 0 : index
    %c0_9 = arith.constant 0 : index
    %7 = vector.load %arg13[%c0_8, %c0_9] : memref<1x16xf32, #tpu.memory_space<vmem>>, vector<1x16xf32>
    %c0_10 = arith.constant 0 : index
    %c0_11 = arith.constant 0 : index
    %8 = vector.load %arg14[%c0_10, %c0_11] : memref<32x32xf32, #tpu.memory_space<vmem>>, vector<32x32xf32>
    %c0_12 = arith.constant 0 : index
    %c0_13 = arith.constant 0 : index
    %9 = vector.load %arg15[%c0_12, %c0_13] : memref<16x32xf32, #tpu.memory_space<vmem>>, vector<16x32xf32>
    %c0_14 = arith.constant 0 : index
    %c0_15 = arith.constant 0 : index
    %10 = vector.load %arg16[%c0_14, %c0_15] : memref<1x32xf32, #tpu.memory_space<vmem>>, vector<1x32xf32>
    %c0_16 = arith.constant 0 : index
    %c0_17 = arith.constant 0 : index
    %11 = vector.load %arg18[%c0_16, %c0_17] : memref<32x128xf32, #tpu.memory_space<vmem>>, vector<32x128xf32>
    %c0_18 = arith.constant 0 : index
    %c0_19 = arith.constant 0 : index
    %12 = vector.load %arg19[%c0_18, %c0_19] : memref<1x128xf32, #tpu.memory_space<vmem>>, vector<1x128xf32>
    %c0_20 = arith.constant 0 : index
    %c0_21 = arith.constant 0 : index
    %13 = vector.load %arg20[%c0_20, %c0_21] : memref<16x16xf32, #tpu.memory_space<vmem>>, vector<16x16xf32>
    %c0_22 = arith.constant 0 : index
    %c0_23 = arith.constant 0 : index
    %14 = vector.load %arg21[%c0_22, %c0_23] : memref<1x16xf32, #tpu.memory_space<vmem>>, vector<1x16xf32>
    %c0_24 = arith.constant 0 : index
    %c0_25 = arith.constant 0 : index
    %c0_26 = arith.constant 0 : index
    %15 = vector.load %arg1[%c0_24, %c0_25, %c0_26] : memref<1x16x32xbf16, #tpu.memory_space<vmem>>, vector<1x16x32xbf16>
    %16 = vector.shape_cast %15 : vector<1x16x32xbf16> to vector<16x32xbf16>
    %c0_27 = arith.constant 0 : index
    %c0_28 = arith.constant 0 : index
    %17 = vector.load %arg3[%c0_27, %c0_28] : memref<32x256xbf16, #tpu.memory_space<vmem>>, vector<32x256xbf16>
    %cst_29 = arith.constant dense<0.000000e+00> : vector<16x256xf32>
    %18 = tpu.matmul %16, %17, %cst_29 {dimension_numbers = #tpu.dot_dimension_numbers<[1], [0], [0], [1], [0, 0, 1, 1], [], []>} : vector<16x32xbf16>, vector<32x256xbf16>, vector<16x256xf32> -> vector<16x256xf32>
    %c0_30 = arith.constant 0 : index
    %c0_31 = arith.constant 0 : index
    %19 = vector.load %arg4[%c0_30, %c0_31] : memref<1x256xf32, #tpu.memory_space<vmem>>, vector<1x256xf32>
    %20 = vector.broadcast %19 : vector<1x256xf32> to vector<16x256xf32>
    %21 = arith.addf %18, %20 : vector<16x256xf32>
    %c0_32 = arith.constant 0 : index
    %c0_33 = arith.constant 0 : index
    %22 = vector.load %arg7[%c0_32, %c0_33] : memref<2x32xf32, #tpu.memory_space<vmem>>, vector<1x32xf32>
    %23 = vector.shape_cast %22 : vector<1x32xf32> to vector<1x32xf32>
    %24 = vector.broadcast %23 : vector<1x32xf32> to vector<2x32xf32>
    %c0_34 = arith.constant 0 : index
    %c0_35 = arith.constant 0 : index
    %25 = vector.load %arg8[%c0_34, %c0_35] : memref<2x32xf32, #tpu.memory_space<vmem>>, vector<1x32xf32>
    %26 = vector.shape_cast %25 : vector<1x32xf32> to vector<1x32xf32>
    %27 = vector.broadcast %26 : vector<1x32xf32> to vector<2x32xf32>
    %28 = vector.extract_strided_slice %3 {offsets = [0, 0], sizes = [2, 1], strides = [1, 1]} : vector<16x1xi1> to vector<2x1xi1>
    %29 = vector.extract_strided_slice %21 {offsets = [0, 0], sizes = [2, 128], strides = [1, 1]} : vector<16x256xf32> to vector<2x128xf32>
    %cst_36 = arith.constant dense<0.000000e+00> : vector<2x128xf32>
    %30 = tpu.matmul %24, %4, %cst_36 {dimension_numbers = #tpu.dot_dimension_numbers<[1], [0], [0], [1], [0, 0, 1, 1], [], []>} : vector<2x32xf32>, vector<32x128xf32>, vector<2x128xf32> -> vector<2x128xf32>
    %31 = arith.addf %29, %30 : vector<2x128xf32>
    %32 = vector.extract_strided_slice %31 {offsets = [0, 0], sizes = [2, 32], strides = [1, 1]} : vector<2x128xf32> to vector<2x32xf32>
    %33 = arith.negf %32 : vector<2x32xf32>
    %34 = math.exp %33 : vector<2x32xf32>
    %cst_37 = arith.constant 1.000000e+00 : f32
    %35 = vector.broadcast %cst_37 : f32 to vector<2x32xf32>
    %36 = arith.addf %35, %34 : vector<2x32xf32>
    %37 = arith.divf %35, %36 : vector<2x32xf32>
    %38 = vector.extract_strided_slice %31 {offsets = [0, 32], sizes = [2, 32], strides = [1, 1]} : vector<2x128xf32> to vector<2x32xf32>
    %39 = arith.negf %38 : vector<2x32xf32>
    %40 = math.exp %39 : vector<2x32xf32>
    %cst_38 = arith.constant 1.000000e+00 : f32
    %41 = vector.broadcast %cst_38 : f32 to vector<2x32xf32>
    %42 = arith.addf %41, %40 : vector<2x32xf32>
    %43 = arith.divf %41, %42 : vector<2x32xf32>
    %44 = vector.extract_strided_slice %31 {offsets = [0, 64], sizes = [2, 32], strides = [1, 1]} : vector<2x128xf32> to vector<2x32xf32>
    %45 = math.tanh %44 : vector<2x32xf32>
    %46 = vector.extract_strided_slice %31 {offsets = [0, 96], sizes = [2, 32], strides = [1, 1]} : vector<2x128xf32> to vector<2x32xf32>
    %47 = arith.negf %46 : vector<2x32xf32>
    %48 = math.exp %47 : vector<2x32xf32>
    %cst_39 = arith.constant 1.000000e+00 : f32
    %49 = vector.broadcast %cst_39 : f32 to vector<2x32xf32>
    %50 = arith.addf %49, %48 : vector<2x32xf32>
    %51 = arith.divf %49, %50 : vector<2x32xf32>
    %52 = arith.mulf %43, %27 : vector<2x32xf32>
    %53 = arith.mulf %37, %45 : vector<2x32xf32>
    %54 = arith.addf %52, %53 : vector<2x32xf32>
    %55 = math.tanh %54 : vector<2x32xf32>
    %56 = arith.mulf %51, %55 : vector<2x32xf32>
    %57 = vector.shape_cast %28 : vector<2x1xi1> to vector<2x1xi1>
    %58 = vector.broadcast %57 : vector<2x1xi1> to vector<2x32xi1>
    %59 = arith.select %58, %56, %24 : vector<2x32xi1>, vector<2x32xf32>
    %60 = vector.shape_cast %28 : vector<2x1xi1> to vector<2x1xi1>
    %61 = vector.broadcast %60 : vector<2x1xi1> to vector<2x32xi1>
    %62 = arith.select %61, %54, %27 : vector<2x32xi1>, vector<2x32xf32>
    %cst_40 = arith.constant 0.000000e+00 : f32
    %63 = vector.shape_cast %28 : vector<2x1xi1> to vector<2x1xi1>
    %64 = vector.broadcast %63 : vector<2x1xi1> to vector<2x32xi1>
    %65 = vector.broadcast %cst_40 : f32 to vector<2x32xf32>
    %66 = arith.select %64, %56, %65 : vector<2x32xi1>, vector<2x32xf32>
    %c0_41 = arith.constant 0 : index
    %c0_42 = arith.constant 0 : index
    %67 = vector.load %arg23[%c0_41, %c0_42] : memref<16x64xf32, #tpu.memory_space<vmem>>, vector<2x32xf32>
    tpu.vector_store %arg23[%c0_41, %c0_42], %66 {strides = array<i32>} : memref<16x64xf32, #tpu.memory_space<vmem>>, vector<2x32xf32>,
    %68 = vector.extract_strided_slice %3 {offsets = [2, 0], sizes = [2, 1], strides = [1, 1]} : vector<16x1xi1> to vector<2x1xi1>
    %69 = vector.extract_strided_slice %21 {offsets = [2, 0], sizes = [2, 128], strides = [1, 1]} : vector<16x256xf32> to vector<2x128xf32>
    %cst_43 = arith.constant dense<0.000000e+00> : vector<2x128xf32>
    %70 = tpu.matmul %59, %4, %cst_43 {dimension_numbers = #tpu.dot_dimension_numbers<[1], [0], [0], [1], [0, 0, 1, 1], [], []>} : vector<2x32xf32>, vector<32x128xf32>, vector<2x128xf32> -> vector<2x128xf32>
    %71 = arith.addf %69, %70 : vector<2x128xf32>
    %72 = vector.extract_strided_slice %71 {offsets = [0, 0], sizes = [2, 32], strides = [1, 1]} : vector<2x128xf32> to vector<2x32xf32>
    %73 = arith.negf %72 : vector<2x32xf32>
    %74 = math.exp %73 : vector<2x32xf32>
    %cst_44 = arith.constant 1.000000e+00 : f32
    %75 = vector.broadcast %cst_44 : f32 to vector<2x32xf32>
    %76 = arith.addf %75, %74 : vector<2x32xf32>
    %77 = arith.divf %75, %76 : vector<2x32xf32>
    %78 = vector.extract_strided_slice %71 {offsets = [0, 32], sizes = [2, 32], strides = [1, 1]} : vector<2x128xf32> to vector<2x32xf32>
    %79 = arith.negf %78 : vector<2x32xf32>
    %80 = math.exp %79 : vector<2x32xf32>
    %cst_45 = arith.constant 1.000000e+00 : f32
    %81 = vector.broadcast %cst_45 : f32 to vector<2x32xf32>
    %82 = arith.addf %81, %80 : vector<2x32xf32>
    %83 = arith.divf %81, %82 : vector<2x32xf32>
    %84 = vector.extract_strided_slice %71 {offsets = [0, 64], sizes = [2, 32], strides = [1, 1]} : vector<2x128xf32> to vector<2x32xf32>
    %85 = math.tanh %84 : vector<2x32xf32>
    %86 = vector.extract_strided_slice %71 {offsets = [0, 96], sizes = [2, 32], strides = [1, 1]} : vector<2x128xf32> to vector<2x32xf32>
    %87 = arith.negf %86 : vector<2x32xf32>
    %88 = math.exp %87 : vector<2x32xf32>
    %cst_46 = arith.constant 1.000000e+00 : f32
    %89 = vector.broadcast %cst_46 : f32 to vector<2x32xf32>
    %90 = arith.addf %89, %88 : vector<2x32xf32>
    %91 = arith.divf %89, %90 : vector<2x32xf32>
    %92 = arith.mulf %83, %62 : vector<2x32xf32>
    %93 = arith.mulf %77, %85 : vector<2x32xf32>
    %94 = arith.addf %92, %93 : vector<2x32xf32>
    %95 = math.tanh %94 : vector<2x32xf32>
    %96 = arith.mulf %91, %95 : vector<2x32xf32>
    %97 = vector.shape_cast %68 : vector<2x1xi1> to vector<2x1xi1>
    %98 = vector.broadcast %97 : vector<2x1xi1> to vector<2x32xi1>
    %99 = arith.select %98, %96, %59 : vector<2x32xi1>, vector<2x32xf32>
    %100 = vector.shape_cast %68 : vector<2x1xi1> to vector<2x1xi1>
    %101 = vector.broadcast %100 : vector<2x1xi1> to vector<2x32xi1>
    %102 = arith.select %101, %94, %62 : vector<2x32xi1>, vector<2x32xf32>
    %cst_47 = arith.constant 0.000000e+00 : f32
    %103 = vector.shape_cast %68 : vector<2x1xi1> to vector<2x1xi1>
    %104 = vector.broadcast %103 : vector<2x1xi1> to vector<2x32xi1>
    %105 = vector.broadcast %cst_47 : f32 to vector<2x32xf32>
    %106 = arith.select %104, %96, %105 : vector<2x32xi1>, vector<2x32xf32>
    %c2 = arith.constant 2 : index
    %c0_48 = arith.constant 0 : index
    %107 = vector.load %arg23[%c2, %c0_48] : memref<16x64xf32, #tpu.memory_space<vmem>>, vector<2x32xf32>
    tpu.vector_store %arg23[%c2, %c0_48], %106 {strides = array<i32>} : memref<16x64xf32, #tpu.memory_space<vmem>>, vector<2x32xf32>,
    %108 = vector.extract_strided_slice %3 {offsets = [4, 0], sizes = [2, 1], strides = [1, 1]} : vector<16x1xi1> to vector<2x1xi1>
    %109 = vector.extract_strided_slice %21 {offsets = [4, 0], sizes = [2, 128], strides = [1, 1]} : vector<16x256xf32> to vector<2x128xf32>
    %cst_49 = arith.constant dense<0.000000e+00> : vector<2x128xf32>
    %110 = tpu.matmul %99, %4, %cst_49 {dimension_numbers = #tpu.dot_dimension_numbers<[1], [0], [0], [1], [0, 0, 1, 1], [], []>} : vector<2x32xf32>, vector<32x128xf32>, vector<2x128xf32> -> vector<2x128xf32>
    %111 = arith.addf %109, %110 : vector<2x128xf32>
    %112 = vector.extract_strided_slice %111 {offsets = [0, 0], sizes = [2, 32], strides = [1, 1]} : vector<2x128xf32> to vector<2x32xf32>
    %113 = arith.negf %112 : vector<2x32xf32>
    %114 = math.exp %113 : vector<2x32xf32>
    %cst_50 = arith.constant 1.000000e+00 : f32
    %115 = vector.broadcast %cst_50 : f32 to vector<2x32xf32>
    %116 = arith.addf %115, %114 : vector<2x32xf32>
    %117 = arith.divf %115, %116 : vector<2x32xf32>
    %118 = vector.extract_strided_slice %111 {offsets = [0, 32], sizes = [2, 32], strides = [1, 1]} : vector<2x128xf32> to vector<2x32xf32>
    %119 = arith.negf %118 : vector<2x32xf32>
    %120 = math.exp %119 : vector<2x32xf32>
    %cst_51 = arith.constant 1.000000e+00 : f32
    %121 = vector.broadcast %cst_51 : f32 to vector<2x32xf32>
    %122 = arith.addf %121, %120 : vector<2x32xf32>
    %123 = arith.divf %121, %122 : vector<2x32xf32>
    %124 = vector.extract_strided_slice %111 {offsets = [0, 64], sizes = [2, 32], strides = [1, 1]} : vector<2x128xf32> to vector<2x32xf32>
    %125 = math.tanh %124 : vector<2x32xf32>
    %126 = vector.extract_strided_slice %111 {offsets = [0, 96], sizes = [2, 32], strides = [1, 1]} : vector<2x128xf32> to vector<2x32xf32>
    %127 = arith.negf %126 : vector<2x32xf32>
    %128 = math.exp %127 : vector<2x32xf32>
    %cst_52 = arith.constant 1.000000e+00 : f32
    %129 = vector.broadcast %cst_52 : f32 to vector<2x32xf32>
    %130 = arith.addf %129, %128 : vector<2x32xf32>
    %131 = arith.divf %129, %130 : vector<2x32xf32>
    %132 = arith.mulf %123, %102 : vector<2x32xf32>
    %133 = arith.mulf %117, %125 : vector<2x32xf32>
    %134 = arith.addf %132, %133 : vector<2x32xf32>
    %135 = math.tanh %134 : vector<2x32xf32>
    %136 = arith.mulf %131, %135 : vector<2x32xf32>
    %137 = vector.shape_cast %108 : vector<2x1xi1> to vector<2x1xi1>
    %138 = vector.broadcast %137 : vector<2x1xi1> to vector<2x32xi1>
    %139 = arith.select %138, %136, %99 : vector<2x32xi1>, vector<2x32xf32>
    %140 = vector.shape_cast %108 : vector<2x1xi1> to vector<2x1xi1>
    %141 = vector.broadcast %140 : vector<2x1xi1> to vector<2x32xi1>
    %142 = arith.select %141, %134, %102 : vector<2x32xi1>, vector<2x32xf32>
    %cst_53 = arith.constant 0.000000e+00 : f32
    %143 = vector.shape_cast %108 : vector<2x1xi1> to vector<2x1xi1>
    %144 = vector.broadcast %143 : vector<2x1xi1> to vector<2x32xi1>
    %145 = vector.broadcast %cst_53 : f32 to vector<2x32xf32>
    %146 = arith.select %144, %136, %145 : vector<2x32xi1>, vector<2x32xf32>
    %c4 = arith.constant 4 : index
    %c0_54 = arith.constant 0 : index
    %147 = vector.load %arg23[%c4, %c0_54] : memref<16x64xf32, #tpu.memory_space<vmem>>, vector<2x32xf32>
    tpu.vector_store %arg23[%c4, %c0_54], %146 {strides = array<i32>} : memref<16x64xf32, #tpu.memory_space<vmem>>, vector<2x32xf32>,
    %148 = vector.extract_strided_slice %3 {offsets = [6, 0], sizes = [2, 1], strides = [1, 1]} : vector<16x1xi1> to vector<2x1xi1>
    %149 = vector.extract_strided_slice %21 {offsets = [6, 0], sizes = [2, 128], strides = [1, 1]} : vector<16x256xf32> to vector<2x128xf32>
    %cst_55 = arith.constant dense<0.000000e+00> : vector<2x128xf32>
    %150 = tpu.matmul %139, %4, %cst_55 {dimension_numbers = #tpu.dot_dimension_numbers<[1], [0], [0], [1], [0, 0, 1, 1], [], []>} : vector<2x32xf32>, vector<32x128xf32>, vector<2x128xf32> -> vector<2x128xf32>
    %151 = arith.addf %149, %150 : vector<2x128xf32>
    %152 = vector.extract_strided_slice %151 {offsets = [0, 0], sizes = [2, 32], strides = [1, 1]} : vector<2x128xf32> to vector<2x32xf32>
    %153 = arith.negf %152 : vector<2x32xf32>
    %154 = math.exp %153 : vector<2x32xf32>
    %cst_56 = arith.constant 1.000000e+00 : f32
    %155 = vector.broadcast %cst_56 : f32 to vector<2x32xf32>
    %156 = arith.addf %155, %154 : vector<2x32xf32>
    %157 = arith.divf %155, %156 : vector<2x32xf32>
    %158 = vector.extract_strided_slice %151 {offsets = [0, 32], sizes = [2, 32], strides = [1, 1]} : vector<2x128xf32> to vector<2x32xf32>
    %159 = arith.negf %158 : vector<2x32xf32>
    %160 = math.exp %159 : vector<2x32xf32>
    %cst_57 = arith.constant 1.000000e+00 : f32
    %161 = vector.broadcast %cst_57 : f32 to vector<2x32xf32>
    %162 = arith.addf %161, %160 : vector<2x32xf32>
    %163 = arith.divf %161, %162 : vector<2x32xf32>
    %164 = vector.extract_strided_slice %151 {offsets = [0, 64], sizes = [2, 32], strides = [1, 1]} : vector<2x128xf32> to vector<2x32xf32>
    %165 = math.tanh %164 : vector<2x32xf32>
    %166 = vector.extract_strided_slice %151 {offsets = [0, 96], sizes = [2, 32], strides = [1, 1]} : vector<2x128xf32> to vector<2x32xf32>
    %167 = arith.negf %166 : vector<2x32xf32>
    %168 = math.exp %167 : vector<2x32xf32>
    %cst_58 = arith.constant 1.000000e+00 : f32
    %169 = vector.broadcast %cst_58 : f32 to vector<2x32xf32>
    %170 = arith.addf %169, %168 : vector<2x32xf32>
    %171 = arith.divf %169, %170 : vector<2x32xf32>
    %172 = arith.mulf %163, %142 : vector<2x32xf32>
    %173 = arith.mulf %157, %165 : vector<2x32xf32>
    %174 = arith.addf %172, %173 : vector<2x32xf32>
    %175 = math.tanh %174 : vector<2x32xf32>
    %176 = arith.mulf %171, %175 : vector<2x32xf32>
    %177 = vector.shape_cast %148 : vector<2x1xi1> to vector<2x1xi1>
    %178 = vector.broadcast %177 : vector<2x1xi1> to vector<2x32xi1>
    %179 = arith.select %178, %176, %139 : vector<2x32xi1>, vector<2x32xf32>
    %180 = vector.shape_cast %148 : vector<2x1xi1> to vector<2x1xi1>
    %181 = vector.broadcast %180 : vector<2x1xi1> to vector<2x32xi1>
    %182 = arith.select %181, %174, %142 : vector<2x32xi1>, vector<2x32xf32>
    %cst_59 = arith.constant 0.000000e+00 : f32
    %183 = vector.shape_cast %148 : vector<2x1xi1> to vector<2x1xi1>
    %184 = vector.broadcast %183 : vector<2x1xi1> to vector<2x32xi1>
    %185 = vector.broadcast %cst_59 : f32 to vector<2x32xf32>
    %186 = arith.select %184, %176, %185 : vector<2x32xi1>, vector<2x32xf32>
    %c6 = arith.constant 6 : index
    %c0_60 = arith.constant 0 : index
    %187 = vector.load %arg23[%c6, %c0_60] : memref<16x64xf32, #tpu.memory_space<vmem>>, vector<2x32xf32>
    tpu.vector_store %arg23[%c6, %c0_60], %186 {strides = array<i32>} : memref<16x64xf32, #tpu.memory_space<vmem>>, vector<2x32xf32>,
    %188 = vector.extract_strided_slice %3 {offsets = [8, 0], sizes = [2, 1], strides = [1, 1]} : vector<16x1xi1> to vector<2x1xi1>
    %189 = vector.extract_strided_slice %21 {offsets = [8, 0], sizes = [2, 128], strides = [1, 1]} : vector<16x256xf32> to vector<2x128xf32>
    %cst_61 = arith.constant dense<0.000000e+00> : vector<2x128xf32>
    %190 = tpu.matmul %179, %4, %cst_61 {dimension_numbers = #tpu.dot_dimension_numbers<[1], [0], [0], [1], [0, 0, 1, 1], [], []>} : vector<2x32xf32>, vector<32x128xf32>, vector<2x128xf32> -> vector<2x128xf32>
    %191 = arith.addf %189, %190 : vector<2x128xf32>
    %192 = vector.extract_strided_slice %191 {offsets = [0, 0], sizes = [2, 32], strides = [1, 1]} : vector<2x128xf32> to vector<2x32xf32>
    %193 = arith.negf %192 : vector<2x32xf32>
    %194 = math.exp %193 : vector<2x32xf32>
    %cst_62 = arith.constant 1.000000e+00 : f32
    %195 = vector.broadcast %cst_62 : f32 to vector<2x32xf32>
    %196 = arith.addf %195, %194 : vector<2x32xf32>
    %197 = arith.divf %195, %196 : vector<2x32xf32>
    %198 = vector.extract_strided_slice %191 {offsets = [0, 32], sizes = [2, 32], strides = [1, 1]} : vector<2x128xf32> to vector<2x32xf32>
    %199 = arith.negf %198 : vector<2x32xf32>
    %200 = math.exp %199 : vector<2x32xf32>
    %cst_63 = arith.constant 1.000000e+00 : f32
    %201 = vector.broadcast %cst_63 : f32 to vector<2x32xf32>
    %202 = arith.addf %201, %200 : vector<2x32xf32>
    %203 = arith.divf %201, %202 : vector<2x32xf32>
    %204 = vector.extract_strided_slice %191 {offsets = [0, 64], sizes = [2, 32], strides = [1, 1]} : vector<2x128xf32> to vector<2x32xf32>
    %205 = math.tanh %204 : vector<2x32xf32>
    %206 = vector.extract_strided_slice %191 {offsets = [0, 96], sizes = [2, 32], strides = [1, 1]} : vector<2x128xf32> to vector<2x32xf32>
    %207 = arith.negf %206 : vector<2x32xf32>
    %208 = math.exp %207 : vector<2x32xf32>
    %cst_64 = arith.constant 1.000000e+00 : f32
    %209 = vector.broadcast %cst_64 : f32 to vector<2x32xf32>
    %210 = arith.addf %209, %208 : vector<2x32xf32>
    %211 = arith.divf %209, %210 : vector<2x32xf32>
    %212 = arith.mulf %203, %182 : vector<2x32xf32>
    %213 = arith.mulf %197, %205 : vector<2x32xf32>
    %214 = arith.addf %212, %213 : vector<2x32xf32>
    %215 = math.tanh %214 : vector<2x32xf32>
    %216 = arith.mulf %211, %215 : vector<2x32xf32>
    %217 = vector.shape_cast %188 : vector<2x1xi1> to vector<2x1xi1>
    %218 = vector.broadcast %217 : vector<2x1xi1> to vector<2x32xi1>
    %219 = arith.select %218, %216, %179 : vector<2x32xi1>, vector<2x32xf32>
    %220 = vector.shape_cast %188 : vector<2x1xi1> to vector<2x1xi1>
    %221 = vector.broadcast %220 : vector<2x1xi1> to vector<2x32xi1>
    %222 = arith.select %221, %214, %182 : vector<2x32xi1>, vector<2x32xf32>
    %cst_65 = arith.constant 0.000000e+00 : f32
    %223 = vector.shape_cast %188 : vector<2x1xi1> to vector<2x1xi1>
    %224 = vector.broadcast %223 : vector<2x1xi1> to vector<2x32xi1>
    %225 = vector.broadcast %cst_65 : f32 to vector<2x32xf32>
    %226 = arith.select %224, %216, %225 : vector<2x32xi1>, vector<2x32xf32>
    %c8 = arith.constant 8 : index
    %c0_66 = arith.constant 0 : index
    %227 = vector.load %arg23[%c8, %c0_66] : memref<16x64xf32, #tpu.memory_space<vmem>>, vector<2x32xf32>
    tpu.vector_store %arg23[%c8, %c0_66], %226 {strides = array<i32>} : memref<16x64xf32, #tpu.memory_space<vmem>>, vector<2x32xf32>,
    %228 = vector.extract_strided_slice %3 {offsets = [10, 0], sizes = [2, 1], strides = [1, 1]} : vector<16x1xi1> to vector<2x1xi1>
    %229 = vector.extract_strided_slice %21 {offsets = [10, 0], sizes = [2, 128], strides = [1, 1]} : vector<16x256xf32> to vector<2x128xf32>
    %cst_67 = arith.constant dense<0.000000e+00> : vector<2x128xf32>
    %230 = tpu.matmul %219, %4, %cst_67 {dimension_numbers = #tpu.dot_dimension_numbers<[1], [0], [0], [1], [0, 0, 1, 1], [], []>} : vector<2x32xf32>, vector<32x128xf32>, vector<2x128xf32> -> vector<2x128xf32>
    %231 = arith.addf %229, %230 : vector<2x128xf32>
    %232 = vector.extract_strided_slice %231 {offsets = [0, 0], sizes = [2, 32], strides = [1, 1]} : vector<2x128xf32> to vector<2x32xf32>
    %233 = arith.negf %232 : vector<2x32xf32>
    %234 = math.exp %233 : vector<2x32xf32>
    %cst_68 = arith.constant 1.000000e+00 : f32
    %235 = vector.broadcast %cst_68 : f32 to vector<2x32xf32>
    %236 = arith.addf %235, %234 : vector<2x32xf32>
    %237 = arith.divf %235, %236 : vector<2x32xf32>
    %238 = vector.extract_strided_slice %231 {offsets = [0, 32], sizes = [2, 32], strides = [1, 1]} : vector<2x128xf32> to vector<2x32xf32>
    %239 = arith.negf %238 : vector<2x32xf32>
    %240 = math.exp %239 : vector<2x32xf32>
    %cst_69 = arith.constant 1.000000e+00 : f32
    %241 = vector.broadcast %cst_69 : f32 to vector<2x32xf32>
    %242 = arith.addf %241, %240 : vector<2x32xf32>
    %243 = arith.divf %241, %242 : vector<2x32xf32>
    %244 = vector.extract_strided_slice %231 {offsets = [0, 64], sizes = [2, 32], strides = [1, 1]} : vector<2x128xf32> to vector<2x32xf32>
    %245 = math.tanh %244 : vector<2x32xf32>
    %246 = vector.extract_strided_slice %231 {offsets = [0, 96], sizes = [2, 32], strides = [1, 1]} : vector<2x128xf32> to vector<2x32xf32>
    %247 = arith.negf %246 : vector<2x32xf32>
    %248 = math.exp %247 : vector<2x32xf32>
    %cst_70 = arith.constant 1.000000e+00 : f32
    %249 = vector.broadcast %cst_70 : f32 to vector<2x32xf32>
    %250 = arith.addf %249, %248 : vector<2x32xf32>
    %251 = arith.divf %249, %250 : vector<2x32xf32>
    %252 = arith.mulf %243, %222 : vector<2x32xf32>
    %253 = arith.mulf %237, %245 : vector<2x32xf32>
    %254 = arith.addf %252, %253 : vector<2x32xf32>
    %255 = math.tanh %254 : vector<2x32xf32>
    %256 = arith.mulf %251, %255 : vector<2x32xf32>
    %257 = vector.shape_cast %228 : vector<2x1xi1> to vector<2x1xi1>
    %258 = vector.broadcast %257 : vector<2x1xi1> to vector<2x32xi1>
    %259 = arith.select %258, %256, %219 : vector<2x32xi1>, vector<2x32xf32>
    %260 = vector.shape_cast %228 : vector<2x1xi1> to vector<2x1xi1>
    %261 = vector.broadcast %260 : vector<2x1xi1> to vector<2x32xi1>
    %262 = arith.select %261, %254, %222 : vector<2x32xi1>, vector<2x32xf32>
    %cst_71 = arith.constant 0.000000e+00 : f32
    %263 = vector.shape_cast %228 : vector<2x1xi1> to vector<2x1xi1>
    %264 = vector.broadcast %263 : vector<2x1xi1> to vector<2x32xi1>
    %265 = vector.broadcast %cst_71 : f32 to vector<2x32xf32>
    %266 = arith.select %264, %256, %265 : vector<2x32xi1>, vector<2x32xf32>
    %c10 = arith.constant 10 : index
    %c0_72 = arith.constant 0 : index
    %267 = vector.load %arg23[%c10, %c0_72] : memref<16x64xf32, #tpu.memory_space<vmem>>, vector<2x32xf32>
    tpu.vector_store %arg23[%c10, %c0_72], %266 {strides = array<i32>} : memref<16x64xf32, #tpu.memory_space<vmem>>, vector<2x32xf32>,
    %268 = vector.extract_strided_slice %3 {offsets = [12, 0], sizes = [2, 1], strides = [1, 1]} : vector<16x1xi1> to vector<2x1xi1>
    %269 = vector.extract_strided_slice %21 {offsets = [12, 0], sizes = [2, 128], strides = [1, 1]} : vector<16x256xf32> to vector<2x128xf32>
    %cst_73 = arith.constant dense<0.000000e+00> : vector<2x128xf32>
    %270 = tpu.matmul %259, %4, %cst_73 {dimension_numbers = #tpu.dot_dimension_numbers<[1], [0], [0], [1], [0, 0, 1, 1], [], []>} : vector<2x32xf32>, vector<32x128xf32>, vector<2x128xf32> -> vector<2x128xf32>
    %271 = arith.addf %269, %270 : vector<2x128xf32>
    %272 = vector.extract_strided_slice %271 {offsets = [0, 0], sizes = [2, 32], strides = [1, 1]} : vector<2x128xf32> to vector<2x32xf32>
    %273 = arith.negf %272 : vector<2x32xf32>
    %274 = math.exp %273 : vector<2x32xf32>
    %cst_74 = arith.constant 1.000000e+00 : f32
    %275 = vector.broadcast %cst_74 : f32 to vector<2x32xf32>
    %276 = arith.addf %275, %274 : vector<2x32xf32>
    %277 = arith.divf %275, %276 : vector<2x32xf32>
    %278 = vector.extract_strided_slice %271 {offsets = [0, 32], sizes = [2, 32], strides = [1, 1]} : vector<2x128xf32> to vector<2x32xf32>
    %279 = arith.negf %278 : vector<2x32xf32>
    %280 = math.exp %279 : vector<2x32xf32>
    %cst_75 = arith.constant 1.000000e+00 : f32
    %281 = vector.broadcast %cst_75 : f32 to vector<2x32xf32>
    %282 = arith.addf %281, %280 : vector<2x32xf32>
    %283 = arith.divf %281, %282 : vector<2x32xf32>
    %284 = vector.extract_strided_slice %271 {offsets = [0, 64], sizes = [2, 32], strides = [1, 1]} : vector<2x128xf32> to vector<2x32xf32>
    %285 = math.tanh %284 : vector<2x32xf32>
    %286 = vector.extract_strided_slice %271 {offsets = [0, 96], sizes = [2, 32], strides = [1, 1]} : vector<2x128xf32> to vector<2x32xf32>
    %287 = arith.negf %286 : vector<2x32xf32>
    %288 = math.exp %287 : vector<2x32xf32>
    %cst_76 = arith.constant 1.000000e+00 : f32
    %289 = vector.broadcast %cst_76 : f32 to vector<2x32xf32>
    %290 = arith.addf %289, %288 : vector<2x32xf32>
    %291 = arith.divf %289, %290 : vector<2x32xf32>
    %292 = arith.mulf %283, %262 : vector<2x32xf32>
    %293 = arith.mulf %277, %285 : vector<2x32xf32>
    %294 = arith.addf %292, %293 : vector<2x32xf32>
    %295 = math.tanh %294 : vector<2x32xf32>
    %296 = arith.mulf %291, %295 : vector<2x32xf32>
    %297 = vector.shape_cast %268 : vector<2x1xi1> to vector<2x1xi1>
    %298 = vector.broadcast %297 : vector<2x1xi1> to vector<2x32xi1>
    %299 = arith.select %298, %296, %259 : vector<2x32xi1>, vector<2x32xf32>
    %300 = vector.shape_cast %268 : vector<2x1xi1> to vector<2x1xi1>
    %301 = vector.broadcast %300 : vector<2x1xi1> to vector<2x32xi1>
    %302 = arith.select %301, %294, %262 : vector<2x32xi1>, vector<2x32xf32>
    %cst_77 = arith.constant 0.000000e+00 : f32
    %303 = vector.shape_cast %268 : vector<2x1xi1> to vector<2x1xi1>
    %304 = vector.broadcast %303 : vector<2x1xi1> to vector<2x32xi1>
    %305 = vector.broadcast %cst_77 : f32 to vector<2x32xf32>
    %306 = arith.select %304, %296, %305 : vector<2x32xi1>, vector<2x32xf32>
    %c12 = arith.constant 12 : index
    %c0_78 = arith.constant 0 : index
    %307 = vector.load %arg23[%c12, %c0_78] : memref<16x64xf32, #tpu.memory_space<vmem>>, vector<2x32xf32>
    tpu.vector_store %arg23[%c12, %c0_78], %306 {strides = array<i32>} : memref<16x64xf32, #tpu.memory_space<vmem>>, vector<2x32xf32>,
    %308 = vector.extract_strided_slice %3 {offsets = [14, 0], sizes = [2, 1], strides = [1, 1]} : vector<16x1xi1> to vector<2x1xi1>
    %309 = vector.extract_strided_slice %21 {offsets = [14, 0], sizes = [2, 128], strides = [1, 1]} : vector<16x256xf32> to vector<2x128xf32>
    %cst_79 = arith.constant dense<0.000000e+00> : vector<2x128xf32>
    %310 = tpu.matmul %299, %4, %cst_79 {dimension_numbers = #tpu.dot_dimension_numbers<[1], [0], [0], [1], [0, 0, 1, 1], [], []>} : vector<2x32xf32>, vector<32x128xf32>, vector<2x128xf32> -> vector<2x128xf32>
    %311 = arith.addf %309, %310 : vector<2x128xf32>
    %312 = vector.extract_strided_slice %311 {offsets = [0, 0], sizes = [2, 32], strides = [1, 1]} : vector<2x128xf32> to vector<2x32xf32>
    %313 = arith.negf %312 : vector<2x32xf32>
    %314 = math.exp %313 : vector<2x32xf32>
    %cst_80 = arith.constant 1.000000e+00 : f32
    %315 = vector.broadcast %cst_80 : f32 to vector<2x32xf32>
    %316 = arith.addf %315, %314 : vector<2x32xf32>
    %317 = arith.divf %315, %316 : vector<2x32xf32>
    %318 = vector.extract_strided_slice %311 {offsets = [0, 32], sizes = [2, 32], strides = [1, 1]} : vector<2x128xf32> to vector<2x32xf32>
    %319 = arith.negf %318 : vector<2x32xf32>
    %320 = math.exp %319 : vector<2x32xf32>
    %cst_81 = arith.constant 1.000000e+00 : f32
    %321 = vector.broadcast %cst_81 : f32 to vector<2x32xf32>
    %322 = arith.addf %321, %320 : vector<2x32xf32>
    %323 = arith.divf %321, %322 : vector<2x32xf32>
    %324 = vector.extract_strided_slice %311 {offsets = [0, 64], sizes = [2, 32], strides = [1, 1]} : vector<2x128xf32> to vector<2x32xf32>
    %325 = math.tanh %324 : vector<2x32xf32>
    %326 = vector.extract_strided_slice %311 {offsets = [0, 96], sizes = [2, 32], strides = [1, 1]} : vector<2x128xf32> to vector<2x32xf32>
    %327 = arith.negf %326 : vector<2x32xf32>
    %328 = math.exp %327 : vector<2x32xf32>
    %cst_82 = arith.constant 1.000000e+00 : f32
    %329 = vector.broadcast %cst_82 : f32 to vector<2x32xf32>
    %330 = arith.addf %329, %328 : vector<2x32xf32>
    %331 = arith.divf %329, %330 : vector<2x32xf32>
    %332 = arith.mulf %323, %302 : vector<2x32xf32>
    %333 = arith.mulf %317, %325 : vector<2x32xf32>
    %334 = arith.addf %332, %333 : vector<2x32xf32>
    %335 = math.tanh %334 : vector<2x32xf32>
    %336 = arith.mulf %331, %335 : vector<2x32xf32>
    %337 = vector.shape_cast %308 : vector<2x1xi1> to vector<2x1xi1>
    %338 = vector.broadcast %337 : vector<2x1xi1> to vector<2x32xi1>
    %339 = arith.select %338, %336, %299 : vector<2x32xi1>, vector<2x32xf32>
    %cst_83 = arith.constant 0.000000e+00 : f32
    %340 = vector.shape_cast %308 : vector<2x1xi1> to vector<2x1xi1>
    %341 = vector.broadcast %340 : vector<2x1xi1> to vector<2x32xi1>
    %342 = vector.broadcast %cst_83 : f32 to vector<2x32xf32>
    %343 = arith.select %341, %336, %342 : vector<2x32xi1>, vector<2x32xf32>
    %c14 = arith.constant 14 : index
    %c0_84 = arith.constant 0 : index
    %344 = vector.load %arg23[%c14, %c0_84] : memref<16x64xf32, #tpu.memory_space<vmem>>, vector<2x32xf32>
    tpu.vector_store %arg23[%c14, %c0_84], %343 {strides = array<i32>} : memref<16x64xf32, #tpu.memory_space<vmem>>, vector<2x32xf32>,
    %c1 = arith.constant 1 : index
    %c0_85 = arith.constant 0 : index
    %345 = vector.load %arg7[%c1, %c0_85] : memref<2x32xf32, #tpu.memory_space<vmem>>, vector<1x32xf32>
    %346 = vector.shape_cast %345 : vector<1x32xf32> to vector<1x32xf32>
    %347 = vector.broadcast %346 : vector<1x32xf32> to vector<2x32xf32>
    %c1_86 = arith.constant 1 : index
    %c0_87 = arith.constant 0 : index
    %348 = vector.load %arg8[%c1_86, %c0_87] : memref<2x32xf32, #tpu.memory_space<vmem>>, vector<1x32xf32>
    %349 = vector.shape_cast %348 : vector<1x32xf32> to vector<1x32xf32>
    %350 = vector.broadcast %349 : vector<1x32xf32> to vector<2x32xf32>
    %351 = vector.extract_strided_slice %3 {offsets = [14, 0], sizes = [2, 1], strides = [1, 1]} : vector<16x1xi1> to vector<2x1xi1>
    %352 = vector.extract_strided_slice %21 {offsets = [14, 128], sizes = [2, 128], strides = [1, 1]} : vector<16x256xf32> to vector<2x128xf32>
    %cst_88 = arith.constant dense<0.000000e+00> : vector<2x128xf32>
    %353 = tpu.matmul %347, %5, %cst_88 {dimension_numbers = #tpu.dot_dimension_numbers<[1], [0], [0], [1], [0, 0, 1, 1], [], []>} : vector<2x32xf32>, vector<32x128xf32>, vector<2x128xf32> -> vector<2x128xf32>
    %354 = arith.addf %352, %353 : vector<2x128xf32>
    %355 = vector.extract_strided_slice %354 {offsets = [0, 0], sizes = [2, 32], strides = [1, 1]} : vector<2x128xf32> to vector<2x32xf32>
    %356 = arith.negf %355 : vector<2x32xf32>
    %357 = math.exp %356 : vector<2x32xf32>
    %cst_89 = arith.constant 1.000000e+00 : f32
    %358 = vector.broadcast %cst_89 : f32 to vector<2x32xf32>
    %359 = arith.addf %358, %357 : vector<2x32xf32>
    %360 = arith.divf %358, %359 : vector<2x32xf32>
    %361 = vector.extract_strided_slice %354 {offsets = [0, 32], sizes = [2, 32], strides = [1, 1]} : vector<2x128xf32> to vector<2x32xf32>
    %362 = arith.negf %361 : vector<2x32xf32>
    %363 = math.exp %362 : vector<2x32xf32>
    %cst_90 = arith.constant 1.000000e+00 : f32
    %364 = vector.broadcast %cst_90 : f32 to vector<2x32xf32>
    %365 = arith.addf %364, %363 : vector<2x32xf32>
    %366 = arith.divf %364, %365 : vector<2x32xf32>
    %367 = vector.extract_strided_slice %354 {offsets = [0, 64], sizes = [2, 32], strides = [1, 1]} : vector<2x128xf32> to vector<2x32xf32>
    %368 = math.tanh %367 : vector<2x32xf32>
    %369 = vector.extract_strided_slice %354 {offsets = [0, 96], sizes = [2, 32], strides = [1, 1]} : vector<2x128xf32> to vector<2x32xf32>
    %370 = arith.negf %369 : vector<2x32xf32>
    %371 = math.exp %370 : vector<2x32xf32>
    %cst_91 = arith.constant 1.000000e+00 : f32
    %372 = vector.broadcast %cst_91 : f32 to vector<2x32xf32>
    %373 = arith.addf %372, %371 : vector<2x32xf32>
    %374 = arith.divf %372, %373 : vector<2x32xf32>
    %375 = arith.mulf %366, %350 : vector<2x32xf32>
    %376 = arith.mulf %360, %368 : vector<2x32xf32>
    %377 = arith.addf %375, %376 : vector<2x32xf32>
    %378 = math.tanh %377 : vector<2x32xf32>
    %379 = arith.mulf %374, %378 : vector<2x32xf32>
    %380 = vector.shape_cast %351 : vector<2x1xi1> to vector<2x1xi1>
    %381 = vector.broadcast %380 : vector<2x1xi1> to vector<2x32xi1>
    %382 = arith.select %381, %379, %347 : vector<2x32xi1>, vector<2x32xf32>
    %383 = vector.shape_cast %351 : vector<2x1xi1> to vector<2x1xi1>
    %384 = vector.broadcast %383 : vector<2x1xi1> to vector<2x32xi1>
    %385 = arith.select %384, %377, %350 : vector<2x32xi1>, vector<2x32xf32>
    %cst_92 = arith.constant 0.000000e+00 : f32
    %386 = vector.shape_cast %351 : vector<2x1xi1> to vector<2x1xi1>
    %387 = vector.broadcast %386 : vector<2x1xi1> to vector<2x32xi1>
    %388 = vector.broadcast %cst_92 : f32 to vector<2x32xf32>
    %389 = arith.select %387, %379, %388 : vector<2x32xi1>, vector<2x32xf32>
    %c14_93 = arith.constant 14 : index
    %c32 = arith.constant 32 : index
    %390 = vector.load %arg23[%c14_93, %c32] : memref<16x64xf32, #tpu.memory_space<vmem>>, vector<2x32xf32>
    tpu.vector_store %arg23[%c14_93, %c32], %389 {strides = array<i32>} : memref<16x64xf32, #tpu.memory_space<vmem>>, vector<2x32xf32>,
    %391 = vector.extract_strided_slice %3 {offsets = [12, 0], sizes = [2, 1], strides = [1, 1]} : vector<16x1xi1> to vector<2x1xi1>
    %392 = vector.extract_strided_slice %21 {offsets = [12, 128], sizes = [2, 128], strides = [1, 1]} : vector<16x256xf32> to vector<2x128xf32>
    %cst_94 = arith.constant dense<0.000000e+00> : vector<2x128xf32>
    %393 = tpu.matmul %382, %5, %cst_94 {dimension_numbers = #tpu.dot_dimension_numbers<[1], [0], [0], [1], [0, 0, 1, 1], [], []>} : vector<2x32xf32>, vector<32x128xf32>, vector<2x128xf32> -> vector<2x128xf32>
    %394 = arith.addf %392, %393 : vector<2x128xf32>
    %395 = vector.extract_strided_slice %394 {offsets = [0, 0], sizes = [2, 32], strides = [1, 1]} : vector<2x128xf32> to vector<2x32xf32>
    %396 = arith.negf %395 : vector<2x32xf32>
    %397 = math.exp %396 : vector<2x32xf32>
    %cst_95 = arith.constant 1.000000e+00 : f32
    %398 = vector.broadcast %cst_95 : f32 to vector<2x32xf32>
    %399 = arith.addf %398, %397 : vector<2x32xf32>
    %400 = arith.divf %398, %399 : vector<2x32xf32>
    %401 = vector.extract_strided_slice %394 {offsets = [0, 32], sizes = [2, 32], strides = [1, 1]} : vector<2x128xf32> to vector<2x32xf32>
    %402 = arith.negf %401 : vector<2x32xf32>
    %403 = math.exp %402 : vector<2x32xf32>
    %cst_96 = arith.constant 1.000000e+00 : f32
    %404 = vector.broadcast %cst_96 : f32 to vector<2x32xf32>
    %405 = arith.addf %404, %403 : vector<2x32xf32>
    %406 = arith.divf %404, %405 : vector<2x32xf32>
    %407 = vector.extract_strided_slice %394 {offsets = [0, 64], sizes = [2, 32], strides = [1, 1]} : vector<2x128xf32> to vector<2x32xf32>
    %408 = math.tanh %407 : vector<2x32xf32>
    %409 = vector.extract_strided_slice %394 {offsets = [0, 96], sizes = [2, 32], strides = [1, 1]} : vector<2x128xf32> to vector<2x32xf32>
    %410 = arith.negf %409 : vector<2x32xf32>
    %411 = math.exp %410 : vector<2x32xf32>
    %cst_97 = arith.constant 1.000000e+00 : f32
    %412 = vector.broadcast %cst_97 : f32 to vector<2x32xf32>
    %413 = arith.addf %412, %411 : vector<2x32xf32>
    %414 = arith.divf %412, %413 : vector<2x32xf32>
    %415 = arith.mulf %406, %385 : vector<2x32xf32>
    %416 = arith.mulf %400, %408 : vector<2x32xf32>
    %417 = arith.addf %415, %416 : vector<2x32xf32>
    %418 = math.tanh %417 : vector<2x32xf32>
    %419 = arith.mulf %414, %418 : vector<2x32xf32>
    %420 = vector.shape_cast %391 : vector<2x1xi1> to vector<2x1xi1>
    %421 = vector.broadcast %420 : vector<2x1xi1> to vector<2x32xi1>
    %422 = arith.select %421, %419, %382 : vector<2x32xi1>, vector<2x32xf32>
    %423 = vector.shape_cast %391 : vector<2x1xi1> to vector<2x1xi1>
    %424 = vector.broadcast %423 : vector<2x1xi1> to vector<2x32xi1>
    %425 = arith.select %424, %417, %385 : vector<2x32xi1>, vector<2x32xf32>
    %cst_98 = arith.constant 0.000000e+00 : f32
    %426 = vector.shape_cast %391 : vector<2x1xi1> to vector<2x1xi1>
    %427 = vector.broadcast %426 : vector<2x1xi1> to vector<2x32xi1>
    %428 = vector.broadcast %cst_98 : f32 to vector<2x32xf32>
    %429 = arith.select %427, %419, %428 : vector<2x32xi1>, vector<2x32xf32>
    %c12_99 = arith.constant 12 : index
    %c32_100 = arith.constant 32 : index
    %430 = vector.load %arg23[%c12_99, %c32_100] : memref<16x64xf32, #tpu.memory_space<vmem>>, vector<2x32xf32>
    tpu.vector_store %arg23[%c12_99, %c32_100], %429 {strides = array<i32>} : memref<16x64xf32, #tpu.memory_space<vmem>>, vector<2x32xf32>,
    %431 = vector.extract_strided_slice %3 {offsets = [10, 0], sizes = [2, 1], strides = [1, 1]} : vector<16x1xi1> to vector<2x1xi1>
    %432 = vector.extract_strided_slice %21 {offsets = [10, 128], sizes = [2, 128], strides = [1, 1]} : vector<16x256xf32> to vector<2x128xf32>
    %cst_101 = arith.constant dense<0.000000e+00> : vector<2x128xf32>
    %433 = tpu.matmul %422, %5, %cst_101 {dimension_numbers = #tpu.dot_dimension_numbers<[1], [0], [0], [1], [0, 0, 1, 1], [], []>} : vector<2x32xf32>, vector<32x128xf32>, vector<2x128xf32> -> vector<2x128xf32>
    %434 = arith.addf %432, %433 : vector<2x128xf32>
    %435 = vector.extract_strided_slice %434 {offsets = [0, 0], sizes = [2, 32], strides = [1, 1]} : vector<2x128xf32> to vector<2x32xf32>
    %436 = arith.negf %435 : vector<2x32xf32>
    %437 = math.exp %436 : vector<2x32xf32>
    %cst_102 = arith.constant 1.000000e+00 : f32
    %438 = vector.broadcast %cst_102 : f32 to vector<2x32xf32>
    %439 = arith.addf %438, %437 : vector<2x32xf32>
    %440 = arith.divf %438, %439 : vector<2x32xf32>
    %441 = vector.extract_strided_slice %434 {offsets = [0, 32], sizes = [2, 32], strides = [1, 1]} : vector<2x128xf32> to vector<2x32xf32>
    %442 = arith.negf %441 : vector<2x32xf32>
    %443 = math.exp %442 : vector<2x32xf32>
    %cst_103 = arith.constant 1.000000e+00 : f32
    %444 = vector.broadcast %cst_103 : f32 to vector<2x32xf32>
    %445 = arith.addf %444, %443 : vector<2x32xf32>
    %446 = arith.divf %444, %445 : vector<2x32xf32>
    %447 = vector.extract_strided_slice %434 {offsets = [0, 64], sizes = [2, 32], strides = [1, 1]} : vector<2x128xf32> to vector<2x32xf32>
    %448 = math.tanh %447 : vector<2x32xf32>
    %449 = vector.extract_strided_slice %434 {offsets = [0, 96], sizes = [2, 32], strides = [1, 1]} : vector<2x128xf32> to vector<2x32xf32>
    %450 = arith.negf %449 : vector<2x32xf32>
    %451 = math.exp %450 : vector<2x32xf32>
    %cst_104 = arith.constant 1.000000e+00 : f32
    %452 = vector.broadcast %cst_104 : f32 to vector<2x32xf32>
    %453 = arith.addf %452, %451 : vector<2x32xf32>
    %454 = arith.divf %452, %453 : vector<2x32xf32>
    %455 = arith.mulf %446, %425 : vector<2x32xf32>
    %456 = arith.mulf %440, %448 : vector<2x32xf32>
    %457 = arith.addf %455, %456 : vector<2x32xf32>
    %458 = math.tanh %457 : vector<2x32xf32>
    %459 = arith.mulf %454, %458 : vector<2x32xf32>
    %460 = vector.shape_cast %431 : vector<2x1xi1> to vector<2x1xi1>
    %461 = vector.broadcast %460 : vector<2x1xi1> to vector<2x32xi1>
    %462 = arith.select %461, %459, %422 : vector<2x32xi1>, vector<2x32xf32>
    %463 = vector.shape_cast %431 : vector<2x1xi1> to vector<2x1xi1>
    %464 = vector.broadcast %463 : vector<2x1xi1> to vector<2x32xi1>
    %465 = arith.select %464, %457, %425 : vector<2x32xi1>, vector<2x32xf32>
    %cst_105 = arith.constant 0.000000e+00 : f32
    %466 = vector.shape_cast %431 : vector<2x1xi1> to vector<2x1xi1>
    %467 = vector.broadcast %466 : vector<2x1xi1> to vector<2x32xi1>
    %468 = vector.broadcast %cst_105 : f32 to vector<2x32xf32>
    %469 = arith.select %467, %459, %468 : vector<2x32xi1>, vector<2x32xf32>
    %c10_106 = arith.constant 10 : index
    %c32_107 = arith.constant 32 : index
    %470 = vector.load %arg23[%c10_106, %c32_107] : memref<16x64xf32, #tpu.memory_space<vmem>>, vector<2x32xf32>
    tpu.vector_store %arg23[%c10_106, %c32_107], %469 {strides = array<i32>} : memref<16x64xf32, #tpu.memory_space<vmem>>, vector<2x32xf32>,
    %471 = vector.extract_strided_slice %3 {offsets = [8, 0], sizes = [2, 1], strides = [1, 1]} : vector<16x1xi1> to vector<2x1xi1>
    %472 = vector.extract_strided_slice %21 {offsets = [8, 128], sizes = [2, 128], strides = [1, 1]} : vector<16x256xf32> to vector<2x128xf32>
    %cst_108 = arith.constant dense<0.000000e+00> : vector<2x128xf32>
    %473 = tpu.matmul %462, %5, %cst_108 {dimension_numbers = #tpu.dot_dimension_numbers<[1], [0], [0], [1], [0, 0, 1, 1], [], []>} : vector<2x32xf32>, vector<32x128xf32>, vector<2x128xf32> -> vector<2x128xf32>
    %474 = arith.addf %472, %473 : vector<2x128xf32>
    %475 = vector.extract_strided_slice %474 {offsets = [0, 0], sizes = [2, 32], strides = [1, 1]} : vector<2x128xf32> to vector<2x32xf32>
    %476 = arith.negf %475 : vector<2x32xf32>
    %477 = math.exp %476 : vector<2x32xf32>
    %cst_109 = arith.constant 1.000000e+00 : f32
    %478 = vector.broadcast %cst_109 : f32 to vector<2x32xf32>
    %479 = arith.addf %478, %477 : vector<2x32xf32>
    %480 = arith.divf %478, %479 : vector<2x32xf32>
    %481 = vector.extract_strided_slice %474 {offsets = [0, 32], sizes = [2, 32], strides = [1, 1]} : vector<2x128xf32> to vector<2x32xf32>
    %482 = arith.negf %481 : vector<2x32xf32>
    %483 = math.exp %482 : vector<2x32xf32>
    %cst_110 = arith.constant 1.000000e+00 : f32
    %484 = vector.broadcast %cst_110 : f32 to vector<2x32xf32>
    %485 = arith.addf %484, %483 : vector<2x32xf32>
    %486 = arith.divf %484, %485 : vector<2x32xf32>
    %487 = vector.extract_strided_slice %474 {offsets = [0, 64], sizes = [2, 32], strides = [1, 1]} : vector<2x128xf32> to vector<2x32xf32>
    %488 = math.tanh %487 : vector<2x32xf32>
    %489 = vector.extract_strided_slice %474 {offsets = [0, 96], sizes = [2, 32], strides = [1, 1]} : vector<2x128xf32> to vector<2x32xf32>
    %490 = arith.negf %489 : vector<2x32xf32>
    %491 = math.exp %490 : vector<2x32xf32>
    %cst_111 = arith.constant 1.000000e+00 : f32
    %492 = vector.broadcast %cst_111 : f32 to vector<2x32xf32>
    %493 = arith.addf %492, %491 : vector<2x32xf32>
    %494 = arith.divf %492, %493 : vector<2x32xf32>
    %495 = arith.mulf %486, %465 : vector<2x32xf32>
    %496 = arith.mulf %480, %488 : vector<2x32xf32>
    %497 = arith.addf %495, %496 : vector<2x32xf32>
    %498 = math.tanh %497 : vector<2x32xf32>
    %499 = arith.mulf %494, %498 : vector<2x32xf32>
    %500 = vector.shape_cast %471 : vector<2x1xi1> to vector<2x1xi1>
    %501 = vector.broadcast %500 : vector<2x1xi1> to vector<2x32xi1>
    %502 = arith.select %501, %499, %462 : vector<2x32xi1>, vector<2x32xf32>
    %503 = vector.shape_cast %471 : vector<2x1xi1> to vector<2x1xi1>
    %504 = vector.broadcast %503 : vector<2x1xi1> to vector<2x32xi1>
    %505 = arith.select %504, %497, %465 : vector<2x32xi1>, vector<2x32xf32>
    %cst_112 = arith.constant 0.000000e+00 : f32
    %506 = vector.shape_cast %471 : vector<2x1xi1> to vector<2x1xi1>
    %507 = vector.broadcast %506 : vector<2x1xi1> to vector<2x32xi1>
    %508 = vector.broadcast %cst_112 : f32 to vector<2x32xf32>
    %509 = arith.select %507, %499, %508 : vector<2x32xi1>, vector<2x32xf32>
    %c8_113 = arith.constant 8 : index
    %c32_114 = arith.constant 32 : index
    %510 = vector.load %arg23[%c8_113, %c32_114] : memref<16x64xf32, #tpu.memory_space<vmem>>, vector<2x32xf32>
    tpu.vector_store %arg23[%c8_113, %c32_114], %509 {strides = array<i32>} : memref<16x64xf32, #tpu.memory_space<vmem>>, vector<2x32xf32>,
    %511 = vector.extract_strided_slice %3 {offsets = [6, 0], sizes = [2, 1], strides = [1, 1]} : vector<16x1xi1> to vector<2x1xi1>
    %512 = vector.extract_strided_slice %21 {offsets = [6, 128], sizes = [2, 128], strides = [1, 1]} : vector<16x256xf32> to vector<2x128xf32>
    %cst_115 = arith.constant dense<0.000000e+00> : vector<2x128xf32>
    %513 = tpu.matmul %502, %5, %cst_115 {dimension_numbers = #tpu.dot_dimension_numbers<[1], [0], [0], [1], [0, 0, 1, 1], [], []>} : vector<2x32xf32>, vector<32x128xf32>, vector<2x128xf32> -> vector<2x128xf32>
    %514 = arith.addf %512, %513 : vector<2x128xf32>
    %515 = vector.extract_strided_slice %514 {offsets = [0, 0], sizes = [2, 32], strides = [1, 1]} : vector<2x128xf32> to vector<2x32xf32>
    %516 = arith.negf %515 : vector<2x32xf32>
    %517 = math.exp %516 : vector<2x32xf32>
    %cst_116 = arith.constant 1.000000e+00 : f32
    %518 = vector.broadcast %cst_116 : f32 to vector<2x32xf32>
    %519 = arith.addf %518, %517 : vector<2x32xf32>
    %520 = arith.divf %518, %519 : vector<2x32xf32>
    %521 = vector.extract_strided_slice %514 {offsets = [0, 32], sizes = [2, 32], strides = [1, 1]} : vector<2x128xf32> to vector<2x32xf32>
    %522 = arith.negf %521 : vector<2x32xf32>
    %523 = math.exp %522 : vector<2x32xf32>
    %cst_117 = arith.constant 1.000000e+00 : f32
    %524 = vector.broadcast %cst_117 : f32 to vector<2x32xf32>
    %525 = arith.addf %524, %523 : vector<2x32xf32>
    %526 = arith.divf %524, %525 : vector<2x32xf32>
    %527 = vector.extract_strided_slice %514 {offsets = [0, 64], sizes = [2, 32], strides = [1, 1]} : vector<2x128xf32> to vector<2x32xf32>
    %528 = math.tanh %527 : vector<2x32xf32>
    %529 = vector.extract_strided_slice %514 {offsets = [0, 96], sizes = [2, 32], strides = [1, 1]} : vector<2x128xf32> to vector<2x32xf32>
    %530 = arith.negf %529 : vector<2x32xf32>
    %531 = math.exp %530 : vector<2x32xf32>
    %cst_118 = arith.constant 1.000000e+00 : f32
    %532 = vector.broadcast %cst_118 : f32 to vector<2x32xf32>
    %533 = arith.addf %532, %531 : vector<2x32xf32>
    %534 = arith.divf %532, %533 : vector<2x32xf32>
    %535 = arith.mulf %526, %505 : vector<2x32xf32>
    %536 = arith.mulf %520, %528 : vector<2x32xf32>
    %537 = arith.addf %535, %536 : vector<2x32xf32>
    %538 = math.tanh %537 : vector<2x32xf32>
    %539 = arith.mulf %534, %538 : vector<2x32xf32>
    %540 = vector.shape_cast %511 : vector<2x1xi1> to vector<2x1xi1>
    %541 = vector.broadcast %540 : vector<2x1xi1> to vector<2x32xi1>
    %542 = arith.select %541, %539, %502 : vector<2x32xi1>, vector<2x32xf32>
    %543 = vector.shape_cast %511 : vector<2x1xi1> to vector<2x1xi1>
    %544 = vector.broadcast %543 : vector<2x1xi1> to vector<2x32xi1>
    %545 = arith.select %544, %537, %505 : vector<2x32xi1>, vector<2x32xf32>
    %cst_119 = arith.constant 0.000000e+00 : f32
    %546 = vector.shape_cast %511 : vector<2x1xi1> to vector<2x1xi1>
    %547 = vector.broadcast %546 : vector<2x1xi1> to vector<2x32xi1>
    %548 = vector.broadcast %cst_119 : f32 to vector<2x32xf32>
    %549 = arith.select %547, %539, %548 : vector<2x32xi1>, vector<2x32xf32>
    %c6_120 = arith.constant 6 : index
    %c32_121 = arith.constant 32 : index
    %550 = vector.load %arg23[%c6_120, %c32_121] : memref<16x64xf32, #tpu.memory_space<vmem>>, vector<2x32xf32>
    tpu.vector_store %arg23[%c6_120, %c32_121], %549 {strides = array<i32>} : memref<16x64xf32, #tpu.memory_space<vmem>>, vector<2x32xf32>,
    %551 = vector.extract_strided_slice %3 {offsets = [4, 0], sizes = [2, 1], strides = [1, 1]} : vector<16x1xi1> to vector<2x1xi1>
    %552 = vector.extract_strided_slice %21 {offsets = [4, 128], sizes = [2, 128], strides = [1, 1]} : vector<16x256xf32> to vector<2x128xf32>
    %cst_122 = arith.constant dense<0.000000e+00> : vector<2x128xf32>
    %553 = tpu.matmul %542, %5, %cst_122 {dimension_numbers = #tpu.dot_dimension_numbers<[1], [0], [0], [1], [0, 0, 1, 1], [], []>} : vector<2x32xf32>, vector<32x128xf32>, vector<2x128xf32> -> vector<2x128xf32>
    %554 = arith.addf %552, %553 : vector<2x128xf32>
    %555 = vector.extract_strided_slice %554 {offsets = [0, 0], sizes = [2, 32], strides = [1, 1]} : vector<2x128xf32> to vector<2x32xf32>
    %556 = arith.negf %555 : vector<2x32xf32>
    %557 = math.exp %556 : vector<2x32xf32>
    %cst_123 = arith.constant 1.000000e+00 : f32
    %558 = vector.broadcast %cst_123 : f32 to vector<2x32xf32>
    %559 = arith.addf %558, %557 : vector<2x32xf32>
    %560 = arith.divf %558, %559 : vector<2x32xf32>
    %561 = vector.extract_strided_slice %554 {offsets = [0, 32], sizes = [2, 32], strides = [1, 1]} : vector<2x128xf32> to vector<2x32xf32>
    %562 = arith.negf %561 : vector<2x32xf32>
    %563 = math.exp %562 : vector<2x32xf32>
    %cst_124 = arith.constant 1.000000e+00 : f32
    %564 = vector.broadcast %cst_124 : f32 to vector<2x32xf32>
    %565 = arith.addf %564, %563 : vector<2x32xf32>
    %566 = arith.divf %564, %565 : vector<2x32xf32>
    %567 = vector.extract_strided_slice %554 {offsets = [0, 64], sizes = [2, 32], strides = [1, 1]} : vector<2x128xf32> to vector<2x32xf32>
    %568 = math.tanh %567 : vector<2x32xf32>
    %569 = vector.extract_strided_slice %554 {offsets = [0, 96], sizes = [2, 32], strides = [1, 1]} : vector<2x128xf32> to vector<2x32xf32>
    %570 = arith.negf %569 : vector<2x32xf32>
    %571 = math.exp %570 : vector<2x32xf32>
    %cst_125 = arith.constant 1.000000e+00 : f32
    %572 = vector.broadcast %cst_125 : f32 to vector<2x32xf32>
    %573 = arith.addf %572, %571 : vector<2x32xf32>
    %574 = arith.divf %572, %573 : vector<2x32xf32>
    %575 = arith.mulf %566, %545 : vector<2x32xf32>
    %576 = arith.mulf %560, %568 : vector<2x32xf32>
    %577 = arith.addf %575, %576 : vector<2x32xf32>
    %578 = math.tanh %577 : vector<2x32xf32>
    %579 = arith.mulf %574, %578 : vector<2x32xf32>
    %580 = vector.shape_cast %551 : vector<2x1xi1> to vector<2x1xi1>
    %581 = vector.broadcast %580 : vector<2x1xi1> to vector<2x32xi1>
    %582 = arith.select %581, %579, %542 : vector<2x32xi1>, vector<2x32xf32>
    %583 = vector.shape_cast %551 : vector<2x1xi1> to vector<2x1xi1>
    %584 = vector.broadcast %583 : vector<2x1xi1> to vector<2x32xi1>
    %585 = arith.select %584, %577, %545 : vector<2x32xi1>, vector<2x32xf32>
    %cst_126 = arith.constant 0.000000e+00 : f32
    %586 = vector.shape_cast %551 : vector<2x1xi1> to vector<2x1xi1>
    %587 = vector.broadcast %586 : vector<2x1xi1> to vector<2x32xi1>
    %588 = vector.broadcast %cst_126 : f32 to vector<2x32xf32>
    %589 = arith.select %587, %579, %588 : vector<2x32xi1>, vector<2x32xf32>
    %c4_127 = arith.constant 4 : index
    %c32_128 = arith.constant 32 : index
    %590 = vector.load %arg23[%c4_127, %c32_128] : memref<16x64xf32, #tpu.memory_space<vmem>>, vector<2x32xf32>
    tpu.vector_store %arg23[%c4_127, %c32_128], %589 {strides = array<i32>} : memref<16x64xf32, #tpu.memory_space<vmem>>, vector<2x32xf32>,
    %591 = vector.extract_strided_slice %3 {offsets = [2, 0], sizes = [2, 1], strides = [1, 1]} : vector<16x1xi1> to vector<2x1xi1>
    %592 = vector.extract_strided_slice %21 {offsets = [2, 128], sizes = [2, 128], strides = [1, 1]} : vector<16x256xf32> to vector<2x128xf32>
    %cst_129 = arith.constant dense<0.000000e+00> : vector<2x128xf32>
    %593 = tpu.matmul %582, %5, %cst_129 {dimension_numbers = #tpu.dot_dimension_numbers<[1], [0], [0], [1], [0, 0, 1, 1], [], []>} : vector<2x32xf32>, vector<32x128xf32>, vector<2x128xf32> -> vector<2x128xf32>
    %594 = arith.addf %592, %593 : vector<2x128xf32>
    %595 = vector.extract_strided_slice %594 {offsets = [0, 0], sizes = [2, 32], strides = [1, 1]} : vector<2x128xf32> to vector<2x32xf32>
    %596 = arith.negf %595 : vector<2x32xf32>
    %597 = math.exp %596 : vector<2x32xf32>
    %cst_130 = arith.constant 1.000000e+00 : f32
    %598 = vector.broadcast %cst_130 : f32 to vector<2x32xf32>
    %599 = arith.addf %598, %597 : vector<2x32xf32>
    %600 = arith.divf %598, %599 : vector<2x32xf32>
    %601 = vector.extract_strided_slice %594 {offsets = [0, 32], sizes = [2, 32], strides = [1, 1]} : vector<2x128xf32> to vector<2x32xf32>
    %602 = arith.negf %601 : vector<2x32xf32>
    %603 = math.exp %602 : vector<2x32xf32>
    %cst_131 = arith.constant 1.000000e+00 : f32
    %604 = vector.broadcast %cst_131 : f32 to vector<2x32xf32>
    %605 = arith.addf %604, %603 : vector<2x32xf32>
    %606 = arith.divf %604, %605 : vector<2x32xf32>
    %607 = vector.extract_strided_slice %594 {offsets = [0, 64], sizes = [2, 32], strides = [1, 1]} : vector<2x128xf32> to vector<2x32xf32>
    %608 = math.tanh %607 : vector<2x32xf32>
    %609 = vector.extract_strided_slice %594 {offsets = [0, 96], sizes = [2, 32], strides = [1, 1]} : vector<2x128xf32> to vector<2x32xf32>
    %610 = arith.negf %609 : vector<2x32xf32>
    %611 = math.exp %610 : vector<2x32xf32>
    %cst_132 = arith.constant 1.000000e+00 : f32
    %612 = vector.broadcast %cst_132 : f32 to vector<2x32xf32>
    %613 = arith.addf %612, %611 : vector<2x32xf32>
    %614 = arith.divf %612, %613 : vector<2x32xf32>
    %615 = arith.mulf %606, %585 : vector<2x32xf32>
    %616 = arith.mulf %600, %608 : vector<2x32xf32>
    %617 = arith.addf %615, %616 : vector<2x32xf32>
    %618 = math.tanh %617 : vector<2x32xf32>
    %619 = arith.mulf %614, %618 : vector<2x32xf32>
    %620 = vector.shape_cast %591 : vector<2x1xi1> to vector<2x1xi1>
    %621 = vector.broadcast %620 : vector<2x1xi1> to vector<2x32xi1>
    %622 = arith.select %621, %619, %582 : vector<2x32xi1>, vector<2x32xf32>
    %623 = vector.shape_cast %591 : vector<2x1xi1> to vector<2x1xi1>
    %624 = vector.broadcast %623 : vector<2x1xi1> to vector<2x32xi1>
    %625 = arith.select %624, %617, %585 : vector<2x32xi1>, vector<2x32xf32>
    %cst_133 = arith.constant 0.000000e+00 : f32
    %626 = vector.shape_cast %591 : vector<2x1xi1> to vector<2x1xi1>
    %627 = vector.broadcast %626 : vector<2x1xi1> to vector<2x32xi1>
    %628 = vector.broadcast %cst_133 : f32 to vector<2x32xf32>
    %629 = arith.select %627, %619, %628 : vector<2x32xi1>, vector<2x32xf32>
    %c2_134 = arith.constant 2 : index
    %c32_135 = arith.constant 32 : index
    %630 = vector.load %arg23[%c2_134, %c32_135] : memref<16x64xf32, #tpu.memory_space<vmem>>, vector<2x32xf32>
    tpu.vector_store %arg23[%c2_134, %c32_135], %629 {strides = array<i32>} : memref<16x64xf32, #tpu.memory_space<vmem>>, vector<2x32xf32>,
    %631 = vector.extract_strided_slice %3 {offsets = [0, 0], sizes = [2, 1], strides = [1, 1]} : vector<16x1xi1> to vector<2x1xi1>
    %632 = vector.extract_strided_slice %21 {offsets = [0, 128], sizes = [2, 128], strides = [1, 1]} : vector<16x256xf32> to vector<2x128xf32>
    %cst_136 = arith.constant dense<0.000000e+00> : vector<2x128xf32>
    %633 = tpu.matmul %622, %5, %cst_136 {dimension_numbers = #tpu.dot_dimension_numbers<[1], [0], [0], [1], [0, 0, 1, 1], [], []>} : vector<2x32xf32>, vector<32x128xf32>, vector<2x128xf32> -> vector<2x128xf32>
    %634 = arith.addf %632, %633 : vector<2x128xf32>
    %635 = vector.extract_strided_slice %634 {offsets = [0, 0], sizes = [2, 32], strides = [1, 1]} : vector<2x128xf32> to vector<2x32xf32>
    %636 = arith.negf %635 : vector<2x32xf32>
    %637 = math.exp %636 : vector<2x32xf32>
    %cst_137 = arith.constant 1.000000e+00 : f32
    %638 = vector.broadcast %cst_137 : f32 to vector<2x32xf32>
    %639 = arith.addf %638, %637 : vector<2x32xf32>
    %640 = arith.divf %638, %639 : vector<2x32xf32>
    %641 = vector.extract_strided_slice %634 {offsets = [0, 32], sizes = [2, 32], strides = [1, 1]} : vector<2x128xf32> to vector<2x32xf32>
    %642 = arith.negf %641 : vector<2x32xf32>
    %643 = math.exp %642 : vector<2x32xf32>
    %cst_138 = arith.constant 1.000000e+00 : f32
    %644 = vector.broadcast %cst_138 : f32 to vector<2x32xf32>
    %645 = arith.addf %644, %643 : vector<2x32xf32>
    %646 = arith.divf %644, %645 : vector<2x32xf32>
    %647 = vector.extract_strided_slice %634 {offsets = [0, 64], sizes = [2, 32], strides = [1, 1]} : vector<2x128xf32> to vector<2x32xf32>
    %648 = math.tanh %647 : vector<2x32xf32>
    %649 = vector.extract_strided_slice %634 {offsets = [0, 96], sizes = [2, 32], strides = [1, 1]} : vector<2x128xf32> to vector<2x32xf32>
    %650 = arith.negf %649 : vector<2x32xf32>
    %651 = math.exp %650 : vector<2x32xf32>
    %cst_139 = arith.constant 1.000000e+00 : f32
    %652 = vector.broadcast %cst_139 : f32 to vector<2x32xf32>
    %653 = arith.addf %652, %651 : vector<2x32xf32>
    %654 = arith.divf %652, %653 : vector<2x32xf32>
    %655 = arith.mulf %646, %625 : vector<2x32xf32>
    %656 = arith.mulf %640, %648 : vector<2x32xf32>
    %657 = arith.addf %655, %656 : vector<2x32xf32>
    %658 = math.tanh %657 : vector<2x32xf32>
    %659 = arith.mulf %654, %658 : vector<2x32xf32>
    %660 = vector.shape_cast %631 : vector<2x1xi1> to vector<2x1xi1>
    %661 = vector.broadcast %660 : vector<2x1xi1> to vector<2x32xi1>
    %662 = arith.select %661, %659, %622 : vector<2x32xi1>, vector<2x32xf32>
    %cst_140 = arith.constant 0.000000e+00 : f32
    %663 = vector.shape_cast %631 : vector<2x1xi1> to vector<2x1xi1>
    %664 = vector.broadcast %663 : vector<2x1xi1> to vector<2x32xi1>
    %665 = vector.broadcast %cst_140 : f32 to vector<2x32xf32>
    %666 = arith.select %664, %659, %665 : vector<2x32xi1>, vector<2x32xf32>
    %c0_141 = arith.constant 0 : index
    %c32_142 = arith.constant 32 : index
    %667 = vector.load %arg23[%c0_141, %c32_142] : memref<16x64xf32, #tpu.memory_space<vmem>>, vector<2x32xf32>
    tpu.vector_store %arg23[%c0_141, %c32_142], %666 {strides = array<i32>} : memref<16x64xf32, #tpu.memory_space<vmem>>, vector<2x32xf32>,
    %c0_143 = arith.constant 0 : index
    %c0_144 = arith.constant 0 : index
    %668 = vector.load %arg9[%c0_143, %c0_144] : memref<32x32xf32, #tpu.memory_space<vmem>>, vector<32x32xf32>
    %cst_145 = arith.constant dense<0.000000e+00> : vector<2x32xf32>
    %669 = tpu.matmul %339, %668, %cst_145 {dimension_numbers = #tpu.dot_dimension_numbers<[1], [0], [0], [1], [0, 0, 1, 1], [], []>} : vector<2x32xf32>, vector<32x32xf32>, vector<2x32xf32> -> vector<2x32xf32>
    %c0_146 = arith.constant 0 : index
    %c0_147 = arith.constant 0 : index
    %670 = vector.load %arg10[%c0_146, %c0_147] : memref<32x32xf32, #tpu.memory_space<vmem>>, vector<32x32xf32>
    %cst_148 = arith.constant dense<0.000000e+00> : vector<2x32xf32>
    %671 = tpu.matmul %662, %670, %cst_148 {dimension_numbers = #tpu.dot_dimension_numbers<[1], [0], [0], [1], [0, 0, 1, 1], [], []>} : vector<2x32xf32>, vector<32x32xf32>, vector<2x32xf32> -> vector<2x32xf32>
    %672 = arith.addf %669, %671 : vector<2x32xf32>
    %c0_149 = arith.constant 0 : index
    %c0_150 = arith.constant 0 : index
    %673 = vector.load %arg11[%c0_149, %c0_150] : memref<1x32xf32, #tpu.memory_space<vmem>>, vector<1x32xf32>
    %674 = vector.broadcast %673 : vector<1x32xf32> to vector<2x32xf32>
    %675 = arith.addf %672, %674 : vector<2x32xf32>
    %cst_151 = arith.constant dense<0.000000e+00> : vector<2x16xf32>
    %676 = tpu.matmul %675, %6, %cst_151 {dimension_numbers = #tpu.dot_dimension_numbers<[1], [0], [0], [1], [0, 0, 1, 1], [], []>} : vector<2x32xf32>, vector<32x16xf32>, vector<2x16xf32> -> vector<2x16xf32>
    %677 = vector.broadcast %7 : vector<1x16xf32> to vector<2x16xf32>
    %678 = arith.addf %676, %677 : vector<2x16xf32>
    %679 = math.tanh %678 : vector<2x16xf32>
    %cst_152 = arith.constant dense<0.000000e+00> : vector<2x32xf32>
    %680 = tpu.matmul %675, %8, %cst_152 {dimension_numbers = #tpu.dot_dimension_numbers<[1], [0], [0], [1], [0, 0, 1, 1], [], []>} : vector<2x32xf32>, vector<32x32xf32>, vector<2x32xf32> -> vector<2x32xf32>
    %cst_153 = arith.constant dense<0.000000e+00> : vector<2x32xf32>
    %681 = tpu.matmul %679, %9, %cst_153 {dimension_numbers = #tpu.dot_dimension_numbers<[1], [0], [0], [1], [0, 0, 1, 1], [], []>} : vector<2x16xf32>, vector<16x32xf32>, vector<2x32xf32> -> vector<2x32xf32>
    %682 = arith.addf %680, %681 : vector<2x32xf32>
    %683 = vector.broadcast %10 : vector<1x32xf32> to vector<2x32xf32>
    %684 = arith.addf %682, %683 : vector<2x32xf32>
    %c0_154 = arith.constant 0 : index
    %c0_155 = arith.constant 0 : index
    %685 = vector.load %arg23[%c0_154, %c0_155] : memref<16x64xf32, #tpu.memory_space<vmem>>, vector<16x64xf32>
    %c0_156 = arith.constant 0 : index
    %c0_157 = arith.constant 0 : index
    %686 = vector.load %arg17[%c0_156, %c0_157] : memref<64x128xf32, #tpu.memory_space<vmem>>, vector<64x128xf32>
    %cst_158 = arith.constant dense<0.000000e+00> : vector<16x128xf32>
    %687 = tpu.matmul %685, %686, %cst_158 {dimension_numbers = #tpu.dot_dimension_numbers<[1], [0], [0], [1], [0, 0, 1, 1], [], []>} : vector<16x64xf32>, vector<64x128xf32>, vector<16x128xf32> -> vector<16x128xf32>
    %688 = vector.broadcast %12 : vector<1x128xf32> to vector<16x128xf32>
    %689 = arith.addf %687, %688 : vector<16x128xf32>
    %690 = vector.extract_strided_slice %689 {offsets = [0, 0], sizes = [2, 128], strides = [1, 1]} : vector<16x128xf32> to vector<2x128xf32>
    %cst_159 = arith.constant dense<0.000000e+00> : vector<2x128xf32>
    %691 = tpu.matmul %684, %11, %cst_159 {dimension_numbers = #tpu.dot_dimension_numbers<[1], [0], [0], [1], [0, 0, 1, 1], [], []>} : vector<2x32xf32>, vector<32x128xf32>, vector<2x128xf32> -> vector<2x128xf32>
    %692 = arith.addf %690, %691 : vector<2x128xf32>
    %693 = vector.extract_strided_slice %692 {offsets = [0, 0], sizes = [2, 32], strides = [1, 1]} : vector<2x128xf32> to vector<2x32xf32>
    %694 = arith.negf %693 : vector<2x32xf32>
    %695 = math.exp %694 : vector<2x32xf32>
    %cst_160 = arith.constant 1.000000e+00 : f32
    %696 = vector.broadcast %cst_160 : f32 to vector<2x32xf32>
    %697 = arith.addf %696, %695 : vector<2x32xf32>
    %698 = arith.divf %696, %697 : vector<2x32xf32>
    %699 = vector.extract_strided_slice %692 {offsets = [0, 32], sizes = [2, 32], strides = [1, 1]} : vector<2x128xf32> to vector<2x32xf32>
    %700 = arith.negf %699 : vector<2x32xf32>
    %701 = math.exp %700 : vector<2x32xf32>
    %cst_161 = arith.constant 1.000000e+00 : f32
    %702 = vector.broadcast %cst_161 : f32 to vector<2x32xf32>
    %703 = arith.addf %702, %701 : vector<2x32xf32>
    %704 = arith.divf %702, %703 : vector<2x32xf32>
    %705 = vector.extract_strided_slice %692 {offsets = [0, 64], sizes = [2, 32], strides = [1, 1]} : vector<2x128xf32> to vector<2x32xf32>
    %706 = math.tanh %705 : vector<2x32xf32>
    %707 = vector.extract_strided_slice %692 {offsets = [0, 96], sizes = [2, 32], strides = [1, 1]} : vector<2x128xf32> to vector<2x32xf32>
    %708 = arith.negf %707 : vector<2x32xf32>
    %709 = math.exp %708 : vector<2x32xf32>
    %cst_162 = arith.constant 1.000000e+00 : f32
    %710 = vector.broadcast %cst_162 : f32 to vector<2x32xf32>
    %711 = arith.addf %710, %709 : vector<2x32xf32>
    %712 = arith.divf %710, %711 : vector<2x32xf32>
    %713 = arith.mulf %704, %684 : vector<2x32xf32>
    %714 = arith.mulf %698, %706 : vector<2x32xf32>
    %715 = arith.addf %713, %714 : vector<2x32xf32>
    %716 = math.tanh %715 : vector<2x32xf32>
    %717 = arith.mulf %712, %716 : vector<2x32xf32>
    %cst_163 = arith.constant dense<0.000000e+00> : vector<2x16xf32>
    %718 = tpu.matmul %717, %6, %cst_163 {dimension_numbers = #tpu.dot_dimension_numbers<[1], [0], [0], [1], [0, 0, 1, 1], [], []>} : vector<2x32xf32>, vector<32x16xf32>, vector<2x16xf32> -> vector<2x16xf32>
    %719 = vector.broadcast %7 : vector<1x16xf32> to vector<2x16xf32>
    %720 = arith.addf %718, %719 : vector<2x16xf32>
    %721 = math.tanh %720 : vector<2x16xf32>
    %cst_164 = arith.constant dense<0.000000e+00> : vector<2x16xf32>
    %722 = tpu.matmul %721, %13, %cst_164 {dimension_numbers = #tpu.dot_dimension_numbers<[1], [0], [0], [1], [0, 0, 1, 1], [], []>} : vector<2x16xf32>, vector<16x16xf32>, vector<2x16xf32> -> vector<2x16xf32>
    %723 = vector.broadcast %14 : vector<1x16xf32> to vector<2x16xf32>
    %724 = arith.addf %722, %723 : vector<2x16xf32>
    %c0_165 = arith.constant 0 : index
    %c0_166 = arith.constant 0 : index
    %c0_167 = arith.constant 0 : index
    %725 = vector.load %arg22[%c0_165, %c0_166, %c0_167] : memref<1x2x128xf32, #tpu.memory_space<vmem>>, vector<1x2x16xf32>
    %726 = vector.shape_cast %725 : vector<1x2x16xf32> to vector<2x16xf32>
    %727 = vector.shape_cast %724 : vector<2x16xf32> to vector<1x2x16xf32>
    tpu.vector_store %arg22[%c0_165, %c0_166, %c0_167], %727 {strides = array<i32>} : memref<1x2x128xf32, #tpu.memory_space<vmem>>, vector<1x2x16xf32>,
    %cst_168 = arith.constant dense<0.000000e+00> : vector<2x32xf32>
    %728 = tpu.matmul %717, %8, %cst_168 {dimension_numbers = #tpu.dot_dimension_numbers<[1], [0], [0], [1], [0, 0, 1, 1], [], []>} : vector<2x32xf32>, vector<32x32xf32>, vector<2x32xf32> -> vector<2x32xf32>
    %cst_169 = arith.constant dense<0.000000e+00> : vector<2x32xf32>
    %729 = tpu.matmul %721, %9, %cst_169 {dimension_numbers = #tpu.dot_dimension_numbers<[1], [0], [0], [1], [0, 0, 1, 1], [], []>} : vector<2x16xf32>, vector<16x32xf32>, vector<2x32xf32> -> vector<2x32xf32>
    %730 = arith.addf %728, %729 : vector<2x32xf32>
    %731 = vector.broadcast %10 : vector<1x32xf32> to vector<2x32xf32>
    %732 = arith.addf %730, %731 : vector<2x32xf32>
    %733 = vector.extract_strided_slice %689 {offsets = [2, 0], sizes = [2, 128], strides = [1, 1]} : vector<16x128xf32> to vector<2x128xf32>
    %cst_170 = arith.constant dense<0.000000e+00> : vector<2x128xf32>
    %734 = tpu.matmul %732, %11, %cst_170 {dimension_numbers = #tpu.dot_dimension_numbers<[1], [0], [0], [1], [0, 0, 1, 1], [], []>} : vector<2x32xf32>, vector<32x128xf32>, vector<2x128xf32> -> vector<2x128xf32>
    %735 = arith.addf %733, %734 : vector<2x128xf32>
    %736 = vector.extract_strided_slice %735 {offsets = [0, 0], sizes = [2, 32], strides = [1, 1]} : vector<2x128xf32> to vector<2x32xf32>
    %737 = arith.negf %736 : vector<2x32xf32>
    %738 = math.exp %737 : vector<2x32xf32>
    %cst_171 = arith.constant 1.000000e+00 : f32
    %739 = vector.broadcast %cst_171 : f32 to vector<2x32xf32>
    %740 = arith.addf %739, %738 : vector<2x32xf32>
    %741 = arith.divf %739, %740 : vector<2x32xf32>
    %742 = vector.extract_strided_slice %735 {offsets = [0, 32], sizes = [2, 32], strides = [1, 1]} : vector<2x128xf32> to vector<2x32xf32>
    %743 = arith.negf %742 : vector<2x32xf32>
    %744 = math.exp %743 : vector<2x32xf32>
    %cst_172 = arith.constant 1.000000e+00 : f32
    %745 = vector.broadcast %cst_172 : f32 to vector<2x32xf32>
    %746 = arith.addf %745, %744 : vector<2x32xf32>
    %747 = arith.divf %745, %746 : vector<2x32xf32>
    %748 = vector.extract_strided_slice %735 {offsets = [0, 64], sizes = [2, 32], strides = [1, 1]} : vector<2x128xf32> to vector<2x32xf32>
    %749 = math.tanh %748 : vector<2x32xf32>
    %750 = vector.extract_strided_slice %735 {offsets = [0, 96], sizes = [2, 32], strides = [1, 1]} : vector<2x128xf32> to vector<2x32xf32>
    %751 = arith.negf %750 : vector<2x32xf32>
    %752 = math.exp %751 : vector<2x32xf32>
    %cst_173 = arith.constant 1.000000e+00 : f32
    %753 = vector.broadcast %cst_173 : f32 to vector<2x32xf32>
    %754 = arith.addf %753, %752 : vector<2x32xf32>
    %755 = arith.divf %753, %754 : vector<2x32xf32>
    %756 = arith.mulf %747, %732 : vector<2x32xf32>
    %757 = arith.mulf %741, %749 : vector<2x32xf32>
    %758 = arith.addf %756, %757 : vector<2x32xf32>
    %759 = math.tanh %758 : vector<2x32xf32>
    %760 = arith.mulf %755, %759 : vector<2x32xf32>
    %cst_174 = arith.constant dense<0.000000e+00> : vector<2x16xf32>
    %761 = tpu.matmul %760, %6, %cst_174 {dimension_numbers = #tpu.dot_dimension_numbers<[1], [0], [0], [1], [0, 0, 1, 1], [], []>} : vector<2x32xf32>, vector<32x16xf32>, vector<2x16xf32> -> vector<2x16xf32>
    %762 = vector.broadcast %7 : vector<1x16xf32> to vector<2x16xf32>
    %763 = arith.addf %761, %762 : vector<2x16xf32>
    %764 = math.tanh %763 : vector<2x16xf32>
    %cst_175 = arith.constant dense<0.000000e+00> : vector<2x16xf32>
    %765 = tpu.matmul %764, %13, %cst_175 {dimension_numbers = #tpu.dot_dimension_numbers<[1], [0], [0], [1], [0, 0, 1, 1], [], []>} : vector<2x16xf32>, vector<16x16xf32>, vector<2x16xf32> -> vector<2x16xf32>
    %766 = vector.broadcast %14 : vector<1x16xf32> to vector<2x16xf32>
    %767 = arith.addf %765, %766 : vector<2x16xf32>
    %c0_176 = arith.constant 0 : index
    %c0_177 = arith.constant 0 : index
    %c16 = arith.constant 16 : index
    %768 = vector.load %arg22[%c0_176, %c0_177, %c16] : memref<1x2x128xf32, #tpu.memory_space<vmem>>, vector<1x2x16xf32>
    %769 = vector.shape_cast %768 : vector<1x2x16xf32> to vector<2x16xf32>
    %770 = vector.shape_cast %767 : vector<2x16xf32> to vector<1x2x16xf32>
    tpu.vector_store %arg22[%c0_176, %c0_177, %c16], %770 {strides = array<i32>} : memref<1x2x128xf32, #tpu.memory_space<vmem>>, vector<1x2x16xf32>,
    %cst_178 = arith.constant dense<0.000000e+00> : vector<2x32xf32>
    %771 = tpu.matmul %760, %8, %cst_178 {dimension_numbers = #tpu.dot_dimension_numbers<[1], [0], [0], [1], [0, 0, 1, 1], [], []>} : vector<2x32xf32>, vector<32x32xf32>, vector<2x32xf32> -> vector<2x32xf32>
    %cst_179 = arith.constant dense<0.000000e+00> : vector<2x32xf32>
    %772 = tpu.matmul %764, %9, %cst_179 {dimension_numbers = #tpu.dot_dimension_numbers<[1], [0], [0], [1], [0, 0, 1, 1], [], []>} : vector<2x16xf32>, vector<16x32xf32>, vector<2x32xf32> -> vector<2x32xf32>
    %773 = arith.addf %771, %772 : vector<2x32xf32>
    %774 = vector.broadcast %10 : vector<1x32xf32> to vector<2x32xf32>
    %775 = arith.addf %773, %774 : vector<2x32xf32>
    %776 = vector.extract_strided_slice %689 {offsets = [4, 0], sizes = [2, 128], strides = [1, 1]} : vector<16x128xf32> to vector<2x128xf32>
    %cst_180 = arith.constant dense<0.000000e+00> : vector<2x128xf32>
    %777 = tpu.matmul %775, %11, %cst_180 {dimension_numbers = #tpu.dot_dimension_numbers<[1], [0], [0], [1], [0, 0, 1, 1], [], []>} : vector<2x32xf32>, vector<32x128xf32>, vector<2x128xf32> -> vector<2x128xf32>
    %778 = arith.addf %776, %777 : vector<2x128xf32>
    %779 = vector.extract_strided_slice %778 {offsets = [0, 0], sizes = [2, 32], strides = [1, 1]} : vector<2x128xf32> to vector<2x32xf32>
    %780 = arith.negf %779 : vector<2x32xf32>
    %781 = math.exp %780 : vector<2x32xf32>
    %cst_181 = arith.constant 1.000000e+00 : f32
    %782 = vector.broadcast %cst_181 : f32 to vector<2x32xf32>
    %783 = arith.addf %782, %781 : vector<2x32xf32>
    %784 = arith.divf %782, %783 : vector<2x32xf32>
    %785 = vector.extract_strided_slice %778 {offsets = [0, 32], sizes = [2, 32], strides = [1, 1]} : vector<2x128xf32> to vector<2x32xf32>
    %786 = arith.negf %785 : vector<2x32xf32>
    %787 = math.exp %786 : vector<2x32xf32>
    %cst_182 = arith.constant 1.000000e+00 : f32
    %788 = vector.broadcast %cst_182 : f32 to vector<2x32xf32>
    %789 = arith.addf %788, %787 : vector<2x32xf32>
    %790 = arith.divf %788, %789 : vector<2x32xf32>
    %791 = vector.extract_strided_slice %778 {offsets = [0, 64], sizes = [2, 32], strides = [1, 1]} : vector<2x128xf32> to vector<2x32xf32>
    %792 = math.tanh %791 : vector<2x32xf32>
    %793 = vector.extract_strided_slice %778 {offsets = [0, 96], sizes = [2, 32], strides = [1, 1]} : vector<2x128xf32> to vector<2x32xf32>
    %794 = arith.negf %793 : vector<2x32xf32>
    %795 = math.exp %794 : vector<2x32xf32>
    %cst_183 = arith.constant 1.000000e+00 : f32
    %796 = vector.broadcast %cst_183 : f32 to vector<2x32xf32>
    %797 = arith.addf %796, %795 : vector<2x32xf32>
    %798 = arith.divf %796, %797 : vector<2x32xf32>
    %799 = arith.mulf %790, %775 : vector<2x32xf32>
    %800 = arith.mulf %784, %792 : vector<2x32xf32>
    %801 = arith.addf %799, %800 : vector<2x32xf32>
    %802 = math.tanh %801 : vector<2x32xf32>
    %803 = arith.mulf %798, %802 : vector<2x32xf32>
    %cst_184 = arith.constant dense<0.000000e+00> : vector<2x16xf32>
    %804 = tpu.matmul %803, %6, %cst_184 {dimension_numbers = #tpu.dot_dimension_numbers<[1], [0], [0], [1], [0, 0, 1, 1], [], []>} : vector<2x32xf32>, vector<32x16xf32>, vector<2x16xf32> -> vector<2x16xf32>
    %805 = vector.broadcast %7 : vector<1x16xf32> to vector<2x16xf32>
    %806 = arith.addf %804, %805 : vector<2x16xf32>
    %807 = math.tanh %806 : vector<2x16xf32>
    %cst_185 = arith.constant dense<0.000000e+00> : vector<2x16xf32>
    %808 = tpu.matmul %807, %13, %cst_185 {dimension_numbers = #tpu.dot_dimension_numbers<[1], [0], [0], [1], [0, 0, 1, 1], [], []>} : vector<2x16xf32>, vector<16x16xf32>, vector<2x16xf32> -> vector<2x16xf32>
    %809 = vector.broadcast %14 : vector<1x16xf32> to vector<2x16xf32>
    %810 = arith.addf %808, %809 : vector<2x16xf32>
    %c0_186 = arith.constant 0 : index
    %c0_187 = arith.constant 0 : index
    %c32_188 = arith.constant 32 : index
    %811 = vector.load %arg22[%c0_186, %c0_187, %c32_188] : memref<1x2x128xf32, #tpu.memory_space<vmem>>, vector<1x2x16xf32>
    %812 = vector.shape_cast %811 : vector<1x2x16xf32> to vector<2x16xf32>
    %813 = vector.shape_cast %810 : vector<2x16xf32> to vector<1x2x16xf32>
    tpu.vector_store %arg22[%c0_186, %c0_187, %c32_188], %813 {strides = array<i32>} : memref<1x2x128xf32, #tpu.memory_space<vmem>>, vector<1x2x16xf32>,
    %cst_189 = arith.constant dense<0.000000e+00> : vector<2x32xf32>
    %814 = tpu.matmul %803, %8, %cst_189 {dimension_numbers = #tpu.dot_dimension_numbers<[1], [0], [0], [1], [0, 0, 1, 1], [], []>} : vector<2x32xf32>, vector<32x32xf32>, vector<2x32xf32> -> vector<2x32xf32>
    %cst_190 = arith.constant dense<0.000000e+00> : vector<2x32xf32>
    %815 = tpu.matmul %807, %9, %cst_190 {dimension_numbers = #tpu.dot_dimension_numbers<[1], [0], [0], [1], [0, 0, 1, 1], [], []>} : vector<2x16xf32>, vector<16x32xf32>, vector<2x32xf32> -> vector<2x32xf32>
    %816 = arith.addf %814, %815 : vector<2x32xf32>
    %817 = vector.broadcast %10 : vector<1x32xf32> to vector<2x32xf32>
    %818 = arith.addf %816, %817 : vector<2x32xf32>
    %819 = vector.extract_strided_slice %689 {offsets = [6, 0], sizes = [2, 128], strides = [1, 1]} : vector<16x128xf32> to vector<2x128xf32>
    %cst_191 = arith.constant dense<0.000000e+00> : vector<2x128xf32>
    %820 = tpu.matmul %818, %11, %cst_191 {dimension_numbers = #tpu.dot_dimension_numbers<[1], [0], [0], [1], [0, 0, 1, 1], [], []>} : vector<2x32xf32>, vector<32x128xf32>, vector<2x128xf32> -> vector<2x128xf32>
    %821 = arith.addf %819, %820 : vector<2x128xf32>
    %822 = vector.extract_strided_slice %821 {offsets = [0, 0], sizes = [2, 32], strides = [1, 1]} : vector<2x128xf32> to vector<2x32xf32>
    %823 = arith.negf %822 : vector<2x32xf32>
    %824 = math.exp %823 : vector<2x32xf32>
    %cst_192 = arith.constant 1.000000e+00 : f32
    %825 = vector.broadcast %cst_192 : f32 to vector<2x32xf32>
    %826 = arith.addf %825, %824 : vector<2x32xf32>
    %827 = arith.divf %825, %826 : vector<2x32xf32>
    %828 = vector.extract_strided_slice %821 {offsets = [0, 32], sizes = [2, 32], strides = [1, 1]} : vector<2x128xf32> to vector<2x32xf32>
    %829 = arith.negf %828 : vector<2x32xf32>
    %830 = math.exp %829 : vector<2x32xf32>
    %cst_193 = arith.constant 1.000000e+00 : f32
    %831 = vector.broadcast %cst_193 : f32 to vector<2x32xf32>
    %832 = arith.addf %831, %830 : vector<2x32xf32>
    %833 = arith.divf %831, %832 : vector<2x32xf32>
    %834 = vector.extract_strided_slice %821 {offsets = [0, 64], sizes = [2, 32], strides = [1, 1]} : vector<2x128xf32> to vector<2x32xf32>
    %835 = math.tanh %834 : vector<2x32xf32>
    %836 = vector.extract_strided_slice %821 {offsets = [0, 96], sizes = [2, 32], strides = [1, 1]} : vector<2x128xf32> to vector<2x32xf32>
    %837 = arith.negf %836 : vector<2x32xf32>
    %838 = math.exp %837 : vector<2x32xf32>
    %cst_194 = arith.constant 1.000000e+00 : f32
    %839 = vector.broadcast %cst_194 : f32 to vector<2x32xf32>
    %840 = arith.addf %839, %838 : vector<2x32xf32>
    %841 = arith.divf %839, %840 : vector<2x32xf32>
    %842 = arith.mulf %833, %818 : vector<2x32xf32>
    %843 = arith.mulf %827, %835 : vector<2x32xf32>
    %844 = arith.addf %842, %843 : vector<2x32xf32>
    %845 = math.tanh %844 : vector<2x32xf32>
    %846 = arith.mulf %841, %845 : vector<2x32xf32>
    %cst_195 = arith.constant dense<0.000000e+00> : vector<2x16xf32>
    %847 = tpu.matmul %846, %6, %cst_195 {dimension_numbers = #tpu.dot_dimension_numbers<[1], [0], [0], [1], [0, 0, 1, 1], [], []>} : vector<2x32xf32>, vector<32x16xf32>, vector<2x16xf32> -> vector<2x16xf32>
    %848 = vector.broadcast %7 : vector<1x16xf32> to vector<2x16xf32>
    %849 = arith.addf %847, %848 : vector<2x16xf32>
    %850 = math.tanh %849 : vector<2x16xf32>
    %cst_196 = arith.constant dense<0.000000e+00> : vector<2x16xf32>
    %851 = tpu.matmul %850, %13, %cst_196 {dimension_numbers = #tpu.dot_dimension_numbers<[1], [0], [0], [1], [0, 0, 1, 1], [], []>} : vector<2x16xf32>, vector<16x16xf32>, vector<2x16xf32> -> vector<2x16xf32>
    %852 = vector.broadcast %14 : vector<1x16xf32> to vector<2x16xf32>
    %853 = arith.addf %851, %852 : vector<2x16xf32>
    %c0_197 = arith.constant 0 : index
    %c0_198 = arith.constant 0 : index
    %c48 = arith.constant 48 : index
    %854 = vector.load %arg22[%c0_197, %c0_198, %c48] : memref<1x2x128xf32, #tpu.memory_space<vmem>>, vector<1x2x16xf32>
    %855 = vector.shape_cast %854 : vector<1x2x16xf32> to vector<2x16xf32>
    %856 = vector.shape_cast %853 : vector<2x16xf32> to vector<1x2x16xf32>
    tpu.vector_store %arg22[%c0_197, %c0_198, %c48], %856 {strides = array<i32>} : memref<1x2x128xf32, #tpu.memory_space<vmem>>, vector<1x2x16xf32>,
    %cst_199 = arith.constant dense<0.000000e+00> : vector<2x32xf32>
    %857 = tpu.matmul %846, %8, %cst_199 {dimension_numbers = #tpu.dot_dimension_numbers<[1], [0], [0], [1], [0, 0, 1, 1], [], []>} : vector<2x32xf32>, vector<32x32xf32>, vector<2x32xf32> -> vector<2x32xf32>
    %cst_200 = arith.constant dense<0.000000e+00> : vector<2x32xf32>
    %858 = tpu.matmul %850, %9, %cst_200 {dimension_numbers = #tpu.dot_dimension_numbers<[1], [0], [0], [1], [0, 0, 1, 1], [], []>} : vector<2x16xf32>, vector<16x32xf32>, vector<2x32xf32> -> vector<2x32xf32>
    %859 = arith.addf %857, %858 : vector<2x32xf32>
    %860 = vector.broadcast %10 : vector<1x32xf32> to vector<2x32xf32>
    %861 = arith.addf %859, %860 : vector<2x32xf32>
    %862 = vector.extract_strided_slice %689 {offsets = [8, 0], sizes = [2, 128], strides = [1, 1]} : vector<16x128xf32> to vector<2x128xf32>
    %cst_201 = arith.constant dense<0.000000e+00> : vector<2x128xf32>
    %863 = tpu.matmul %861, %11, %cst_201 {dimension_numbers = #tpu.dot_dimension_numbers<[1], [0], [0], [1], [0, 0, 1, 1], [], []>} : vector<2x32xf32>, vector<32x128xf32>, vector<2x128xf32> -> vector<2x128xf32>
    %864 = arith.addf %862, %863 : vector<2x128xf32>
    %865 = vector.extract_strided_slice %864 {offsets = [0, 0], sizes = [2, 32], strides = [1, 1]} : vector<2x128xf32> to vector<2x32xf32>
    %866 = arith.negf %865 : vector<2x32xf32>
    %867 = math.exp %866 : vector<2x32xf32>
    %cst_202 = arith.constant 1.000000e+00 : f32
    %868 = vector.broadcast %cst_202 : f32 to vector<2x32xf32>
    %869 = arith.addf %868, %867 : vector<2x32xf32>
    %870 = arith.divf %868, %869 : vector<2x32xf32>
    %871 = vector.extract_strided_slice %864 {offsets = [0, 32], sizes = [2, 32], strides = [1, 1]} : vector<2x128xf32> to vector<2x32xf32>
    %872 = arith.negf %871 : vector<2x32xf32>
    %873 = math.exp %872 : vector<2x32xf32>
    %cst_203 = arith.constant 1.000000e+00 : f32
    %874 = vector.broadcast %cst_203 : f32 to vector<2x32xf32>
    %875 = arith.addf %874, %873 : vector<2x32xf32>
    %876 = arith.divf %874, %875 : vector<2x32xf32>
    %877 = vector.extract_strided_slice %864 {offsets = [0, 64], sizes = [2, 32], strides = [1, 1]} : vector<2x128xf32> to vector<2x32xf32>
    %878 = math.tanh %877 : vector<2x32xf32>
    %879 = vector.extract_strided_slice %864 {offsets = [0, 96], sizes = [2, 32], strides = [1, 1]} : vector<2x128xf32> to vector<2x32xf32>
    %880 = arith.negf %879 : vector<2x32xf32>
    %881 = math.exp %880 : vector<2x32xf32>
    %cst_204 = arith.constant 1.000000e+00 : f32
    %882 = vector.broadcast %cst_204 : f32 to vector<2x32xf32>
    %883 = arith.addf %882, %881 : vector<2x32xf32>
    %884 = arith.divf %882, %883 : vector<2x32xf32>
    %885 = arith.mulf %876, %861 : vector<2x32xf32>
    %886 = arith.mulf %870, %878 : vector<2x32xf32>
    %887 = arith.addf %885, %886 : vector<2x32xf32>
    %888 = math.tanh %887 : vector<2x32xf32>
    %889 = arith.mulf %884, %888 : vector<2x32xf32>
    %cst_205 = arith.constant dense<0.000000e+00> : vector<2x16xf32>
    %890 = tpu.matmul %889, %6, %cst_205 {dimension_numbers = #tpu.dot_dimension_numbers<[1], [0], [0], [1], [0, 0, 1, 1], [], []>} : vector<2x32xf32>, vector<32x16xf32>, vector<2x16xf32> -> vector<2x16xf32>
    %891 = vector.broadcast %7 : vector<1x16xf32> to vector<2x16xf32>
    %892 = arith.addf %890, %891 : vector<2x16xf32>
    %893 = math.tanh %892 : vector<2x16xf32>
    %cst_206 = arith.constant dense<0.000000e+00> : vector<2x16xf32>
    %894 = tpu.matmul %893, %13, %cst_206 {dimension_numbers = #tpu.dot_dimension_numbers<[1], [0], [0], [1], [0, 0, 1, 1], [], []>} : vector<2x16xf32>, vector<16x16xf32>, vector<2x16xf32> -> vector<2x16xf32>
    %895 = vector.broadcast %14 : vector<1x16xf32> to vector<2x16xf32>
    %896 = arith.addf %894, %895 : vector<2x16xf32>
    %c0_207 = arith.constant 0 : index
    %c0_208 = arith.constant 0 : index
    %c64 = arith.constant 64 : index
    %897 = vector.load %arg22[%c0_207, %c0_208, %c64] : memref<1x2x128xf32, #tpu.memory_space<vmem>>, vector<1x2x16xf32>
    %898 = vector.shape_cast %897 : vector<1x2x16xf32> to vector<2x16xf32>
    %899 = vector.shape_cast %896 : vector<2x16xf32> to vector<1x2x16xf32>
    tpu.vector_store %arg22[%c0_207, %c0_208, %c64], %899 {strides = array<i32>} : memref<1x2x128xf32, #tpu.memory_space<vmem>>, vector<1x2x16xf32>,
    %cst_209 = arith.constant dense<0.000000e+00> : vector<2x32xf32>
    %900 = tpu.matmul %889, %8, %cst_209 {dimension_numbers = #tpu.dot_dimension_numbers<[1], [0], [0], [1], [0, 0, 1, 1], [], []>} : vector<2x32xf32>, vector<32x32xf32>, vector<2x32xf32> -> vector<2x32xf32>
    %cst_210 = arith.constant dense<0.000000e+00> : vector<2x32xf32>
    %901 = tpu.matmul %893, %9, %cst_210 {dimension_numbers = #tpu.dot_dimension_numbers<[1], [0], [0], [1], [0, 0, 1, 1], [], []>} : vector<2x16xf32>, vector<16x32xf32>, vector<2x32xf32> -> vector<2x32xf32>
    %902 = arith.addf %900, %901 : vector<2x32xf32>
    %903 = vector.broadcast %10 : vector<1x32xf32> to vector<2x32xf32>
    %904 = arith.addf %902, %903 : vector<2x32xf32>
    %905 = vector.extract_strided_slice %689 {offsets = [10, 0], sizes = [2, 128], strides = [1, 1]} : vector<16x128xf32> to vector<2x128xf32>
    %cst_211 = arith.constant dense<0.000000e+00> : vector<2x128xf32>
    %906 = tpu.matmul %904, %11, %cst_211 {dimension_numbers = #tpu.dot_dimension_numbers<[1], [0], [0], [1], [0, 0, 1, 1], [], []>} : vector<2x32xf32>, vector<32x128xf32>, vector<2x128xf32> -> vector<2x128xf32>
    %907 = arith.addf %905, %906 : vector<2x128xf32>
    %908 = vector.extract_strided_slice %907 {offsets = [0, 0], sizes = [2, 32], strides = [1, 1]} : vector<2x128xf32> to vector<2x32xf32>
    %909 = arith.negf %908 : vector<2x32xf32>
    %910 = math.exp %909 : vector<2x32xf32>
    %cst_212 = arith.constant 1.000000e+00 : f32
    %911 = vector.broadcast %cst_212 : f32 to vector<2x32xf32>
    %912 = arith.addf %911, %910 : vector<2x32xf32>
    %913 = arith.divf %911, %912 : vector<2x32xf32>
    %914 = vector.extract_strided_slice %907 {offsets = [0, 32], sizes = [2, 32], strides = [1, 1]} : vector<2x128xf32> to vector<2x32xf32>
    %915 = arith.negf %914 : vector<2x32xf32>
    %916 = math.exp %915 : vector<2x32xf32>
    %cst_213 = arith.constant 1.000000e+00 : f32
    %917 = vector.broadcast %cst_213 : f32 to vector<2x32xf32>
    %918 = arith.addf %917, %916 : vector<2x32xf32>
    %919 = arith.divf %917, %918 : vector<2x32xf32>
    %920 = vector.extract_strided_slice %907 {offsets = [0, 64], sizes = [2, 32], strides = [1, 1]} : vector<2x128xf32> to vector<2x32xf32>
    %921 = math.tanh %920 : vector<2x32xf32>
    %922 = vector.extract_strided_slice %907 {offsets = [0, 96], sizes = [2, 32], strides = [1, 1]} : vector<2x128xf32> to vector<2x32xf32>
    %923 = arith.negf %922 : vector<2x32xf32>
    %924 = math.exp %923 : vector<2x32xf32>
    %cst_214 = arith.constant 1.000000e+00 : f32
    %925 = vector.broadcast %cst_214 : f32 to vector<2x32xf32>
    %926 = arith.addf %925, %924 : vector<2x32xf32>
    %927 = arith.divf %925, %926 : vector<2x32xf32>
    %928 = arith.mulf %919, %904 : vector<2x32xf32>
    %929 = arith.mulf %913, %921 : vector<2x32xf32>
    %930 = arith.addf %928, %929 : vector<2x32xf32>
    %931 = math.tanh %930 : vector<2x32xf32>
    %932 = arith.mulf %927, %931 : vector<2x32xf32>
    %cst_215 = arith.constant dense<0.000000e+00> : vector<2x16xf32>
    %933 = tpu.matmul %932, %6, %cst_215 {dimension_numbers = #tpu.dot_dimension_numbers<[1], [0], [0], [1], [0, 0, 1, 1], [], []>} : vector<2x32xf32>, vector<32x16xf32>, vector<2x16xf32> -> vector<2x16xf32>
    %934 = vector.broadcast %7 : vector<1x16xf32> to vector<2x16xf32>
    %935 = arith.addf %933, %934 : vector<2x16xf32>
    %936 = math.tanh %935 : vector<2x16xf32>
    %cst_216 = arith.constant dense<0.000000e+00> : vector<2x16xf32>
    %937 = tpu.matmul %936, %13, %cst_216 {dimension_numbers = #tpu.dot_dimension_numbers<[1], [0], [0], [1], [0, 0, 1, 1], [], []>} : vector<2x16xf32>, vector<16x16xf32>, vector<2x16xf32> -> vector<2x16xf32>
    %938 = vector.broadcast %14 : vector<1x16xf32> to vector<2x16xf32>
    %939 = arith.addf %937, %938 : vector<2x16xf32>
    %c0_217 = arith.constant 0 : index
    %c0_218 = arith.constant 0 : index
    %c80 = arith.constant 80 : index
    %940 = vector.load %arg22[%c0_217, %c0_218, %c80] : memref<1x2x128xf32, #tpu.memory_space<vmem>>, vector<1x2x16xf32>
    %941 = vector.shape_cast %940 : vector<1x2x16xf32> to vector<2x16xf32>
    %942 = vector.shape_cast %939 : vector<2x16xf32> to vector<1x2x16xf32>
    tpu.vector_store %arg22[%c0_217, %c0_218, %c80], %942 {strides = array<i32>} : memref<1x2x128xf32, #tpu.memory_space<vmem>>, vector<1x2x16xf32>,
    %cst_219 = arith.constant dense<0.000000e+00> : vector<2x32xf32>
    %943 = tpu.matmul %932, %8, %cst_219 {dimension_numbers = #tpu.dot_dimension_numbers<[1], [0], [0], [1], [0, 0, 1, 1], [], []>} : vector<2x32xf32>, vector<32x32xf32>, vector<2x32xf32> -> vector<2x32xf32>
    %cst_220 = arith.constant dense<0.000000e+00> : vector<2x32xf32>
    %944 = tpu.matmul %936, %9, %cst_220 {dimension_numbers = #tpu.dot_dimension_numbers<[1], [0], [0], [1], [0, 0, 1, 1], [], []>} : vector<2x16xf32>, vector<16x32xf32>, vector<2x32xf32> -> vector<2x32xf32>
    %945 = arith.addf %943, %944 : vector<2x32xf32>
    %946 = vector.broadcast %10 : vector<1x32xf32> to vector<2x32xf32>
    %947 = arith.addf %945, %946 : vector<2x32xf32>
    %948 = vector.extract_strided_slice %689 {offsets = [12, 0], sizes = [2, 128], strides = [1, 1]} : vector<16x128xf32> to vector<2x128xf32>
    %cst_221 = arith.constant dense<0.000000e+00> : vector<2x128xf32>
    %949 = tpu.matmul %947, %11, %cst_221 {dimension_numbers = #tpu.dot_dimension_numbers<[1], [0], [0], [1], [0, 0, 1, 1], [], []>} : vector<2x32xf32>, vector<32x128xf32>, vector<2x128xf32> -> vector<2x128xf32>
    %950 = arith.addf %948, %949 : vector<2x128xf32>
    %951 = vector.extract_strided_slice %950 {offsets = [0, 0], sizes = [2, 32], strides = [1, 1]} : vector<2x128xf32> to vector<2x32xf32>
    %952 = arith.negf %951 : vector<2x32xf32>
    %953 = math.exp %952 : vector<2x32xf32>
    %cst_222 = arith.constant 1.000000e+00 : f32
    %954 = vector.broadcast %cst_222 : f32 to vector<2x32xf32>
    %955 = arith.addf %954, %953 : vector<2x32xf32>
    %956 = arith.divf %954, %955 : vector<2x32xf32>
    %957 = vector.extract_strided_slice %950 {offsets = [0, 32], sizes = [2, 32], strides = [1, 1]} : vector<2x128xf32> to vector<2x32xf32>
    %958 = arith.negf %957 : vector<2x32xf32>
    %959 = math.exp %958 : vector<2x32xf32>
    %cst_223 = arith.constant 1.000000e+00 : f32
    %960 = vector.broadcast %cst_223 : f32 to vector<2x32xf32>
    %961 = arith.addf %960, %959 : vector<2x32xf32>
    %962 = arith.divf %960, %961 : vector<2x32xf32>
    %963 = vector.extract_strided_slice %950 {offsets = [0, 64], sizes = [2, 32], strides = [1, 1]} : vector<2x128xf32> to vector<2x32xf32>
    %964 = math.tanh %963 : vector<2x32xf32>
    %965 = vector.extract_strided_slice %950 {offsets = [0, 96], sizes = [2, 32], strides = [1, 1]} : vector<2x128xf32> to vector<2x32xf32>
    %966 = arith.negf %965 : vector<2x32xf32>
    %967 = math.exp %966 : vector<2x32xf32>
    %cst_224 = arith.constant 1.000000e+00 : f32
    %968 = vector.broadcast %cst_224 : f32 to vector<2x32xf32>
    %969 = arith.addf %968, %967 : vector<2x32xf32>
    %970 = arith.divf %968, %969 : vector<2x32xf32>
    %971 = arith.mulf %962, %947 : vector<2x32xf32>
    %972 = arith.mulf %956, %964 : vector<2x32xf32>
    %973 = arith.addf %971, %972 : vector<2x32xf32>
    %974 = math.tanh %973 : vector<2x32xf32>
    %975 = arith.mulf %970, %974 : vector<2x32xf32>
    %cst_225 = arith.constant dense<0.000000e+00> : vector<2x16xf32>
    %976 = tpu.matmul %975, %6, %cst_225 {dimension_numbers = #tpu.dot_dimension_numbers<[1], [0], [0], [1], [0, 0, 1, 1], [], []>} : vector<2x32xf32>, vector<32x16xf32>, vector<2x16xf32> -> vector<2x16xf32>
    %977 = vector.broadcast %7 : vector<1x16xf32> to vector<2x16xf32>
    %978 = arith.addf %976, %977 : vector<2x16xf32>
    %979 = math.tanh %978 : vector<2x16xf32>
    %cst_226 = arith.constant dense<0.000000e+00> : vector<2x16xf32>
    %980 = tpu.matmul %979, %13, %cst_226 {dimension_numbers = #tpu.dot_dimension_numbers<[1], [0], [0], [1], [0, 0, 1, 1], [], []>} : vector<2x16xf32>, vector<16x16xf32>, vector<2x16xf32> -> vector<2x16xf32>
    %981 = vector.broadcast %14 : vector<1x16xf32> to vector<2x16xf32>
    %982 = arith.addf %980, %981 : vector<2x16xf32>
    %c0_227 = arith.constant 0 : index
    %c0_228 = arith.constant 0 : index
    %c96 = arith.constant 96 : index
    %983 = vector.load %arg22[%c0_227, %c0_228, %c96] : memref<1x2x128xf32, #tpu.memory_space<vmem>>, vector<1x2x16xf32>
    %984 = vector.shape_cast %983 : vector<1x2x16xf32> to vector<2x16xf32>
    %985 = vector.shape_cast %982 : vector<2x16xf32> to vector<1x2x16xf32>
    tpu.vector_store %arg22[%c0_227, %c0_228, %c96], %985 {strides = array<i32>} : memref<1x2x128xf32, #tpu.memory_space<vmem>>, vector<1x2x16xf32>,
    %cst_229 = arith.constant dense<0.000000e+00> : vector<2x32xf32>
    %986 = tpu.matmul %975, %8, %cst_229 {dimension_numbers = #tpu.dot_dimension_numbers<[1], [0], [0], [1], [0, 0, 1, 1], [], []>} : vector<2x32xf32>, vector<32x32xf32>, vector<2x32xf32> -> vector<2x32xf32>
    %cst_230 = arith.constant dense<0.000000e+00> : vector<2x32xf32>
    %987 = tpu.matmul %979, %9, %cst_230 {dimension_numbers = #tpu.dot_dimension_numbers<[1], [0], [0], [1], [0, 0, 1, 1], [], []>} : vector<2x16xf32>, vector<16x32xf32>, vector<2x32xf32> -> vector<2x32xf32>
    %988 = arith.addf %986, %987 : vector<2x32xf32>
    %989 = vector.broadcast %10 : vector<1x32xf32> to vector<2x32xf32>
    %990 = arith.addf %988, %989 : vector<2x32xf32>
    %991 = vector.extract_strided_slice %689 {offsets = [14, 0], sizes = [2, 128], strides = [1, 1]} : vector<16x128xf32> to vector<2x128xf32>
    %cst_231 = arith.constant dense<0.000000e+00> : vector<2x128xf32>
    %992 = tpu.matmul %990, %11, %cst_231 {dimension_numbers = #tpu.dot_dimension_numbers<[1], [0], [0], [1], [0, 0, 1, 1], [], []>} : vector<2x32xf32>, vector<32x128xf32>, vector<2x128xf32> -> vector<2x128xf32>
    %993 = arith.addf %991, %992 : vector<2x128xf32>
    %994 = vector.extract_strided_slice %993 {offsets = [0, 0], sizes = [2, 32], strides = [1, 1]} : vector<2x128xf32> to vector<2x32xf32>
    %995 = arith.negf %994 : vector<2x32xf32>
    %996 = math.exp %995 : vector<2x32xf32>
    %cst_232 = arith.constant 1.000000e+00 : f32
    %997 = vector.broadcast %cst_232 : f32 to vector<2x32xf32>
    %998 = arith.addf %997, %996 : vector<2x32xf32>
    %999 = arith.divf %997, %998 : vector<2x32xf32>
    %1000 = vector.extract_strided_slice %993 {offsets = [0, 32], sizes = [2, 32], strides = [1, 1]} : vector<2x128xf32> to vector<2x32xf32>
    %1001 = arith.negf %1000 : vector<2x32xf32>
    %1002 = math.exp %1001 : vector<2x32xf32>
    %cst_233 = arith.constant 1.000000e+00 : f32
    %1003 = vector.broadcast %cst_233 : f32 to vector<2x32xf32>
    %1004 = arith.addf %1003, %1002 : vector<2x32xf32>
    %1005 = arith.divf %1003, %1004 : vector<2x32xf32>
    %1006 = vector.extract_strided_slice %993 {offsets = [0, 64], sizes = [2, 32], strides = [1, 1]} : vector<2x128xf32> to vector<2x32xf32>
    %1007 = math.tanh %1006 : vector<2x32xf32>
    %1008 = vector.extract_strided_slice %993 {offsets = [0, 96], sizes = [2, 32], strides = [1, 1]} : vector<2x128xf32> to vector<2x32xf32>
    %1009 = arith.negf %1008 : vector<2x32xf32>
    %1010 = math.exp %1009 : vector<2x32xf32>
    %cst_234 = arith.constant 1.000000e+00 : f32
    %1011 = vector.broadcast %cst_234 : f32 to vector<2x32xf32>
    %1012 = arith.addf %1011, %1010 : vector<2x32xf32>
    %1013 = arith.divf %1011, %1012 : vector<2x32xf32>
    %1014 = arith.mulf %1005, %990 : vector<2x32xf32>
    %1015 = arith.mulf %999, %1007 : vector<2x32xf32>
    %1016 = arith.addf %1014, %1015 : vector<2x32xf32>
    %1017 = math.tanh %1016 : vector<2x32xf32>
    %1018 = arith.mulf %1013, %1017 : vector<2x32xf32>
    %cst_235 = arith.constant dense<0.000000e+00> : vector<2x16xf32>
    %1019 = tpu.matmul %1018, %6, %cst_235 {dimension_numbers = #tpu.dot_dimension_numbers<[1], [0], [0], [1], [0, 0, 1, 1], [], []>} : vector<2x32xf32>, vector<32x16xf32>, vector<2x16xf32> -> vector<2x16xf32>
    %1020 = vector.broadcast %7 : vector<1x16xf32> to vector<2x16xf32>
    %1021 = arith.addf %1019, %1020 : vector<2x16xf32>
    %1022 = math.tanh %1021 : vector<2x16xf32>
    %cst_236 = arith.constant dense<0.000000e+00> : vector<2x16xf32>
    %1023 = tpu.matmul %1022, %13, %cst_236 {dimension_numbers = #tpu.dot_dimension_numbers<[1], [0], [0], [1], [0, 0, 1, 1], [], []>} : vector<2x16xf32>, vector<16x16xf32>, vector<2x16xf32> -> vector<2x16xf32>
    %1024 = vector.broadcast %14 : vector<1x16xf32> to vector<2x16xf32>
    %1025 = arith.addf %1023, %1024 : vector<2x16xf32>
    %c0_237 = arith.constant 0 : index
    %c0_238 = arith.constant 0 : index
    %c112 = arith.constant 112 : index
    %1026 = vector.load %arg22[%c0_237, %c0_238, %c112] : memref<1x2x128xf32, #tpu.memory_space<vmem>>, vector<1x2x16xf32>
    %1027 = vector.shape_cast %1026 : vector<1x2x16xf32> to vector<2x16xf32>
    %1028 = vector.shape_cast %1025 : vector<2x16xf32> to vector<1x2x16xf32>
    tpu.vector_store %arg22[%c0_237, %c0_238, %c112], %1028 {strides = array<i32>} : memref<1x2x128xf32, #tpu.memory_space<vmem>>, vector<1x2x16xf32>,
    return
  }
  func.func @transform_0(%arg0: i32) -> (i32, i32, i32) {
    %c0_i32 = arith.constant 0 : i32
    %c0_i32_0 = arith.constant 0 : i32
    %c0_i32_1 = arith.constant 0 : i32
    return %arg0, %c0_i32, %c0_i32_0 : i32, i32, i32
  }
  func.func @transform_1(%arg0: i32) -> (i32, i32, i32) {
    %c0_i32 = arith.constant 0 : i32
    %c0_i32_0 = arith.constant 0 : i32
    %c0_i32_1 = arith.constant 0 : i32
    return %arg0, %c0_i32, %c0_i32_0 : i32, i32, i32
  }
  func.func @transform_2(%arg0: i32) -> (i32, i32) {
    %c0_i32 = arith.constant 0 : i32
    %c0_i32_0 = arith.constant 0 : i32
    %c0_i32_1 = arith.constant 0 : i32
    return %c0_i32, %c0_i32_0 : i32, i32
  }
  func.func @transform_3(%arg0: i32) -> (i32, i32) {
    %c0_i32 = arith.constant 0 : i32
    %c0_i32_0 = arith.constant 0 : i32
    %c0_i32_1 = arith.constant 0 : i32
    return %c0_i32, %c0_i32_0 : i32, i32
  }
  func.func @transform_4(%arg0: i32) -> (i32, i32) {
    %c0_i32 = arith.constant 0 : i32
    %c0_i32_0 = arith.constant 0 : i32
    %c0_i32_1 = arith.constant 0 : i32
    return %c0_i32, %c0_i32_0 : i32, i32
  }
  func.func @transform_5(%arg0: i32) -> (i32, i32) {
    %c0_i32 = arith.constant 0 : i32
    %c0_i32_0 = arith.constant 0 : i32
    %c0_i32_1 = arith.constant 0 : i32
    return %c0_i32, %c0_i32_0 : i32, i32
  }
  func.func @transform_6(%arg0: i32) -> (i32, i32) {
    %c0_i32 = arith.constant 0 : i32
    %c0_i32_0 = arith.constant 0 : i32
    %c0_i32_1 = arith.constant 0 : i32
    return %c0_i32, %c0_i32_0 : i32, i32
  }
  func.func @transform_7(%arg0: i32) -> (i32, i32) {
    %c0_i32 = arith.constant 0 : i32
    %c0_i32_0 = arith.constant 0 : i32
    %c0_i32_1 = arith.constant 0 : i32
    return %c0_i32, %c0_i32_0 : i32, i32
  }
  func.func @transform_8(%arg0: i32) -> (i32, i32) {
    %c0_i32 = arith.constant 0 : i32
    %c0_i32_0 = arith.constant 0 : i32
    %c0_i32_1 = arith.constant 0 : i32
    return %c0_i32, %c0_i32_0 : i32, i32
  }
  func.func @transform_9(%arg0: i32) -> (i32, i32) {
    %c0_i32 = arith.constant 0 : i32
    %c0_i32_0 = arith.constant 0 : i32
    %c0_i32_1 = arith.constant 0 : i32
    return %c0_i32, %c0_i32_0 : i32, i32
  }
  func.func @transform_10(%arg0: i32) -> (i32, i32) {
    %c0_i32 = arith.constant 0 : i32
    %c0_i32_0 = arith.constant 0 : i32
    %c0_i32_1 = arith.constant 0 : i32
    return %c0_i32, %c0_i32_0 : i32, i32
  }
  func.func @transform_11(%arg0: i32) -> (i32, i32) {
    %c0_i32 = arith.constant 0 : i32
    %c0_i32_0 = arith.constant 0 : i32
    %c0_i32_1 = arith.constant 0 : i32
    return %c0_i32, %c0_i32_0 : i32, i32
  }
  func.func @transform_12(%arg0: i32) -> (i32, i32) {
    %c0_i32 = arith.constant 0 : i32
    %c0_i32_0 = arith.constant 0 : i32
    %c0_i32_1 = arith.constant 0 : i32
    return %c0_i32, %c0_i32_0 : i32, i32
  }
  func.func @transform_13(%arg0: i32) -> (i32, i32) {
    %c0_i32 = arith.constant 0 : i32
    %c0_i32_0 = arith.constant 0 : i32
    %c0_i32_1 = arith.constant 0 : i32
    return %c0_i32, %c0_i32_0 : i32, i32
  }
  func.func @transform_14(%arg0: i32) -> (i32, i32) {
    %c0_i32 = arith.constant 0 : i32
    %c0_i32_0 = arith.constant 0 : i32
    %c0_i32_1 = arith.constant 0 : i32
    return %c0_i32, %c0_i32_0 : i32, i32
  }
  func.func @transform_15(%arg0: i32) -> (i32, i32) {
    %c0_i32 = arith.constant 0 : i32
    %c0_i32_0 = arith.constant 0 : i32
    %c0_i32_1 = arith.constant 0 : i32
    return %c0_i32, %c0_i32_0 : i32, i32
  }
  func.func @transform_16(%arg0: i32) -> (i32, i32) {
    %c0_i32 = arith.constant 0 : i32
    %c0_i32_0 = arith.constant 0 : i32
    %c0_i32_1 = arith.constant 0 : i32
    return %c0_i32, %c0_i32_0 : i32, i32
  }
  func.func @transform_17(%arg0: i32) -> (i32, i32) {
    %c0_i32 = arith.constant 0 : i32
    %c0_i32_0 = arith.constant 0 : i32
    %c0_i32_1 = arith.constant 0 : i32
    return %c0_i32, %c0_i32_0 : i32, i32
  }
  func.func @transform_18(%arg0: i32) -> (i32, i32) {
    %c0_i32 = arith.constant 0 : i32
    %c0_i32_0 = arith.constant 0 : i32
    %c0_i32_1 = arith.constant 0 : i32
    return %c0_i32, %c0_i32_0 : i32, i32
  }
  func.func @transform_19(%arg0: i32) -> (i32, i32) {
    %c0_i32 = arith.constant 0 : i32
    %c0_i32_0 = arith.constant 0 : i32
    %c0_i32_1 = arith.constant 0 : i32
    return %c0_i32, %c0_i32_0 : i32, i32
  }
  func.func @transform_20(%arg0: i32) -> (i32, i32) {
    %c0_i32 = arith.constant 0 : i32
    %c0_i32_0 = arith.constant 0 : i32
    %c0_i32_1 = arith.constant 0 : i32
    return %c0_i32, %c0_i32_0 : i32, i32
  }
  func.func @transform_21(%arg0: i32) -> (i32, i32, i32) {
    %c0_i32 = arith.constant 0 : i32
    %c0_i32_0 = arith.constant 0 : i32
    %c0_i32_1 = arith.constant 0 : i32
    return %arg0, %c0_i32, %c0_i32_0 : i32, i32, i32
  }
}

</mosaic_0001>

<bundles_post_ra>
// kernel: double_lstm_forward.1
= control target key start
LH: loop header
LB: loop body
LE: loop exit
PB: predicated region body
PF: predicated region fallthrough
CT: control target
= control target key end

     0   :  { %v7176_v1 = vmov 0.0|0.0   ;;  %v7177_v2 = vmov 0   ;;  %vm7178_vm0 = vmmov 0   ;;  %v7179_v6 = vmov 0.0   ;;  %s7180_s23 = smov 64   ;;  %s7181_s25 = smov 32   ;;  %s8320_s2 = inlined_call_operand.vmem [shape: bf16[32,256], index: 2, kind: input, shape index: {}]   ;;  %s8321_s4 = inlined_call_operand.vmem [shape: f32[32,128], index: 4, kind: input, shape index: {}]   ;;  %s8322_s0 = inlined_call_operand.vmem [shape: bf16[1,16,32], index: 0, kind: input, shape index: {}]   ;;  %s8323_s6 = inlined_call_operand.vmem [shape: f32[2,32], index: 6, kind: input, shape index: {}]   ;;  %s8324_s3 = inlined_call_operand.vmem [shape: f32[1,256], index: 3, kind: input, shape index: {}]   ;;  %s8325_s7 = inlined_call_operand.vmem [shape: f32[2,32], index: 7, kind: input, shape index: {}]   ;;  %s8326_s1 = inlined_call_operand.vmem [shape: f32[1,16,1], index: 1, kind: input, shape index: {}]   ;;  %s8327_s5 = inlined_call_operand.vmem [shape: f32[32,128], index: 5, kind: input, shape index: {}]   ;;  %s8328_s8 = inlined_call_operand.vmem [shape: f32[32,32], index: 8, kind: input, shape index: {}]   ;;  %s8329_s9 = inlined_call_operand.vmem [shape: f32[32,32], index: 9, kind: input, shape index: {}]   ;;  %s8330_s11 = inlined_call_operand.vmem [shape: f32[32,16], index: 11, kind: input, shape index: {}]   ;;  %s8331_s13 = inlined_call_operand.vmem [shape: f32[32,32], index: 13, kind: input, shape index: {}]   ;;  %s8332_s10 = inlined_call_operand.vmem [shape: f32[1,32], index: 10, kind: input, shape index: {}]   ;;  %s8333_s14 = inlined_call_operand.vmem [shape: f32[16,32], index: 14, kind: input, shape index: {}]   ;;  %s8334_s16 = inlined_call_operand.vmem [shape: f32[64,128], index: 16, kind: input, shape index: {}]   ;;  %s8335_s17 = inlined_call_operand.vmem [shape: f32[32,128], index: 17, kind: input, shape index: {}]   ;;  %s8336_s12 = inlined_call_operand.vmem [shape: f32[1,16], index: 12, kind: input, shape index: {}]   ;;  %s8337_s15 = inlined_call_operand.vmem [shape: f32[1,32], index: 15, kind: input, shape index: {}]   ;;  %s8338_s18 = inlined_call_operand.vmem [shape: f32[1,128], index: 18, kind: input, shape index: {}]   ;;  %s8339_s19 = inlined_call_operand.vmem [shape: f32[16,16], index: 19, kind: input, shape index: {}]   ;;  %s8340_s20 = inlined_call_operand.vmem [shape: f32[1,16], index: 20, kind: input, shape index: {}]   ;;  %s8341_s21 = inlined_call_operand.vmem [shape: f32[1,2,128], index: 21, kind: output, shape index: {}]  }
   0x1   :  { %8346 = sst [smem:[#allocation3_spill]] %s8320_s2  ;;  %6623 = vmatprep.subr.bf16.mxu1 %v7176_v1  ;;  %180 = vmatprep.mubr.bf16.mxu0 %v7177_v2  ;;  %vm144_vm1 = vcmask 261120   ;;  %v109_v15 = vlaneseq  ;;  %v69_v37 = vld [vmem:[%s8326_s1] sm:$0xff]  ;;  %s7182_s28 = smov 96   ;;  %vm435_vm6 = vcmask 257026   ;;  %vm671_vm7 = vcmask 261126  }
   0x2   :  { %8347 = sst [smem:[#allocation4_spill]] %s8321_s4  ;;  %s8352_s26 = sld [smem:[#allocation3_spill]]  ;;  %6027 = vmatprep.mubr.msk.f32.mxu1 %vm7178_vm0, %v7179_v6  ;;  %6956 = vset.pattern.permute.xlu1 %v7177_v2  ;;  %vm71_vm2 = vcmp.gt.f32.partialorder %v69_v37, 0.0  ;;  %vm318_vm8 = vcmask 254976   ;;  %vm1615_vm9 = vcmask 517376   ;;  %vm553_vm10 = vcmask 259076  }
   0x3   :  { %8348 = sst [smem:[#allocation5_spill]] %s8322_s0  ;;  %s8353_s2 = sld [smem:[#allocation4_spill]]  ;;  %6957 = vset.pattern.permute.xlu0 %v7177_v2  ;;  %v110_v16 = vshrl.u32 %v109_v15, 7  ;;  %v303_v41 = vsel %vm71_vm2, 1, %v7177_v2  ;;  %vm1383_vm11 = vcmask 521476   ;;  %vm1265_vm12 = vcmask 523526  }
   0x4   :  { %8349 = sst [smem:[#allocation6_spill]] %s8323_s6  ;;  %s8354_s29 = sld [smem:[#allocation5_spill]]  ;;  %vm1501_vm13 = vcmask 519426   ;;  %vm2326_vm14 = vcmask 130048   ;;  %vm2493_vm15 = vcmask 523264   ;;  %vm2831_vm2 = vcmask 123904  }
   0x5   :  { %8350 = sst [smem:[#allocation7_spill]] %s8324_s3  ;;  %s8355_s30 = sld [smem:[#allocation6_spill]]  ;;  %v111_v17 = vsub.s32 0, %v110_v16  ;;  %v115_v19 = vsub.s32 1, %v110_v16 }
   0x6   :  { %8351 = sst [smem:[#allocation8_spill]] %s8325_s7  ;;  %s8356_s22 = sld [smem:[#allocation7_spill]] }
   0x7   :  { %s8357_s0 = sld [smem:[#allocation8_spill]] }
   0x8   :  { %v6958_v0 = vld [vmem:[%s8352_s26 + $0x4] ss:$8 sps:$4 sm:$0xff]   ;;  %v6960_v3 = vld [vmem:[%s8352_s26] ss:$8 sps:$4 sm:$0xff]   ;;  %v6961_v8 = vld [vmem:[%s8352_s26 + $0x14] ss:$8 sps:$4 sm:$0xff]  }
   0x9   :  { %v73_v4 = vld [vmem:[%s8353_s2] sm:$0xff]  ;;  %v74_v5 = vld [vmem:[%s8353_s2 + $0x8] sm:$0xff]  ;;  %148 = vmatprep.subr.bf16.mxu0 %v6958_v0  ;;  %v6963_v9 = vld [vmem:[%s8352_s26 + $0x10] ss:$8 sps:$4 sm:$0xff]  }
   0xa   :  { %v7314_v7 = vpack.c.bf16 %v74_v5, %v73_v4  ;;  %149 = vmatpush1.bf16.msra.mxu0 %v6960_v3  ;;  %v75_v10 = vld [vmem:[%s8353_s2 + $0x10] sm:$0xff]  ;;  %v76_v11 = vld [vmem:[%s8353_s2 + $0x18] sm:$0xff]  ;;  %v6964_v13 = vld [vmem:[%s8354_s29] sm:$0xff]  }
   0xb   :  { %150 = vmatprep.subr.bf16.mxu0 %v6961_v8  ;;  %v7330_v12 = vpack.c.bf16 %v76_v11, %v75_v10  ;;  %v5652_v14 = vld [vmem:[%s8355_s30] ss:$0 sm:$0xff] }
   0xc   :  { %6625 = vmatpush3.bf16.msra.mxu1 %v7314_v7  ;;  %v107_v18 = vld [vmem:[%s8356_s22] sm:$0x3] }
   0xd   :  { %6626 = vmatprep.subr.bf16.mxu1 %v7176_v1  ;;  %v112_v20 = vrot.slane %v107_v18, %v111_v17  ;;  %v7359_v21 = vrot.slane %v107_v18, %v115_v19  ;;  %v5653_v33 = vld [vmem:[%s8357_s0] ss:$0 sm:$0xff] }
   0xe   :  { %151 = vmatpush1.bf16.msra.mxu0 %v6963_v9 }
   0xf   :  { %6629 = vmatprep.subr.bf16.mxu0 %v7176_v1 }
  0x10   :  { %6628 = vmatpush3.bf16.msra.mxu1 %v7330_v12 }
  0x11   :  { %6635 = vmatprep.subr.bf16.mxu1 %v7176_v1  ;;  %5651 = vmatmul.mubr.msk.bf16.vlgmr.msra.gmra.mrb[0].mxu0 %vm144_vm1, %v6964_v13 }
  0x12   :  { %6631 = vmatpush3.bf16.msra.mxu0 %v7314_v7  ;;  %6038 = vmatprep.mubr.msk.f32.mxu0 %vm7178_vm0, %v7179_v6 }
  0x13   :  { %6028 = vmatmul.mubr.msk.f32.vlgmr.msra.gmra.mrb[0].mxu1 %vm144_vm1, %v5652_v14  ;;  %6632 = vmatprep.subr.bf16.mxu0 %v7176_v1 }
  0x14   :  { %6637 = vmatpush3.bf16.msra.mxu1 %v7314_v7  ;;  %6049 = vmatprep.mubr.msk.f32.mxu1 %vm7178_vm0, %v7179_v6 }
  0x15   :  { %6638 = vmatprep.subr.bf16.mxu1 %v7176_v1 }
  0x16   :  { %6634 = vmatpush3.bf16.msra.mxu0 %v7330_v12 }
  0x17   :  { %6641 = vmatprep.subr.bf16.mxu0 %v7176_v1 }
  0x18   :  { %6640 = vmatpush3.bf16.msra.mxu1 %v7330_v12 }
  0x19   :  { %6647 = vmatprep.subr.bf16.mxu1 %v7176_v1 }
  0xe4   :  { %v182_v22 = vpop.f32.mrb[0].mxu0 }
  0xe5   :  { %v7361_v23 = vadd.f32 %v182_v22, %v112_v20  ;;  %v184_v24 = vpop.f32.mrb[1].mxu0 }
  0xe6   :  { %v270_v25 = vpop.f32.mrb[0].mxu1  ;;  %v7364_v26 = vadd.f32 %v184_v24, %v7359_v21  ;;  %v186_v27 = vpop.f32.mrb[2].mxu0 }
  0xe7   :  { %v6029_v28 = vpop.f32.mrb[1].mxu1  ;;  %v274_v29 = vadd.f32 %v270_v25, %v7361_v23  ;;  %v7367_v30 = vadd.f32 %v186_v27, %v112_v20  ;;  %v7369_v31 = vpop.f32.mrb[3].mxu0 }
  0xe9   :  { %6965 = vtanh.f32 %v274_v29  ;;  %v5655_v34 = vmul.f32 -1.442695, %v274_v29 }
  0xeb   :  { %6967 = vpow2.f32 %v5655_v34 }
  0xf3   :  { %v6966_v32 = vpop.eup %6965 }
  0xf4   :  { %288 = vrot.lane.b32.xlu0 %v6966_v32, %s7180_s23 }
  0xf5   :  { %v6968_v35 = vpop.eup %6967 }
  0xf6   :  { %v278_v36 = vadd.f32 1.0, %v6968_v35 }
  0xf8   :  { %283 = vrot.lane.b32.xlu0 %v5653_v33, %s7181_s25  ;;  %6969 = vrcp.f32 %v278_v36 }
 0x102   :  { %v6970_v38 = vpop.eup %6969 }
 0x166   :  { %v289_v39 = vpop.permute.xlu0 %288 }
 0x167   :  { %v291_v40 = vmul.f32 %v6970_v38, %v289_v39 }
 0x169   :  { %293 = vrot.lane.b32.xlu1 %v291_v40, %s7181_s25 }
 0x16a   :  { %v284_v42 = vpop.permute.xlu0 %283 }
 0x16b   :  { %v286_v43 = vmul.f32 %v6970_v38, %v284_v42 }
 0x16d   :  { %305 = vperm.xlu1 %6956, %v303_v41  }
 0x171   :  { %308 = vrot.lane.b32.xlu1 %v5652_v14, %s7182_s28 }
 0x1db   :  { %v294_v44 = vpop.permute.xlu1 %293 }
 0x1dc   :  { %v296_v45 = vadd.f32 %v294_v44, %v286_v43 }
 0x1de   :  { %6971 = vtanh.f32 %v296_v45 }
 0x1e8   :  { %v6972_v46 = vpop.eup %6971 }
 0x1e9   :  { %299 = vrot.lane.b32.xlu0 %v6972_v46, %s7180_s23 }
 0x1ec   :  { %v7383_v47 = vpop.permute.xlu1 %305 }
 0x1ed   :  { %vm307_vm3 = vcmp.eq.s32.totalorder %v7383_v47, 1  ;;  %v81_v47 = vld [vmem:[%s8330_s11] sm:$0xff] }
 0x1ee   :  { %v312_v0 = vsel %vm307_vm3, %v296_v45, %v284_v42 }
 0x1ef   :  { %v407_v3 = vrot.slane %v312_v0, 6 }
 0x1f0   :  { %v309_v49 = vpop.permute.xlu1 %308 }
 0x25b   :  { %v300_v48 = vpop.permute.xlu0 %299 }
 0x25c   :  { %v7385_v50 = vmul.f32 %v6970_v38, %v300_v48 }
 0x25e   :  { %v311_v51 = vsel %vm307_vm3, %v7385_v50, %v309_v49 }
 0x25f   :  { %321 = vrot.lane.b32.xlu0 %v311_v51, %s7181_s25  ;;  %v426_v11 = vrot.slane %v311_v51, 6 }
 0x2d1   :  { %v322_v52 = vpop.permute.xlu0 %321 }
 0x2d2   :  { %6039 = vmatmul.mubr.msk.f32.vlgmr.msra.gmra.mrb[4].mxu0 %vm144_vm1, %v322_v52 }
 0x2d3   :  { %6643 = vmatpush3.bf16.msra.mxu0 %v7314_v7  ;;  %6060 = vmatprep.mubr.msk.f32.mxu0 %vm7178_vm0, %v7179_v6 }
 0x2d4   :  { %6644 = vmatprep.subr.bf16.mxu0 %v7176_v1 }
 0x2d7   :  { %6646 = vmatpush3.bf16.msra.mxu0 %v7330_v12 }
 0x2d8   :  { %6653 = vmatprep.subr.bf16.mxu0 %v7176_v1 }
 0x3a5   :  { %v391_v53 = vpop.f32.mrb[4].mxu0 }
 0x3a6   :  { %v396_v54 = vrot.slane %v391_v53, 6  ;;  %v6040_v55 = vpop.f32.mrb[5].mxu0 }
 0x3a8   :  { %v398_v56 = vadd.f32 %v396_v54, %v7361_v23 }
 0x3aa   :  { %6973 = vtanh.f32 %v398_v56  ;;  %v5657_v58 = vmul.f32 -1.442695, %v398_v56 }
 0x3ac   :  { %6975 = vpow2.f32 %v5657_v58 }
 0x3b4   :  { %v6974_v57 = vpop.eup %6973 }
 0x3b5   :  { %411 = vrot.lane.b32.xlu1 %v6974_v57, %s7180_s23 }
 0x3b6   :  { %v6976_v59 = vpop.eup %6975 }
 0x3b7   :  { %v402_v60 = vadd.f32 1.0, %v6976_v59 }
 0x3b9   :  { %6977 = vrcp.f32 %v402_v60 }
 0x3c3   :  { %v6978_v61 = vpop.eup %6977 }
 0x3c4   :  { %v409_v4 = vmul.f32 %v6978_v61, %v407_v3 }
 0x427   :  { %v412_v62 = vpop.permute.xlu1 %411 }
 0x428   :  { %v414_v63 = vmul.f32 %v6978_v61, %v412_v62 }
 0x42a   :  { %416 = vrot.lane.b32.xlu0 %v414_v63, %s7181_s25 }
 0x49c   :  { %v417_v5 = vpop.permute.xlu0 %416 }
 0x49d   :  { %v419_v8 = vadd.f32 %v417_v5, %v409_v4 }
 0x49f   :  { %6979 = vtanh.f32 %v419_v8  ;;  %v429_v33 = vsel %vm307_vm3, %v419_v8, %v407_v3 }
 0x4a0   :  { %v525_v34 = vrot.slane %v429_v33, 6 }
 0x4a9   :  { %v6980_v9 = vpop.eup %6979 }
 0x4aa   :  { %422 = vrot.lane.b32.xlu1 %v6980_v9, %s7180_s23 }
 0x51c   :  { %v423_v10 = vpop.permute.xlu1 %422 }
 0x51d   :  { %v7405_v13 = vmul.f32 %v6978_v61, %v423_v10 }
 0x51f   :  { %v428_v14 = vsel %vm307_vm3, %v7405_v13, %v426_v11 }
 0x520   :  { %v438_v15 = vrot.slane %v428_v14, 2  ;;  %v544_v40 = vrot.slane %v428_v14, 6  ;;  %v70_v14 = vld [vmem:[%s8326_s1 + $0x8] sm:$0xff] }
 0x521   :  { %vm72_vm4 = vcmp.gt.f32.partialorder %v70_v14, 0.0 }
 0x522   :  { %439 = vrot.lane.b32.xlu0 %v438_v15, %s7181_s25 }
 0x594   :  { %v440_v16 = vpop.permute.xlu0 %439 }
 0x595   :  { %6050 = vmatmul.mubr.msk.f32.vlgmr.msra.gmra.mrb[2].mxu1 %vm144_vm1, %v440_v16  ;;  %v777_v16 = vsel %vm72_vm4, 1, %v7177_v2  ;;  %vm4037_vm4 = vcmask 517504  }
 0x596   :  { %6649 = vmatpush3.bf16.msra.mxu1 %v7314_v7  ;;  %6071 = vmatprep.mubr.msk.f32.mxu1 %vm7178_vm0, %v7179_v6 }
 0x597   :  { %6650 = vmatprep.subr.bf16.mxu1 %v7176_v1 }
 0x59a   :  { %6652 = vmatpush3.bf16.msra.mxu1 %v7330_v12 }
 0x59b   :  { %6659 = vmatprep.subr.bf16.mxu1 %v7176_v1 }
 0x668   :  { %v509_v17 = vpop.f32.mrb[2].mxu1 }
 0x669   :  { %v514_v18 = vrot.slane %v509_v17, 4  ;;  %v6051_v19 = vpop.f32.mrb[3].mxu1 }
 0x66b   :  { %v516_v20 = vadd.f32 %v514_v18, %v7361_v23 }
 0x66d   :  { %6981 = vtanh.f32 %v516_v20  ;;  %v5659_v24 = vmul.f32 -1.442695, %v516_v20 }
 0x66f   :  { %6983 = vpow2.f32 %v5659_v24 }
 0x677   :  { %v6982_v22 = vpop.eup %6981 }
 0x678   :  { %529 = vrot.lane.b32.xlu1 %v6982_v22, %s7180_s23 }
 0x679   :  { %v6984_v25 = vpop.eup %6983 }
 0x67a   :  { %v520_v27 = vadd.f32 1.0, %v6984_v25 }
 0x67c   :  { %6985 = vrcp.f32 %v520_v27 }
 0x686   :  { %v6986_v28 = vpop.eup %6985 }
 0x687   :  { %v527_v35 = vmul.f32 %v6986_v28, %v525_v34 }
 0x6ea   :  { %v530_v29 = vpop.permute.xlu1 %529 }
 0x6eb   :  { %v532_v32 = vmul.f32 %v6986_v28, %v530_v29 }
 0x6ed   :  { %534 = vrot.lane.b32.xlu0 %v532_v32, %s7181_s25 }
 0x75f   :  { %v535_v36 = vpop.permute.xlu0 %534 }
 0x760   :  { %v537_v37 = vadd.f32 %v535_v36, %v527_v35 }
 0x762   :  { %6987 = vtanh.f32 %v537_v37  ;;  %v547_v58 = vsel %vm307_vm3, %v537_v37, %v525_v34 }
 0x763   :  { %v643_v59 = vrot.slane %v547_v58, 6 }
 0x76c   :  { %v6988_v38 = vpop.eup %6987 }
 0x76d   :  { %540 = vrot.lane.b32.xlu1 %v6988_v38, %s7180_s23 }
 0x7df   :  { %v541_v39 = vpop.permute.xlu1 %540 }
 0x7e0   :  { %v7424_v41 = vmul.f32 %v6986_v28, %v541_v39 }
 0x7e2   :  { %v546_v42 = vsel %vm307_vm3, %v7424_v41, %v544_v40 }
 0x7e3   :  { %v556_v43 = vrot.slane %v546_v42, 4  ;;  %v662_v0 = vrot.slane %v546_v42, 6 }
 0x7e5   :  { %557 = vrot.lane.b32.xlu0 %v556_v43, %s7181_s25 }
 0x857   :  { %v558_v44 = vpop.permute.xlu0 %557 }
 0x858   :  { %6061 = vmatmul.mubr.msk.f32.vlgmr.msra.gmra.mrb[6].mxu0 %vm144_vm1, %v558_v44 }
 0x859   :  { %6655 = vmatpush3.bf16.msra.mxu0 %v7314_v7  ;;  %6082 = vmatprep.mubr.msk.f32.mxu0 %vm7178_vm0, %v7179_v6 }
 0x85a   :  { %6656 = vmatprep.subr.bf16.mxu0 %v7176_v1 }
 0x85d   :  { %6658 = vmatpush3.bf16.msra.mxu0 %v7330_v12 }
 0x85e   :  { %6665 = vmatprep.subr.bf16.mxu0 %v7176_v1 }
 0x92b   :  { %v627_v45 = vpop.f32.mrb[6].mxu0 }
 0x92c   :  { %v632_v46 = vrot.slane %v627_v45, 2  ;;  %v6062_v48 = vpop.f32.mrb[7].mxu0 }
 0x92e   :  { %v634_v49 = vadd.f32 %v632_v46, %v7361_v23 }
 0x930   :  { %6989 = vtanh.f32 %v634_v49  ;;  %v5661_v52 = vmul.f32 -1.442695, %v634_v49 }
 0x932   :  { %6991 = vpow2.f32 %v5661_v52 }
 0x93a   :  { %v6990_v51 = vpop.eup %6989 }
 0x93b   :  { %647 = vrot.lane.b32.xlu1 %v6990_v51, %s7180_s23 }
 0x93c   :  { %v6992_v53 = vpop.eup %6991 }
 0x93d   :  { %v638_v54 = vadd.f32 1.0, %v6992_v53 }
 0x93f   :  { %6993 = vrcp.f32 %v638_v54 }
 0x949   :  { %v6994_v55 = vpop.eup %6993 }
 0x94a   :  { %v645_v60 = vmul.f32 %v6994_v55, %v643_v59 }
 0x9ad   :  { %v648_v56 = vpop.permute.xlu1 %647 }
 0x9ae   :  { %v650_v57 = vmul.f32 %v6994_v55, %v648_v56 }
 0x9b0   :  { %652 = vrot.lane.b32.xlu0 %v650_v57, %s7181_s25 }
 0xa22   :  { %v653_v23 = vpop.permute.xlu0 %652 }
 0xa23   :  { %v655_v61 = vadd.f32 %v653_v23, %v645_v60  ;;  %v77_v23 = vld [vmem:[%s8327_s5] sm:$0xff] }
 0xa25   :  { %6995 = vtanh.f32 %v655_v61  ;;  %v665_v25 = vsel %vm307_vm3, %v655_v61, %v643_v59  ;;  %v78_v61 = vld [vmem:[%s8327_s5 + $0x8] sm:$0xff] }
 0xa26   :  { %v758_v27 = vrot.slane %v665_v25, 6 }
 0xa2f   :  { %v6996_v62 = vpop.eup %6995 }
 0xa30   :  { %658 = vrot.lane.b32.xlu1 %v6996_v62, %s7180_s23  ;;  %v7511_v62 = vpack.c.bf16 %v78_v61, %v77_v23 }
 0xaa2   :  { %v659_v63 = vpop.permute.xlu1 %658 }
 0xaa3   :  { %v7443_v3 = vmul.f32 %v6994_v55, %v659_v63  ;;  %v79_v63 = vld [vmem:[%s8327_s5 + $0x10] sm:$0xff] }
 0xaa5   :  { %v664_v4 = vsel %vm307_vm3, %v7443_v3, %v662_v0  ;;  %v80_v0 = vld [vmem:[%s8327_s5 + $0x18] sm:$0xff] }
 0xaa6   :  { %v674_v5 = vrot.slane %v664_v4, 6 }
 0xaa8   :  { %675 = vrot.lane.b32.xlu0 %v674_v5, %s7181_s25 }
 0xb1a   :  { %v676_v8 = vpop.permute.xlu0 %675 }
 0xb1b   :  { %6072 = vmatmul.mubr.msk.f32.vlgmr.msra.gmra.mrb[4].mxu1 %vm144_vm1, %v676_v8  ;;  %v5670_v8 = vld [vmem:[%s8355_s30 + $0x1] ss:$0 sm:$0xff] }
 0xb1c   :  { %6661 = vmatpush3.bf16.msra.mxu1 %v7314_v7  ;;  %6093 = vmatprep.mubr.msk.f32.mxu1 %vm7178_vm0, %v7179_v6 }
 0xb1d   :  { %6662 = vmatprep.subr.bf16.mxu1 %v7176_v1 }
 0xb20   :  { %6664 = vmatpush3.bf16.msra.mxu1 %v7330_v12 }
 0xb21   :  { %6671 = vmatprep.subr.bf16.mxu1 %v7176_v1 }
 0xbee   :  { %v745_v9 = vpop.f32.mrb[4].mxu1 }
 0xbef   :  { %v749_v10 = vadd.f32 %v745_v9, %v7367_v30  ;;  %v6073_v11 = vpop.f32.mrb[5].mxu1 }
 0xbf1   :  { %6997 = vtanh.f32 %v749_v10  ;;  %v5663_v17 = vmul.f32 -1.442695, %v749_v10 }
 0xbf3   :  { %6999 = vpow2.f32 %v5663_v17 }
 0xbfb   :  { %v6998_v15 = vpop.eup %6997 }
 0xbfc   :  { %762 = vrot.lane.b32.xlu1 %v6998_v15, %s7180_s23 }
 0xbfd   :  { %v7000_v18 = vpop.eup %6999 }
 0xbfe   :  { %v753_v19 = vadd.f32 1.0, %v7000_v18 }
 0xc00   :  { %779 = vperm.xlu1 %6956, %v777_v16   ;;  %7001 = vrcp.f32 %v753_v19  ;;  %v7541_v16 = vadd.f32 %v7369_v31, %v7359_v21 }
 0xc0a   :  { %v7002_v20 = vpop.eup %7001 }
 0xc0b   :  { %v760_v28 = vmul.f32 %v7002_v20, %v758_v27 }
 0xc6e   :  { %v763_v22 = vpop.permute.xlu1 %762 }
 0xc6f   :  { %v765_v24 = vmul.f32 %v7002_v20, %v763_v22 }
 0xc71   :  { %767 = vrot.lane.b32.xlu0 %v765_v24, %s7181_s25  ;;  %v5671_v24 = vld [vmem:[%s8357_s0 + $0x1] ss:$0 sm:$0xff]  ;;  %s7184_s0 = smov 48  }
 0xc7f   :  { %v7466_v33 = vpop.permute.xlu1 %779 }
 0xc80   :  { %vm781_vm5 = vcmp.eq.s32.totalorder %v7466_v33, 1 }
 0xce3   :  { %v768_v29 = vpop.permute.xlu0 %767 }
 0xce4   :  { %v770_v32 = vadd.f32 %v768_v29, %v760_v28 }
 0xce6   :  { %7003 = vtanh.f32 %v770_v32 }
 0xcf0   :  { %v7004_v2 = vpop.eup %7003 }
 0xcf1   :  { %773 = vrot.lane.b32.xlu0 %v7004_v2, %s7180_s23 }
 0xd63   :  { %v774_v34 = vpop.permute.xlu0 %773 }
 0xd64   :  { %v7468_v35 = vmul.f32 %v7002_v20, %v774_v34 }
 0xd66   :  { %v783_v36 = vsel %vm781_vm5, %v7468_v35, %v674_v5  ;;  %v7521_v5 = vpack.c.bf16 %v80_v0, %v79_v63 }
 0xd67   :  { %792 = vrot.lane.b32.xlu1 %v783_v36, %s7181_s25  ;;  %v897_v57 = vrot.slane %v783_v36, 6 }
 0xdd9   :  { %v793_v37 = vpop.permute.xlu1 %792 }
 0xdda   :  { %6083 = vmatmul.mubr.msk.f32.vlgmr.msra.gmra.mrb[8].mxu0 %vm144_vm1, %v793_v37 }
 0xddb   :  { %6667 = vmatpush3.bf16.msra.mxu0 %v7314_v7  ;;  %6104 = vmatprep.mubr.msk.f32.mxu0 %vm7178_vm0, %v7179_v6 }
 0xddc   :  { %6668 = vmatprep.subr.bf16.mxu0 %v7176_v1 }
 0xddf   :  { %6670 = vmatpush3.bf16.msra.mxu0 %v7330_v12  ;;  %v7487_v12 = vsel %vm781_vm5, %v770_v32, %v758_v27 }
 0xde0   :  { %6677 = vmatprep.subr.bf16.mxu0 %v7176_v1  ;;  %v878_v51 = vrot.slane %v7487_v12, 6 }
 0xead   :  { %v862_v38 = vpop.f32.mrb[8].mxu0 }
 0xeae   :  { %v867_v39 = vrot.slane %v862_v38, 6  ;;  %v6084_v40 = vpop.f32.mrb[9].mxu0 }
 0xeb0   :  { %v869_v42 = vadd.f32 %v867_v39, %v7367_v30 }
 0xeb2   :  { %7005 = vtanh.f32 %v869_v42  ;;  %v5665_v44 = vmul.f32 -1.442695, %v869_v42 }
 0xeb4   :  { %7007 = vpow2.f32 %v5665_v44 }
 0xebc   :  { %v7006_v43 = vpop.eup %7005 }
 0xebd   :  { %882 = vrot.lane.b32.xlu0 %v7006_v43, %s7180_s23 }
 0xebe   :  { %v7008_v7 = vpop.eup %7007 }
 0xebf   :  { %v873_v45 = vadd.f32 1.0, %v7008_v7 }
 0xec1   :  { %7009 = vrcp.f32 %v873_v45 }
 0xecb   :  { %v7010_v46 = vpop.eup %7009 }
 0xecc   :  { %v880_v52 = vmul.f32 %v7010_v46, %v878_v51 }
 0xf2f   :  { %v883_v48 = vpop.permute.xlu0 %882 }
 0xf30   :  { %v885_v49 = vmul.f32 %v7010_v46, %v883_v48 }
 0xf32   :  { %887 = vrot.lane.b32.xlu1 %v885_v49, %s7181_s25 }
 0xfa4   :  { %v888_v53 = vpop.permute.xlu1 %887 }
 0xfa5   :  { %v7492_v54 = vadd.f32 %v888_v53, %v880_v52 }
 0xfa7   :  { %7011 = vtanh.f32 %v7492_v54  ;;  %v7557_v39 = vsel %vm781_vm5, %v7492_v54, %v878_v51 }
 0xfa8   :  { %v995_v40 = vrot.slane %v7557_v39, 6 }
 0xfb1   :  { %v7012_v55 = vpop.eup %7011 }
 0xfb2   :  { %893 = vrot.lane.b32.xlu0 %v7012_v55, %s7180_s23 }
0x1024   :  { %v894_v56 = vpop.permute.xlu0 %893 }
0x1025   :  { %v7496_v58 = vmul.f32 %v7010_v46, %v894_v56 }
0x1027   :  { %v7501_v59 = vsel %vm781_vm5, %v7496_v58, %v897_v57 }
0x1028   :  { %v908_v60 = vrot.slane %v7501_v59, 2  ;;  %v1014_v52 = vrot.slane %v7501_v59, 6 }
0x102a   :  { %909 = vrot.lane.b32.xlu1 %v908_v60, %s7181_s25 }
0x109c   :  { %v910_v4 = vpop.permute.xlu1 %909 }
0x109d   :  { %6094 = vmatmul.mubr.msk.f32.vlgmr.msra.gmra.mrb[6].mxu1 %vm144_vm1, %v910_v4 }
0x109e   :  { %6673 = vmatpush3.bf16.msra.mxu1 %v7511_v62  ;;  %6115 = vmatprep.mubr.msk.f32.mxu1 %vm7178_vm0, %v7179_v6 }
0x109f   :  { %6674 = vmatprep.subr.bf16.mxu1 %v7176_v1 }
0x10a2   :  { %6676 = vmatpush3.bf16.msra.mxu1 %v7521_v5 }
0x10a3   :  { %6683 = vmatprep.subr.bf16.mxu1 %v7176_v1 }
0x10a5   :  { %6116 = vmatmul.mubr.msk.f32.vlgmr.msra.gmra.mrb[8].mxu1 %vm144_vm1, %v5670_v8 }
0x10a6   :  { %6685 = vmatpush3.bf16.msra.mxu1 %v7511_v62  ;;  %6137 = vmatprep.mubr.msk.f32.mxu1 %vm7178_vm0, %v7179_v6 }
0x10a7   :  { %6686 = vmatprep.subr.bf16.mxu1 %v7176_v1 }
0x10aa   :  { %6688 = vmatpush3.bf16.msra.mxu1 %v7521_v5 }
0x10ab   :  { %6695 = vmatprep.subr.bf16.mxu1 %v7176_v1 }
0x1170   :  { %v979_v9 = vpop.f32.mrb[6].mxu1 }
0x1171   :  { %v984_v10 = vrot.slane %v979_v9, 4  ;;  %v6095_v11 = vpop.f32.mrb[7].mxu1 }
0x1173   :  { %v986_v14 = vadd.f32 %v984_v10, %v7367_v30 }
0x1175   :  { %7013 = vtanh.f32 %v986_v14  ;;  %v5667_v25 = vmul.f32 -1.442695, %v986_v14 }
0x1178   :  { %v1219_v15 = vpop.f32.mrb[8].mxu1 }
0x1179   :  { %v1224_v17 = vrot.slane %v1219_v15, 2  ;;  %v6117_v18 = vpop.f32.mrb[9].mxu1 }
0x117b   :  { %v1226_v19 = vadd.f32 %v1224_v17, %v7541_v16 }
0x117d   :  { %7015 = vtanh.f32 %v1226_v19  ;;  %v5673_v21 = vmul.f32 -1.442695, %v1226_v19 }
0x117e   :  { %7017 = vpow2.f32 %v5667_v25 }
0x117f   :  { %v7014_v20 = vpop.eup %7013  ;;  %7019 = vpow2.f32 %v5673_v21 }
0x1180   :  { %999 = vrot.lane.b32.xlu0 %v7014_v20, %s7180_s23 }
0x1187   :  { %v7016_v22 = vpop.eup %7015 }
0x1188   :  { %1240 = vrot.lane.b32.xlu1 %v7016_v22, %s7180_s23  ;;  %v7018_v31 = vpop.eup %7017 }
0x1189   :  { %v990_v27 = vadd.f32 1.0, %v7018_v31  ;;  %v7020_v28 = vpop.eup %7019 }
0x118a   :  { %v1230_v29 = vadd.f32 1.0, %v7020_v28 }
0x118b   :  { %7021 = vrcp.f32 %v990_v27 }
0x118c   :  { %1235 = vrot.lane.b32.xlu1 %v5671_v24, %s7181_s25  ;;  %7023 = vrcp.f32 %v1230_v29 }
0x1195   :  { %v7022_v32 = vpop.eup %7021 }
0x1196   :  { %v7024_v36 = vpop.eup %7023  ;;  %v997_v42 = vmul.f32 %v7022_v32, %v995_v40 }
0x11f2   :  { %v1000_v2 = vpop.permute.xlu0 %999 }
0x11f3   :  { %v1002_v34 = vmul.f32 %v7022_v32, %v1000_v2 }
0x11f5   :  { %1004 = vrot.lane.b32.xlu0 %v1002_v34, %s7181_s25 }
0x11fa   :  { %v1241_v37 = vpop.permute.xlu1 %1240 }
0x11fb   :  { %v1243_v38 = vmul.f32 %v7024_v36, %v1241_v37 }
0x11fd   :  { %1245 = vrot.lane.b32.xlu0 %v1243_v38, %s7181_s25 }
0x11fe   :  { %v1236_v7 = vpop.permute.xlu1 %1235 }
0x11ff   :  { %v1238_v45 = vmul.f32 %v7024_v36, %v1236_v7 }
0x1267   :  { %v1005_v43 = vpop.permute.xlu0 %1004 }
0x1268   :  { %v7562_v44 = vadd.f32 %v1005_v43, %v997_v42 }
0x126a   :  { %7025 = vtanh.f32 %v7562_v44 }
0x126f   :  { %v1246_v46 = vpop.permute.xlu0 %1245 }
0x1270   :  { %v1248_v48 = vadd.f32 %v1246_v46, %v1238_v45 }
0x1272   :  { %7027 = vtanh.f32 %v1248_v48  ;;  %v1259_v24 = vsel %vm781_vm5, %v1248_v48, %v1236_v7 }
0x1273   :  { %v1355_v25 = vrot.slane %v1259_v24, 2 }
0x1274   :  { %v7026_v49 = vpop.eup %7025 }
0x1275   :  { %1010 = vrot.lane.b32.xlu1 %v7026_v49, %s7180_s23 }
0x1279   :  { %1255 = vrot.lane.b32.xlu1 %v5670_v8, %s7182_s28 }
0x127c   :  { %v7028_v12 = vpop.eup %7027 }
0x127d   :  { %1251 = vrot.lane.b32.xlu0 %v7028_v12, %s7180_s23 }
0x12e7   :  { %v1011_v51 = vpop.permute.xlu1 %1010 }
0x12e8   :  { %v7569_v53 = vmul.f32 %v7022_v32, %v1011_v51 }
0x12ea   :  { %v7574_v54 = vsel %vm781_vm5, %v7569_v53, %v1014_v52 }
0x12eb   :  { %v1025_v55 = vrot.slane %v7574_v54, 4  ;;  %v1256_v57 = vpop.permute.xlu1 %1255 }
0x12ed   :  { %1026 = vrot.lane.b32.xlu0 %v1025_v55, %s7181_s25 }
0x12ef   :  { %v1252_v56 = vpop.permute.xlu0 %1251 }
0x12f0   :  { %v7578_v60 = vmul.f32 %v7024_v36, %v1252_v56 }
0x12f2   :  { %v1258_v23 = vsel %vm781_vm5, %v7578_v60, %v1256_v57 }
0x12f3   :  { %v1268_v59 = vrot.slane %v1258_v23, 6  ;;  %v1374_v32 = vrot.slane %v1258_v23, 2 }
0x12f5   :  { %1269 = vrot.lane.b32.xlu1 %v1268_v59, %s7181_s25 }
0x135f   :  { %v1027_v61 = vpop.permute.xlu0 %1026 }
0x1360   :  { %6105 = vmatmul.mubr.msk.f32.vlgmr.msra.gmra.mrb[10].mxu0 %vm144_vm1, %v1027_v61 }
0x1361   :  { %6679 = vmatpush3.bf16.msra.mxu0 %v7511_v62  ;;  %6126 = vmatprep.mubr.msk.f32.mxu0 %vm7178_vm0, %v7179_v6 }
0x1362   :  { %6680 = vmatprep.subr.bf16.mxu0 %v7176_v1 }
0x1365   :  { %6682 = vmatpush3.bf16.msra.mxu0 %v7521_v5 }
0x1366   :  { %6689 = vmatprep.subr.bf16.mxu0 %v7176_v1 }
0x1367   :  { %v1270_v63 = vpop.permute.xlu1 %1269 }
0x1368   :  { %6127 = vmatmul.mubr.msk.f32.vlgmr.msra.gmra.mrb[12].mxu0 %vm144_vm1, %v1270_v63 }
0x1369   :  { %6691 = vmatpush3.bf16.msra.mxu0 %v7511_v62  ;;  %6148 = vmatprep.mubr.msk.f32.mxu0 %vm7178_vm0, %v7179_v6 }
0x136a   :  { %6692 = vmatprep.subr.bf16.mxu0 %v7176_v1 }
0x136d   :  { %6694 = vmatpush3.bf16.msra.mxu0 %v7521_v5 }
0x136e   :  { %6701 = vmatprep.subr.bf16.mxu0 %v7176_v1 }
0x1433   :  { %v7598_v0 = vpop.f32.mrb[10].mxu0 }
0x1434   :  { %v6106_v4 = vpop.f32.mrb[11].mxu0 }
0x143b   :  { %v1339_v8 = vpop.f32.mrb[12].mxu0 }
0x143c   :  { %v1344_v9 = vrot.slane %v1339_v8, 4  ;;  %v6128_v10 = vpop.f32.mrb[13].mxu0 }
0x143e   :  { %v1346_v11 = vadd.f32 %v1344_v9, %v7541_v16 }
0x1440   :  { %7029 = vtanh.f32 %v1346_v11  ;;  %v5675_v15 = vmul.f32 -1.442695, %v1346_v11 }
0x1442   :  { %7031 = vpow2.f32 %v5675_v15 }
0x144a   :  { %v7030_v14 = vpop.eup %7029 }
0x144b   :  { %1359 = vrot.lane.b32.xlu0 %v7030_v14, %s7180_s23 }
0x144c   :  { %v7032_v17 = vpop.eup %7031 }
0x144d   :  { %v1350_v18 = vadd.f32 1.0, %v7032_v17 }
0x144f   :  { %7033 = vrcp.f32 %v1350_v18 }
0x1459   :  { %v7034_v19 = vpop.eup %7033 }
0x145a   :  { %v1357_v21 = vmul.f32 %v7034_v19, %v1355_v25 }
0x14bd   :  { %v1360_v20 = vpop.permute.xlu0 %1359 }
0x14be   :  { %v1362_v22 = vmul.f32 %v7034_v19, %v1360_v20 }
0x14c0   :  { %1364 = vrot.lane.b32.xlu1 %v1362_v22, %s7181_s25 }
0x1532   :  { %v1365_v31 = vpop.permute.xlu1 %1364 }
0x1533   :  { %v1367_v27 = vadd.f32 %v1365_v31, %v1357_v21 }
0x1535   :  { %7035 = vtanh.f32 %v1367_v27  ;;  %v1377_v55 = vsel %vm781_vm5, %v1367_v27, %v1355_v25 }
0x1536   :  { %v1473_v56 = vrot.slane %v1377_v55, 2 }
0x153f   :  { %v7036_v28 = vpop.eup %7035 }
0x1540   :  { %1370 = vrot.lane.b32.xlu0 %v7036_v28, %s7180_s23 }
0x15b2   :  { %v1371_v29 = vpop.permute.xlu0 %1370 }
0x15b3   :  { %v7606_v2 = vmul.f32 %v7034_v19, %v1371_v29 }
0x15b5   :  { %v1376_v34 = vsel %vm781_vm5, %v7606_v2, %v1374_v32 }
0x15b6   :  { %v1386_v36 = vrot.slane %v1376_v34, 4  ;;  %v1492_v4 = vrot.slane %v1376_v34, 2 }
0x15b8   :  { %1387 = vrot.lane.b32.xlu1 %v1386_v36, %s7181_s25 }
0x162a   :  { %v1388_v37 = vpop.permute.xlu1 %1387 }
0x162b   :  { %6138 = vmatmul.mubr.msk.f32.vlgmr.msra.gmra.mrb[10].mxu1 %vm144_vm1, %v1388_v37 }
0x162c   :  { %6697 = vmatpush3.bf16.msra.mxu1 %v7511_v62  ;;  %6159 = vmatprep.mubr.msk.f32.mxu1 %vm7178_vm0, %v7179_v6 }
0x162d   :  { %6698 = vmatprep.subr.bf16.mxu1 %v7176_v1 }
0x1630   :  { %6700 = vmatpush3.bf16.msra.mxu1 %v7521_v5 }
0x1631   :  { %6707 = vmatprep.subr.bf16.mxu1 %v7176_v1 }
0x16fe   :  { %v1457_v38 = vpop.f32.mrb[10].mxu1 }
0x16ff   :  { %v1462_v42 = vrot.slane %v1457_v38, 6  ;;  %v6139_v43 = vpop.f32.mrb[11].mxu1 }
0x1701   :  { %v1464_v7 = vadd.f32 %v1462_v42, %v7541_v16 }
0x1703   :  { %7037 = vtanh.f32 %v1464_v7  ;;  %v5677_v46 = vmul.f32 -1.442695, %v1464_v7 }
0x1705   :  { %7039 = vpow2.f32 %v5677_v46 }
0x170d   :  { %v7038_v45 = vpop.eup %7037 }
0x170e   :  { %1477 = vrot.lane.b32.xlu0 %v7038_v45, %s7180_s23 }
0x170f   :  { %v7040_v48 = vpop.eup %7039 }
0x1710   :  { %v1468_v49 = vadd.f32 1.0, %v7040_v48 }
0x1712   :  { %7041 = vrcp.f32 %v1468_v49 }
0x171c   :  { %v7042_v12 = vpop.eup %7041 }
0x171d   :  { %v1475_v57 = vmul.f32 %v7042_v12, %v1473_v56 }
0x1780   :  { %v1478_v51 = vpop.permute.xlu0 %1477 }
0x1781   :  { %v1480_v52 = vmul.f32 %v7042_v12, %v1478_v51 }
0x1783   :  { %1482 = vrot.lane.b32.xlu1 %v1480_v52, %s7181_s25 }
0x17f5   :  { %v1483_v23 = vpop.permute.xlu1 %1482 }
0x17f6   :  { %v1485_v59 = vadd.f32 %v1483_v23, %v1475_v57 }
0x17f8   :  { %7043 = vtanh.f32 %v1485_v59  ;;  %v1495_v31 = vsel %vm781_vm5, %v1485_v59, %v1473_v56 }
0x17f9   :  { %v1588_v27 = vrot.slane %v1495_v31, 2 }
0x1802   :  { %v7044_v61 = vpop.eup %7043 }
0x1803   :  { %1488 = vrot.lane.b32.xlu0 %v7044_v61, %s7180_s23 }
0x1875   :  { %v1489_v63 = vpop.permute.xlu0 %1488 }
0x1876   :  { %v7625_v8 = vmul.f32 %v7042_v12, %v1489_v63 }
0x1878   :  { %v1494_v9 = vsel %vm781_vm5, %v7625_v8, %v1492_v4 }
0x1879   :  { %v1504_v10 = vrot.slane %v1494_v9, 2 }
0x187b   :  { %1505 = vrot.lane.b32.xlu1 %v1504_v10, %s7181_s25 }
0x18ed   :  { %v1506_v11 = vpop.permute.xlu1 %1505 }
0x18ee   :  { %6149 = vmatmul.mubr.msk.f32.vlgmr.msra.gmra.mrb[14].mxu0 %vm144_vm1, %v1506_v11 }
0x18ef   :  { %6703 = vmatpush3.bf16.msra.mxu0 %v7511_v62  ;;  %6170 = vmatprep.mubr.msk.f32.mxu0 %vm7178_vm0, %v7179_v6 }
0x18f0   :  { %6704 = vmatprep.subr.bf16.mxu0 %v7176_v1 }
0x18f3   :  { %6706 = vmatpush3.bf16.msra.mxu0 %v7521_v5 }
0x18f4   :  { %6713 = vmatprep.subr.bf16.mxu0 %v7176_v1 }
0x19c1   :  { %v1575_v14 = vpop.f32.mrb[14].mxu0 }
0x19c2   :  { %v1579_v15 = vadd.f32 %v1575_v14, %v7541_v16  ;;  %v6150_v17 = vpop.f32.mrb[15].mxu0 }
0x19c4   :  { %7045 = vtanh.f32 %v1579_v15  ;;  %v5679_v19 = vmul.f32 -1.442695, %v1579_v15 }
0x19c6   :  { %7047 = vpow2.f32 %v5679_v19 }
0x19ce   :  { %v7046_v18 = vpop.eup %7045 }
0x19cf   :  { %1592 = vrot.lane.b32.xlu0 %v7046_v18, %s7180_s23 }
0x19d0   :  { %v7048_v20 = vpop.eup %7047 }
0x19d1   :  { %v1583_v22 = vadd.f32 1.0, %v7048_v20 }
0x19d3   :  { %7049 = vrcp.f32 %v1583_v22 }
0x19dd   :  { %v7050_v24 = vpop.eup %7049 }
0x19de   :  { %v1590_v16 = vmul.f32 %v7050_v24, %v1588_v27 }
0x1a41   :  { %v1593_v25 = vpop.permute.xlu0 %1592 }
0x1a42   :  { %v1595_v21 = vmul.f32 %v7050_v24, %v1593_v25 }
0x1a44   :  { %1597 = vrot.lane.b32.xlu1 %v1595_v21, %s7181_s25 }
0x1ab6   :  { %v1598_v28 = vpop.permute.xlu1 %1597 }
0x1ab7   :  { %v1600_v29 = vadd.f32 %v1598_v28, %v1590_v16 }
0x1ab9   :  { %7051 = vtanh.f32 %v1600_v29  ;;  %v1609_v56 = vsel %vm781_vm5, %v1600_v29, %v1588_v27 }
0x1aba   :  { %v1704_v57 = vrot.slane %v1609_v56, 2 }
0x1ac3   :  { %v7052_v32 = vpop.eup %7051 }
0x1ac4   :  { %1603 = vrot.lane.b32.xlu0 %v7052_v32, %s7180_s23 }
0x1b36   :  { %v1604_v34 = vpop.permute.xlu0 %1603 }
0x1b37   :  { %v7644_v36 = vmul.f32 %v7050_v24, %v1604_v34 }
0x1b39   :  { %v1608_v37 = vsel %vm781_vm5, %v7644_v36, %v1504_v10 }
0x1b3a   :  { %1618 = vrot.lane.b32.xlu1 %v1608_v37, %s7181_s25  ;;  %v1723_v9 = vrot.slane %v1608_v37, 2 }
0x1bac   :  { %v1619_v38 = vpop.permute.xlu1 %1618 }
0x1bad   :  { %6160 = vmatmul.mubr.msk.f32.vlgmr.msra.gmra.mrb[12].mxu1 %vm144_vm1, %v1619_v38 }
0x1bae   :  { %6709 = vmatpush3.bf16.msra.mxu1 %v7511_v62  ;;  %6181 = vmatprep.mubr.msk.f32.mxu1 %vm7178_vm0, %v7179_v6 }
0x1baf   :  { %6710 = vmatprep.subr.bf16.mxu1 %v7176_v1 }
0x1bb2   :  { %6712 = vmatpush3.bf16.msra.mxu1 %v7521_v5 }
0x1bb3   :  { %6719 = vmatprep.subr.bf16.mxu1 %v7176_v1 }
0x1c80   :  { %v1688_v42 = vpop.f32.mrb[12].mxu1 }
0x1c81   :  { %v1693_v43 = vrot.slane %v1688_v42, 2  ;;  %v6161_v7 = vpop.f32.mrb[13].mxu1 }
0x1c83   :  { %v1695_v45 = vadd.f32 %v1693_v43, %v7364_v26 }
0x1c85   :  { %7053 = vtanh.f32 %v1695_v45  ;;  %v5681_v48 = vmul.f32 -1.442695, %v1695_v45 }
0x1c87   :  { %7055 = vpow2.f32 %v5681_v48 }
0x1c8f   :  { %v7054_v46 = vpop.eup %7053 }
0x1c90   :  { %1708 = vrot.lane.b32.xlu0 %v7054_v46, %s7180_s23 }
0x1c91   :  { %v7056_v49 = vpop.eup %7055 }
0x1c92   :  { %v1699_v12 = vadd.f32 1.0, %v7056_v49 }
0x1c94   :  { %7057 = vrcp.f32 %v1699_v12 }
0x1c9e   :  { %v7058_v51 = vpop.eup %7057 }
0x1c9f   :  { %v1706_v23 = vmul.f32 %v7058_v51, %v1704_v57 }
0x1d02   :  { %v1709_v52 = vpop.permute.xlu0 %1708 }
0x1d03   :  { %v1711_v55 = vmul.f32 %v7058_v51, %v1709_v52 }
0x1d05   :  { %1713 = vrot.lane.b32.xlu1 %v1711_v55, %s7181_s25 }
0x1d77   :  { %v1714_v59 = vpop.permute.xlu1 %1713 }
0x1d78   :  { %v1716_v61 = vadd.f32 %v1714_v59, %v1706_v23 }
0x1d7a   :  { %7059 = vtanh.f32 %v1716_v61 }
0x1d84   :  { %v7060_v63 = vpop.eup %7059 }
0x1d85   :  { %1719 = vrot.lane.b32.xlu0 %v7060_v63, %s7180_s23 }
0x1df7   :  { %v1720_v4 = vpop.permute.xlu0 %1719 }
0x1df8   :  { %v7663_v10 = vmul.f32 %v7058_v51, %v1720_v4  ;;  %v1101_v4 = vrot.slane %v7598_v0, 2 }
0x1dfa   :  { %v1725_v11 = vsel %vm307_vm3, %v7663_v10, %v1723_v9 }
0x1dfb   :  { %v1734_v14 = vrot.slane %v1725_v11, 6  ;;  %v1840_v38 = vrot.slane %v1725_v11, 2 }
0x1dfd   :  { %1735 = vrot.lane.b32.xlu1 %v1734_v14, %s7181_s25 }
0x1e6f   :  { %v1736_v15 = vpop.permute.xlu1 %1735 }
0x1e70   :  { %6171 = vmatmul.mubr.msk.f32.vlgmr.msra.gmra.mrb[16].mxu0 %vm144_vm1, %v1736_v15  ;;  %v1103_v15 = vadd.f32 %v1101_v4, %v7367_v30 }
0x1e71   :  { %6715 = vmatpush3.bf16.msra.mxu0 %v7511_v62  ;;  %6192 = vmatprep.mubr.msk.f32.mxu0 %vm7178_vm0, %v7179_v6 }
0x1e72   :  { %6716 = vmatprep.subr.bf16.mxu0 %v7176_v1 }
0x1e75   :  { %6718 = vmatpush3.bf16.msra.mxu0 %v7521_v5  ;;  %v1726_v5 = vsel %vm307_vm3, %v1716_v61, %v1704_v57 }
0x1e76   :  { %6725 = vmatprep.subr.bf16.mxu0 %v7176_v1  ;;  %v1821_v16 = vrot.slane %v1726_v5, 2  ;;  %v1017_v5 = vsel %vm781_vm5, %v7562_v44, %v995_v40 }
0x1f43   :  { %v1805_v17 = vpop.f32.mrb[16].mxu0 }
0x1f44   :  { %v1810_v18 = vrot.slane %v1805_v17, 4  ;;  %v6172_v19 = vpop.f32.mrb[17].mxu0 }
0x1f45   :  { %v5669_v19 = vmul.f32 -1.442695, %v1103_v15 }
0x1f46   :  { %v1812_v20 = vadd.f32 %v1810_v18, %v7364_v26 }
0x1f48   :  { %7061 = vtanh.f32 %v1812_v20  ;;  %v5683_v24 = vmul.f32 -1.442695, %v1812_v20 }
0x1f4a   :  { %7063 = vpow2.f32 %v5683_v24 }
0x1f52   :  { %v7062_v22 = vpop.eup %7061 }
0x1f53   :  { %1825 = vrot.lane.b32.xlu0 %v7062_v22, %s7180_s23 }
0x1f54   :  { %v7064_v62 = vpop.eup %7063 }
0x1f55   :  { %v1816_v25 = vadd.f32 1.0, %v7064_v62 }
0x1f57   :  { %7065 = vrcp.f32 %v1816_v25 }
0x1f61   :  { %v7066_v21 = vpop.eup %7065 }
0x1f62   :  { %v1823_v28 = vmul.f32 %v7066_v21, %v1821_v16 }
0x1fc5   :  { %v1826_v31 = vpop.permute.xlu0 %1825 }
0x1fc6   :  { %v1828_v27 = vmul.f32 %v7066_v21, %v1826_v31 }
0x1fc8   :  { %1830 = vrot.lane.b32.xlu1 %v1828_v27, %s7181_s25 }
0x203a   :  { %v1831_v29 = vpop.permute.xlu1 %1830 }
0x203b   :  { %v1833_v32 = vadd.f32 %v1831_v29, %v1823_v28 }
0x203d   :  { %7067 = vtanh.f32 %v1833_v32  ;;  %v1843_v61 = vsel %vm307_vm3, %v1833_v32, %v1821_v16  ;;  %v1112_v16 = vrot.slane %v1017_v5, 6 }
0x203e   :  { %v1938_v63 = vrot.slane %v1843_v61, 2 }
0x2047   :  { %v7068_v34 = vpop.eup %7067 }
0x2048   :  { %1836 = vrot.lane.b32.xlu0 %v7068_v34, %s7180_s23 }
0x20ba   :  { %v1837_v37 = vpop.permute.xlu0 %1836 }
0x20bb   :  { %v7682_v42 = vmul.f32 %v7066_v21, %v1837_v37 }
0x20bd   :  { %v1842_v43 = vsel %vm307_vm3, %v7682_v42, %v1840_v38 }
0x20be   :  { %v1851_v7 = vrot.slane %v1842_v43, 4  ;;  %v1957_v0 = vrot.slane %v1842_v43, 2 }
0x20c0   :  { %1852 = vrot.lane.b32.xlu1 %v1851_v7, %s7181_s25 }
0x2132   :  { %v1853_v45 = vpop.permute.xlu1 %1852 }
0x2133   :  { %6182 = vmatmul.mubr.msk.f32.vlgmr.msra.gmra.mrb[14].mxu1 %vm144_vm1, %v1853_v45 }
0x2134   :  { %6203 = vmatprep.mubr.msk.f32.mxu1 %vm7178_vm0, %v7179_v6 }
0x2206   :  { %v1922_v46 = vpop.f32.mrb[14].mxu1 }
0x2207   :  { %v1927_v48 = vrot.slane %v1922_v46, 6  ;;  %v6183_v49 = vpop.f32.mrb[15].mxu1 }
0x2209   :  { %v1929_v12 = vadd.f32 %v1927_v48, %v7364_v26 }
0x220b   :  { %7069 = vtanh.f32 %v1929_v12  ;;  %v5685_v52 = vmul.f32 -1.442695, %v1929_v12  ;;  %v2079_v12 = vld [vmem:[%s8328_s8] sm:$0xff] }
0x220d   :  { %7071 = vpow2.f32 %v5685_v52 }
0x2215   :  { %v7070_v51 = vpop.eup %7069 }
0x2216   :  { %1942 = vrot.lane.b32.xlu0 %v7070_v51, %s7180_s23 }
0x2217   :  { %v7072_v55 = vpop.eup %7071 }
0x2218   :  { %v1933_v56 = vadd.f32 1.0, %v7072_v55 }
0x221a   :  { %7073 = vrcp.f32 %v1933_v56 }
0x2224   :  { %v7074_v57 = vpop.eup %7073 }
0x2225   :  { %v1940_v9 = vmul.f32 %v7074_v57, %v1938_v63 }
0x2288   :  { %v1943_v23 = vpop.permute.xlu0 %1942 }
0x2289   :  { %v1945_v59 = vmul.f32 %v7074_v57, %v1943_v23  ;;  %v2082_v23 = vld [vmem:[%s8328_s8 + $0x18] sm:$0xff] }
0x228b   :  { %1947 = vrot.lane.b32.xlu1 %v1945_v59, %s7181_s25 }
0x22fd   :  { %v1948_v11 = vpop.permute.xlu1 %1947 }
0x22fe   :  { %v1950_v14 = vadd.f32 %v1948_v11, %v1940_v9 }
0x2300   :  { %7075 = vtanh.f32 %v1950_v14  ;;  %v1960_v52 = vsel %vm307_vm3, %v1950_v14, %v1938_v63  ;;  %v1131_v63 = vrot.slane %v7574_v54, 6  ;;  %v901_v54 = vsel %vm781_vm5, %v7496_v58, 0.0  ;;  %v2085_v58 = vld [vmem:[%s8329_s9 + $0x10] sm:$0xff] }
0x2301   :  { %7077 = vtanh.f32 %v1103_v15  ;;  %v2052_v55 = vrot.slane %v1960_v52, 2 }
0x2302   :  { %7079 = vpow2.f32 %v5669_v19  ;;  %v666_v19 = vsel %vm307_vm3, %v7443_v3, 0.0  ;;  %v2083_v3 = vld [vmem:[%s8329_s9] sm:$0xff] }
0x230a   :  { %v7076_v17 = vpop.eup %7075 }
0x230b   :  { %1953 = vrot.lane.b32.xlu0 %v7076_v17, %s7180_s23  ;;  %v7078_v18 = vpop.eup %7077 }
0x230c   :  { %v7080_v20 = vpop.eup %7079 }
0x230d   :  { %v1107_v22 = vadd.f32 1.0, %v7080_v20 }
0x230f   :  { %1116 = vrot.lane.b32.xlu0 %v7078_v18, %s7180_s23  ;;  %7081 = vrcp.f32 %v1107_v22  ;;  %v430_v18 = vsel %vm307_vm3, %v7405_v13, 0.0  ;;  %v1844_v13 = vsel %vm307_vm3, %v7682_v42, 0.0  ;;  %v2084_v22 = vld [vmem:[%s8329_s9 + $0x8] sm:$0xff] }
0x2319   :  { %v7082_v25 = vpop.eup %7081 }
0x231a   :  { %v1114_v29 = vmul.f32 %v7082_v25, %v1112_v16 }
0x237d   :  { %v1954_v24 = vpop.permute.xlu0 %1953 }
0x237e   :  { %v7700_v62 = vmul.f32 %v7074_v57, %v1954_v24  ;;  %v2081_v57 = vld [vmem:[%s8328_s8 + $0x10] sm:$0xff]  ;;  %v6720_v24 = vpack.c.bf16 %v2084_v22, %v2083_v3  ;;  %v93_v22 = vld [vmem:[%s8335_s17] sm:$0xff] }
0x237f   :  { %v6729_v61 = vpack.c.bf16 %v2082_v23, %v2081_v57  ;;  %v86_v57 = vld [vmem:[%s8331_s13] sm:$0xff]  ;;  %v87_v23 = vld [vmem:[%s8331_s13 + $0x8] sm:$0xff] }
0x2380   :  { %v7705_v30 = vsel %vm307_vm3, %v7700_v62, %v1957_v0  ;;  %v2086_v0 = vld [vmem:[%s8329_s9 + $0x18] sm:$0xff]  ;;  %6721 = vmatpush3.bf16.msra.mxu1 %v6720_v24  ;;  %s7185_s9 = smov 80  }
0x2381   :  { %v1117_v21 = vpop.permute.xlu0 %1116  ;;  %v1968_v31 = vrot.slane %v7705_v30, 2  ;;  %v6723_v42 = vpack.c.bf16 %v2086_v0, %v2085_v58  ;;  %6722 = vmatprep.subr.bf16.mxu1 %v7176_v1  ;;  %v313_v30 = vsel %vm307_vm3, %v7385_v50, 0.0  ;;  %v785_v50 = vsel %vm781_vm5, %v7468_v35, 0.0  ;;  %v94_v58 = vld [vmem:[%s8335_s17 + $0x8] sm:$0xff]  ;;  %v7913_v0 = vld [vmem:[%s8336_s12] ss:$0 sm:$0xff] }
0x2382   :  { %v1119_v27 = vmul.f32 %v7082_v25, %v1117_v21  ;;  %v1961_v35 = vsel %vm307_vm3, %v7700_v62, 0.0  ;;  %v82_v62 = vld [vmem:[%s8330_s11 + $0x8] sm:$0xff]  ;;  %v7906_v24 = vpack.c.bf16 %v94_v58, %v93_v22 }
0x2383   :  { %1969 = vrot.lane.b32.xlu1 %v1968_v31, %s7181_s25 }
0x2384   :  { %1121 = vrot.lane.b32.xlu0 %v1119_v27, %s7181_s25  ;;  %6724 = vmatpush3.bf16.msra.mxu1 %v6723_v42 }
0x2385   :  { %6731 = vmatprep.subr.bf16.mxu1 %v7176_v1 }
0x23f5   :  { %v1970_v28 = vpop.permute.xlu1 %1969 }
0x23f6   :  { %6193 = vmatmul.mubr.msk.f32.vlgmr.msra.gmra.mrb[18].mxu0 %vm144_vm1, %v1970_v28  ;;  %v1122_v32 = vpop.permute.xlu0 %1121 }
0x23f7   :  { %v1124_v34 = vadd.f32 %v1122_v32, %v1114_v29  ;;  %6214 = vmatprep.mubr.msk.f32.mxu0 %vm7178_vm0, %v7179_v6  ;;  %v548_v29 = vsel %vm307_vm3, %v7424_v41, 0.0 }
0x23f9   :  { %7083 = vtanh.f32 %v1124_v34  ;;  %v1018_v34 = vsel %vm781_vm5, %v7569_v53, 0.0  ;;  %v1260_v53 = vsel %vm781_vm5, %v7578_v60, 0.0 }
0x2403   :  { %v7084_v37 = vpop.eup %7083 }
0x2404   :  { %1127 = vrot.lane.b32.xlu0 %v7084_v37, %s7180_s23  ;;  %v1727_v37 = vsel %vm307_vm3, %v7663_v10, 0.0 }
0x2476   :  { %v1128_v9 = vpop.permute.xlu0 %1127 }
0x2477   :  { %v1130_v11 = vmul.f32 %v7082_v25, %v1128_v9  ;;  %v1378_v25 = vsel %vm781_vm5, %v7606_v2, 0.0 }
0x2479   :  { %v1133_v15 = vsel %vm781_vm5, %v1130_v11, %v1131_v63  ;;  %v1134_v20 = vsel %vm781_vm5, %v1130_v11, 0.0  ;;  %v7865_v11 = vpack.c.bf16 %v87_v23, %v86_v57 }
0x247a   :  { %v2163_v17 = vrot.slane %v1133_v15, 6  ;;  %v89_v15 = vld [vmem:[%s8331_s13 + $0x18] sm:$0xff] }
0x24c9   :  { %v2039_v38 = vpop.f32.mrb[18].mxu0 }
0x24ca   :  { %v2043_v39 = vadd.f32 %v2039_v38, %v7364_v26  ;;  %v6194_v43 = vpop.f32.mrb[19].mxu0  ;;  %v2080_v26 = vld [vmem:[%s8328_s8 + $0x8] sm:$0xff]  ;;  %v1496_v38 = vsel %vm781_vm5, %v7625_v8, 0.0 }
0x24cb   :  { %v6726_v51 = vpack.c.bf16 %v2080_v26, %v2079_v12  ;;  %v83_v26 = vld [vmem:[%s8330_s11 + $0x10] sm:$0xff] }
0x24cc   :  { %7085 = vtanh.f32 %v2043_v39  ;;  %v5687_v44 = vmul.f32 -1.442695, %v2043_v39  ;;  %v7837_v39 = vpack.c.bf16 %v82_v62, %v81_v47 }
0x24cd   :  { %6727 = vmatpush3.bf16.msra.mxu0 %v6726_v51  ;;  %v84_v51 = vld [vmem:[%s8330_s11 + $0x18] sm:$0xff] }
0x24ce   :  { %7087 = vpow2.f32 %v5687_v44  ;;  %6728 = vmatprep.subr.bf16.mxu0 %v7176_v1  ;;  %v7852_v52 = vpack.c.bf16 %v84_v51, %v83_v26 }
0x24d1   :  { %6730 = vmatpush3.bf16.msra.mxu0 %v6729_v61  ;;  %v5690_v61 = vld [vmem:[%s8332_s10] ss:$0 sm:$0xff] }
0x24d2   :  { %6737 = vmatprep.subr.bf16.mxu0 %v7176_v1 }
0x24d6   :  { %v7086_v40 = vpop.eup %7085 }
0x24d7   :  { %2056 = vrot.lane.b32.xlu1 %v7086_v40, %s7180_s23 }
0x24d8   :  { %v7088_v7 = vpop.eup %7087 }
0x24d9   :  { %v2047_v45 = vadd.f32 1.0, %v7088_v7 }
0x24db   :  { %7089 = vrcp.f32 %v2047_v45 }
0x24e5   :  { %v7090_v46 = vpop.eup %7089 }
0x24e6   :  { %v2054_v56 = vmul.f32 %v7090_v46, %v2052_v55 }
0x2549   :  { %v2057_v48 = vpop.permute.xlu1 %2056 }
0x254a   :  { %v2059_v49 = vmul.f32 %v7090_v46, %v2057_v48 }
0x254c   :  { %2061 = vrot.lane.b32.xlu1 %v2059_v49, %s7181_s25 }
0x25be   :  { %v2062_v59 = vpop.permute.xlu1 %2061 }
0x25bf   :  { %v2064_v4 = vadd.f32 %v2062_v59, %v2054_v56 }
0x25c1   :  { %7091 = vtanh.f32 %v2064_v4 }
0x25cb   :  { %v7092_v14 = vpop.eup %7091 }
0x25cc   :  { %2067 = vrot.lane.b32.xlu1 %v7092_v14, %s7180_s23  ;;  %v88_v14 = vld [vmem:[%s8331_s13 + $0x10] sm:$0xff] }
0x25d0   :  { %2164 = vrot.lane.b32.xlu1 %v2163_v17, %s7181_s25  ;;  %v7875_v17 = vpack.c.bf16 %v89_v15, %v88_v14 }
0x25d4   :  { %432 = vrot.lane.b32.xlu1 %v430_v18, %s7181_s25  ;;  %v90_v18 = vld [vmem:[%s8333_s14] sm:$0xff] }
0x25d8   :  { %668 = vrot.lane.b32.xlu1 %v666_v19, %s7181_s25  ;;  %v91_v19 = vld [vmem:[%s8333_s14 + $0x8] sm:$0xff] }
0x25dc   :  { %903 = vrot.lane.b32.xlu1 %v901_v54, %s7181_s25  ;;  %v7891_v54 = vpack.c.bf16 %v91_v19, %v90_v18  ;;  %v98_v18 = vld [vmem:[%s8339_s19] sm:$0xff]  ;;  %v99_v19 = vld [vmem:[%s8339_s19 + $0x8] sm:$0xff] }
0x25e0   :  { %1136 = vrot.lane.b32.xlu1 %v1134_v20, %s7181_s25  ;;  %v2479_v20 = vld [vmem:[%s8334_s16] sm:$0xff] }
0x25e4   :  { %1846 = vrot.lane.b32.xlu1 %v1844_v13, %s7180_s23  ;;  %v2480_v13 = vld [vmem:[%s8334_s16 + $0x8] sm:$0xff] }
0x25e5   :  { %v6746_v3 = vpack.c.bf16 %v2480_v13, %v2479_v20  ;;  %v7996_v20 = vpack.c.bf16 %v99_v19, %v98_v18 }
0x25e8   :  { %1380 = vrot.lane.b32.xlu1 %v1378_v25, %s7180_s23 }
0x263e   :  { %v2068_v21 = vpop.permute.xlu1 %2067 }
0x263f   :  { %v2070_v27 = vmul.f32 %v7090_v46, %v2068_v21 }
0x2641   :  { %v2072_v5 = vsel %vm307_vm3, %v2070_v27, %v1968_v31  ;;  %v2073_v16 = vsel %vm307_vm3, %v2070_v27, 0.0  ;;  %v1610_v31 = vsel %vm781_vm5, %v7644_v36, 0.0  ;;  %vm3635_vm3 = vcmask 386304  }
0x2642   :  { %2088 = vrot.lane.b32.xlu0 %v2072_v5, %s7181_s25  ;;  %2075 = vrot.lane.b32.xlu1 %v2073_v16, %s7180_s23  ;;  %v2165_v2 = vpop.permute.xlu1 %2164  ;;  %v2481_v16 = vld [vmem:[%s8334_s16 + $0x10] sm:$0xff]  ;;  %vm4434_vm5 = vcmask 648704  }
0x2643   :  { %6215 = vmatmul.mubr.msk.f32.vlgmr.msra.gmra.mrb[20].mxu0 %vm144_vm1, %v2165_v2  ;;  %v2482_v2 = vld [vmem:[%s8334_s16 + $0x18] sm:$0xff] }
0x2644   :  { %6232 = vmatprep.mubr.msk.f32.mxu0 %vm7178_vm0, %v7179_v6  ;;  %6739 = vmatpush3.bf16.msra.mxu0 %v7891_v54 }
0x2645   :  { %6747 = vmatprep.subr.bf16.mxu0 %v6746_v3 }
0x2646   :  { %315 = vrot.lane.b32.xlu0 %v313_v30, %s7181_s25  ;;  %1612 = vrot.lane.b32.xlu1 %v1610_v31, %s7180_s23  ;;  %v433_v28 = vpop.permute.xlu1 %432  ;;  %v6750_v30 = vpack.c.bf16 %v2482_v2, %v2481_v16 }
0x2647   :  { %436 = vst.msk [vmem:[#allocation2] sm:$0xc] %vm435_vm6, %v433_v28  ;;  %v2483_v28 = vld [vmem:[%s8334_s16 + $0x20] sm:$0xff] }
0x264a   :  { %550 = vrot.lane.b32.xlu0 %v548_v29, %s7181_s25  ;;  %v669_v32 = vpop.permute.xlu1 %668  ;;  %v2484_v29 = vld [vmem:[%s8334_s16 + $0x28] sm:$0xff] }
0x264b   :  { %672 = vst.msk [vmem:[#allocation2] sm:$0xc0] %vm671_vm7, %v669_v32 }
0x264e   :  { %787 = vrot.lane.b32.xlu0 %v785_v50, %s7181_s25  ;;  %v904_v36 = vpop.permute.xlu1 %903  ;;  %v6754_v50 = vpack.c.bf16 %v2484_v29, %v2483_v28 }
0x264f   :  { %906 = vst.msk [vmem:[#allocation2 + $0x8] sm:$0xc] %vm435_vm6, %v904_v36  ;;  %v2485_v36 = vld [vmem:[%s8334_s16 + $0x30] sm:$0xff]  ;;  %vm4836_vm6 = vcmask 779904  }
0x2652   :  { %1020 = vrot.lane.b32.xlu0 %v1018_v34, %s7181_s25  ;;  %v1137_v41 = vpop.permute.xlu1 %1136  ;;  %v2486_v34 = vld [vmem:[%s8334_s16 + $0x38] sm:$0xff]  ;;  %s7186_s16 = smov 112  }
0x2653   :  { %1139 = vst.msk [vmem:[#allocation2 + $0x8] sm:$0xc0] %vm671_vm7, %v1137_v41  ;;  %v6758_v41 = vpack.c.bf16 %v2486_v34, %v2485_v36  ;;  %vm5640_vm7 = vcmask 1042304  }
0x2656   :  { %1729 = vrot.lane.b32.xlu0 %v1727_v37, %s7180_s23  ;;  %v1847_v10 = vpop.permute.xlu1 %1846 }
0x265a   :  { %1963 = vrot.lane.b32.xlu0 %v1961_v35, %s7180_s23  ;;  %v1381_v43 = vpop.permute.xlu1 %1380  ;;  %v95_v35 = vld [vmem:[%s8335_s17 + $0x10] sm:$0xff] }
0x265e   :  { %1262 = vrot.lane.b32.xlu0 %v1260_v53, %s7180_s23  ;;  %v96_v53 = vld [vmem:[%s8335_s17 + $0x18] sm:$0xff] }
0x2662   :  { %1498 = vrot.lane.b32.xlu0 %v1496_v38, %s7180_s23  ;;  %v7946_v38 = vpack.c.bf16 %v96_v53, %v95_v35 }
0x26b4   :  { %v2089_v60 = vpop.permute.xlu0 %2088  ;;  %v2076_v8 = vpop.permute.xlu1 %2075 }
0x26b5   :  { %6204 = vmatmul.mubr.msk.f32.vlgmr.msra.gmra.mrb[16].mxu1 %vm144_vm1, %v2089_v60 }
0x26b6   :  { %6733 = vmatpush3.bf16.msra.mxu1 %v7837_v39  ;;  %6225 = vmatprep.mubr.msk.f32.mxu1 %vm7178_vm0, %v7179_v6 }
0x26b7   :  { %6734 = vmatprep.subr.bf16.mxu1 %v7176_v1 }
0x26b8   :  { %v316_v33 = vpop.permute.xlu0 %315  ;;  %v1613_v7 = vpop.permute.xlu1 %1612 }
0x26b9   :  { %319 = vst.msk [vmem:[#allocation2] sm:$0x3] %vm318_vm8, %v316_v33  ;;  %v5696_v33 = vld [vmem:[%s8338_s18] ss:$0 sm:$0xff] }
0x26ba   :  { %2078 = vst.msk [vmem:[#allocation2] sm:$0x3] %vm1615_vm9, %v2076_v8  ;;  %6736 = vmatpush3.bf16.msra.mxu1 %v7852_v52 }
0x26bb   :  { %6740 = vmatprep.subr.bf16.mxu1 %v7176_v1 }
0x26bc   :  { %v551_v40 = vpop.permute.xlu0 %550 }
0x26bd   :  { %554 = vst.msk [vmem:[#allocation2] sm:$0x30] %vm553_vm10, %v551_v40 }
0x26be   :  { %1849 = vst.msk [vmem:[#allocation2] sm:$0x30] %vm1383_vm11, %v1847_v10  ;;  %v7953_v10 = vld [vmem:[%s8337_s15] ss:$0 sm:$0xff] }
0x26c0   :  { %v788_v44 = vpop.permute.xlu0 %787 }
0x26c1   :  { %790 = vst.msk [vmem:[#allocation2 + $0x8] sm:$0x3] %vm318_vm8, %v788_v44 }
0x26c2   :  { %1616 = vst.msk [vmem:[#allocation2 + $0x8] sm:$0x3] %vm1615_vm9, %v1613_v7 }
0x26c4   :  { %v1021_v45 = vpop.permute.xlu0 %1020 }
0x26c5   :  { %1023 = vst.msk [vmem:[#allocation2 + $0x8] sm:$0x30] %vm553_vm10, %v1021_v45 }
0x26c6   :  { %1384 = vst.msk [vmem:[#allocation2 + $0x8] sm:$0x30] %vm1383_vm11, %v1381_v43 }
0x26c8   :  { %v1730_v46 = vpop.permute.xlu0 %1729 }
0x26c9   :  { %1732 = vst.msk [vmem:[#allocation2] sm:$0xc0] %vm1265_vm12, %v1730_v46 }
0x26cc   :  { %v1964_v48 = vpop.permute.xlu0 %1963 }
0x26cd   :  { %1966 = vst.msk [vmem:[#allocation2] sm:$0xc] %vm1501_vm13, %v1964_v48 }
0x26d0   :  { %v1263_v49 = vpop.permute.xlu0 %1262 }
0x26d1   :  { %1266 = vst.msk [vmem:[#allocation2 + $0x8] sm:$0xc0] %vm1265_vm12, %v1263_v49 }
0x26d4   :  { %v1499_v12 = vpop.permute.xlu0 %1498  ;;  %v2477_v32 = vld [vmem:[#allocation2] sm:$0xff] }
0x26d5   :  { %1502 = vst.msk [vmem:[#allocation2 + $0x8] sm:$0xc] %vm1501_vm13, %v1499_v12 }
0x26dc   :  { %v2478_v37 = vld [vmem:[#allocation2 + $0x8] sm:$0xff] }
0x2716   :  { %v2234_v55 = vpop.f32.mrb[20].mxu0 }
0x2717   :  { %v6216_v56 = vpop.f32.mrb[21].mxu0 }
0x2788   :  { %v2158_v59 = vpop.f32.mrb[16].mxu1 }
0x2789   :  { %v2235_v4 = vadd.f32 %v2234_v55, %v2158_v59  ;;  %v6205_v9 = vpop.f32.mrb[17].mxu1 }
0x278b   :  { %v2245_v63 = vadd.f32 %v5690_v61, %v2235_v4 }
0x278d   :  { %6226 = vmatmul.mubr.msk.f32.vlgmr.msra.gmra.mrb[18].mxu1 %vm144_vm1, %v2245_v63 }
0x278e   :  { %6742 = vmatpush3.bf16.msra.mxu1 %v7865_v11  ;;  %6243 = vmatprep.mubr.msk.f32.mxu1 %vm7178_vm0, %v7179_v6 }
0x278f   :  { %6743 = vmatprep.subr.bf16.mxu1 %v7176_v1 }
0x2792   :  { %6745 = vmatpush3.bf16.msra.mxu1 %v7875_v17 }
0x2793   :  { %6762 = vmatprep.subr.bf16.mxu1 %v7176_v1 }
0x2795   :  { %6244 = vmatmul.mubr.msk.f32.vlgmr.msra.gmra.mrb[20].mxu1 %vm144_vm1, %v2245_v63 }
0x2796   :  { %6273 = vmatprep.mubr.msk.f32.mxu1 %vm7178_vm0, %v7179_v6  ;;  %6764 = vmatpush3.bf16.msra.mxu1 %v7906_v24 }
0x2797   :  { %6765 = vmatprep.subr.bf16.mxu1 %v7176_v1 }
0x279a   :  { %6767 = vmatpush3.bf16.msra.mxu1 %v7946_v38 }
0x279b   :  { %6768 = vmatprep.subr.bf16.mxu1 %v7176_v1 }
0x2860   :  { %v2321_v42 = vpop.f32.mrb[18].mxu1 }
0x2861   :  { %v2322_v25 = vadd.f32 %v7913_v0, %v2321_v42  ;;  %v6227_v21 = vpop.f32.mrb[19].mxu1 }
0x2862   :  { %v8016_v21 = vld [vmem:[%s8340_s20] ss:$0 sm:$0xff] }
0x2863   :  { %7093 = vtanh.f32 %v2322_v25 }
0x2868   :  { %v2466_v27 = vpop.f32.mrb[20].mxu1 }
0x2869   :  { %v6245_v5 = vpop.f32.mrb[21].mxu1 }
0x286d   :  { %v7094_v31 = vpop.eup %7093 }
0x286e   :  { %6233 = vmatmul.mubr.msk.f32.vlgmr.msra.gmra.mrb[22].mxu0 %vm2326_vm14, %v7094_v31 }
0x286f   :  { %6749 = vmatpush3.bf16.msra.mxu0 %v6746_v3  ;;  %6262 = vmatprep.mubr.msk.f32.mxu0 %vm2493_vm15, %v2477_v32 }
0x2870   :  { %6751 = vmatprep.subr.bf16.mxu0 %v6750_v30 }
0x2873   :  { %6753 = vmatpush3.bf16.msra.mxu0 %v6750_v30 }
0x2874   :  { %6755 = vmatprep.subr.bf16.mxu0 %v6754_v50 }
0x2877   :  { %6757 = vmatpush3.bf16.msra.mxu0 %v6754_v50 }
0x2878   :  { %6759 = vmatprep.subr.bf16.mxu0 %v6758_v41 }
0x287b   :  { %6761 = vmatpush3.bf16.msra.mxu0 %v6758_v41 }
0x287c   :  { %6774 = vmatprep.subr.bf16.mxu0 %v7176_v1 }
0x287e   :  { %6263 = vmatmul.mubr.msk.f32.vlgmr.msra.gmra.mrb[24].mxu0 %vm2493_vm15, %v2478_v37 }
0x287f   :  { %6291 = vmatprep.mubr.msk.f32.mxu0 %vm7178_vm0, %v7179_v6  ;;  %6776 = vmatpush3.bf16.msra.mxu0 %v7996_v20 }
0x2880   :  { %6777 = vmatprep.subr.bf16.mxu0 %v7176_v1 }
0x2941   :  { %v2396_v47 = vpop.f32.mrb[22].mxu0 }
0x2942   :  { %v2467_v62 = vadd.f32 %v2466_v27, %v2396_v47  ;;  %v6234_v60 = vpop.f32.mrb[23].mxu0 }
0x2944   :  { %v2476_v43 = vadd.f32 %v7953_v10, %v2467_v62 }
0x2946   :  { %2656 = vrot.lane.b32.xlu1 %v2476_v43, %s7181_s25  ;;  %6274 = vmatmul.mubr.msk.f32.vlgmr.msra.gmra.mrb[22].mxu1 %vm144_vm1, %v2476_v43 }
0x2947   :  { %6770 = vmatpush3.bf16.msra.mxu1 %v7837_v39  ;;  %6284 = vmatprep.mubr.msk.f32.mxu1 %vm7178_vm0, %v7179_v6 }
0x2948   :  { %6771 = vmatprep.subr.bf16.mxu1 %v7176_v1 }
0x294b   :  { %6773 = vmatpush3.bf16.msra.mxu1 %v7852_v52 }
0x294c   :  { %6780 = vmatprep.subr.bf16.mxu1 %v7176_v1 }
0x2951   :  { %v6264_v8 = vpop.f32.mrb[24].mxu0 }
0x2952   :  { %v7967_v40 = vadd.f32 %v6264_v8, %v5696_v33  ;;  %v2566_v44 = vpop.f32.mrb[25].mxu0 }
0x2953   :  { %v7969_v7 = vadd.f32 %v5696_v33, %v2566_v44 }
0x29b8   :  { %v2657_v23 = vpop.permute.xlu1 %2656 }
0x2a19   :  { %v2644_v45 = vpop.f32.mrb[22].mxu1 }
0x2a1a   :  { %v2648_v46 = vadd.f32 %v2644_v45, %v7969_v7  ;;  %v6275_v48 = vpop.f32.mrb[23].mxu1 }
0x2a1c   :  { %7095 = vtanh.f32 %v2648_v46  ;;  %v5700_v12 = vmul.f32 -1.442695, %v2648_v46 }
0x2a1e   :  { %7097 = vpow2.f32 %v5700_v12 }
0x2a26   :  { %v7096_v49 = vpop.eup %7095 }
0x2a27   :  { %2661 = vrot.lane.b32.xlu0 %v7096_v49, %s7180_s23 }
0x2a28   :  { %v7098_v26 = vpop.eup %7097 }
0x2a29   :  { %v2652_v51 = vadd.f32 1.0, %v7098_v26 }
0x2a2b   :  { %7099 = vrcp.f32 %v2652_v51 }
0x2a35   :  { %v7100_v55 = vpop.eup %7099 }
0x2a36   :  { %v2659_v59 = vmul.f32 %v7100_v55, %v2657_v23 }
0x2a99   :  { %v2662_v56 = vpop.permute.xlu0 %2661 }
0x2a9a   :  { %v2664_v57 = vmul.f32 %v7100_v55, %v2662_v56 }
0x2a9c   :  { %2666 = vrot.lane.b32.xlu0 %v2664_v57, %s7181_s25 }
0x2b0e   :  { %v2667_v61 = vpop.permute.xlu0 %2666 }
0x2b0f   :  { %v2669_v4 = vadd.f32 %v2667_v61, %v2659_v59 }
0x2b11   :  { %7101 = vtanh.f32 %v2669_v4 }
0x2b1b   :  { %v7102_v9 = vpop.eup %7101 }
0x2b1c   :  { %2672 = vrot.lane.b32.xlu1 %v7102_v9, %s7180_s23 }
0x2b8e   :  { %v2673_v63 = vpop.permute.xlu1 %2672 }
0x2b8f   :  { %v2675_v14 = vmul.f32 %v7100_v55, %v2673_v63 }
0x2b91   :  { %2677 = vrot.lane.b32.xlu0 %v2675_v14, %s7181_s25 }
0x2c03   :  { %v2678_v15 = vpop.permute.xlu0 %2677 }
0x2c04   :  { %6285 = vmatmul.mubr.msk.f32.vlgmr.msra.gmra.mrb[24].mxu1 %vm144_vm1, %v2678_v15 }
0x2c05   :  { %6782 = vmatpush3.bf16.msra.mxu1 %v7865_v11  ;;  %6309 = vmatprep.mubr.msk.f32.mxu1 %vm7178_vm0, %v7179_v6 }
0x2c06   :  { %6783 = vmatprep.subr.bf16.mxu1 %v7176_v1 }
0x2c09   :  { %6785 = vmatpush3.bf16.msra.mxu1 %v7875_v17 }
0x2c0a   :  { %6792 = vmatprep.subr.bf16.mxu1 %v7176_v1 }
0x2c0c   :  { %6310 = vmatmul.mubr.msk.f32.vlgmr.msra.gmra.mrb[26].mxu1 %vm144_vm1, %v2678_v15 }
0x2c0d   :  { %6794 = vmatpush3.bf16.msra.mxu1 %v7837_v39  ;;  %6331 = vmatprep.mubr.msk.f32.mxu1 %vm7178_vm0, %v7179_v6 }
0x2c0e   :  { %6795 = vmatprep.subr.bf16.mxu1 %v7176_v1 }
0x2c11   :  { %6797 = vmatpush3.bf16.msra.mxu1 %v7852_v52 }
0x2c12   :  { %6804 = vmatprep.subr.bf16.mxu1 %v7176_v1 }
0x2cd7   :  { %v2747_v13 = vpop.f32.mrb[24].mxu1 }
0x2cd8   :  { %v2748_v3 = vadd.f32 %v7913_v0, %v2747_v13  ;;  %v6286_v22 = vpop.f32.mrb[25].mxu1 }
0x2cda   :  { %7103 = vtanh.f32 %v2748_v3 }
0x2cdf   :  { %v2969_v58 = vpop.f32.mrb[26].mxu1 }
0x2ce0   :  { %v6311_v42 = vpop.f32.mrb[27].mxu1 }
0x2ce4   :  { %v7104_v25 = vpop.eup %7103 }
0x2ce5   :  { %6292 = vmatmul.mubr.msk.f32.vlgmr.msra.gmra.mrb[26].mxu0 %vm2326_vm14, %v7104_v25 }
0x2ce6   :  { %6779 = vmatpush3.bf16.msra.mxu0 %v7891_v54  ;;  %6298 = vmatprep.mubr.msk.f32.mxu0 %vm7178_vm0, %v7179_v6 }
0x2ce7   :  { %6786 = vmatprep.subr.bf16.mxu0 %v7176_v1 }
0x2ce9   :  { %6299 = vmatmul.mubr.msk.f32.vlgmr.msra.gmra.mrb[28].mxu0 %vm2326_vm14, %v7104_v25 }
0x2cea   :  { %6788 = vmatpush3.bf16.msra.mxu0 %v7906_v24  ;;  %6320 = vmatprep.mubr.msk.f32.mxu0 %vm7178_vm0, %v7179_v6 }
0x2ceb   :  { %6789 = vmatprep.subr.bf16.mxu0 %v7176_v1 }
0x2cee   :  { %6791 = vmatpush3.bf16.msra.mxu0 %v7946_v38 }
0x2cef   :  { %6798 = vmatprep.subr.bf16.mxu0 %v7176_v1 }
0x2db8   :  { %v2827_v27 = vpop.f32.mrb[26].mxu0 }
0x2db9   :  { %v2828_v5 = vadd.f32 %v8016_v21, %v2827_v27  ;;  %v6293_v16 = vpop.f32.mrb[27].mxu0 }
0x2dbb   :  { %2832 = vst.msk [vmem:[%s8341_s21] sm:$0x3] %vm2831_vm2, %v2828_v5 }
0x2dbc   :  { %v2899_v2 = vpop.f32.mrb[28].mxu0 }
0x2dbd   :  { %v2970_v30 = vadd.f32 %v2969_v58, %v2899_v2  ;;  %v6300_v31 = vpop.f32.mrb[29].mxu0 }
0x2dbf   :  { %v2973_v28 = vadd.f32 %v7953_v10, %v2970_v30 }
0x2dc1   :  { %6321 = vmatmul.mubr.msk.f32.vlgmr.msra.gmra.mrb[30].mxu0 %vm144_vm1, %v2973_v28  ;;  %v3058_v29 = vrot.slane %v2973_v28, 6 }
0x2dc2   :  { %6800 = vmatpush3.bf16.msra.mxu0 %v7996_v20  ;;  %6338 = vmatprep.mubr.msk.f32.mxu0 %vm7178_vm0, %v7179_v6 }
0x2dc3   :  { %3059 = vrot.lane.b32.xlu0 %v3058_v29, %s7181_s25  ;;  %6801 = vmatprep.subr.bf16.mxu0 %v7176_v1 }
0x2e35   :  { %v3060_v43 = vpop.permute.xlu0 %3059 }
0x2e94   :  { %v3043_v32 = vpop.f32.mrb[30].mxu0 }
0x2e95   :  { %v3048_v50 = vrot.slane %v3043_v32, 6  ;;  %v6322_v36 = vpop.f32.mrb[31].mxu0 }
0x2e97   :  { %v3050_v34 = vadd.f32 %v3048_v50, %v7969_v7 }
0x2e99   :  { %7105 = vtanh.f32 %v3050_v34  ;;  %v5707_v37 = vmul.f32 -1.442695, %v3050_v34 }
0x2e9b   :  { %7107 = vpow2.f32 %v5707_v37 }
0x2ea3   :  { %v7106_v41 = vpop.eup %7105 }
0x2ea4   :  { %3064 = vrot.lane.b32.xlu1 %v7106_v41, %s7180_s23 }
0x2ea5   :  { %v7108_v35 = vpop.eup %7107 }
0x2ea6   :  { %v3054_v53 = vadd.f32 1.0, %v7108_v35 }
0x2ea8   :  { %7109 = vrcp.f32 %v3054_v53 }
0x2eb2   :  { %v7110_v47 = vpop.eup %7109 }
0x2eb3   :  { %v3062_v33 = vmul.f32 %v7110_v47, %v3060_v43 }
0x2f16   :  { %v3065_v62 = vpop.permute.xlu1 %3064 }
0x2f17   :  { %v3067_v60 = vmul.f32 %v7110_v47, %v3065_v62 }
0x2f19   :  { %3069 = vrot.lane.b32.xlu1 %v3067_v60, %s7181_s25 }
0x2f8b   :  { %v3070_v8 = vpop.permute.xlu1 %3069 }
0x2f8c   :  { %v3072_v44 = vadd.f32 %v3070_v8, %v3062_v33 }
0x2f8e   :  { %7111 = vtanh.f32 %v3072_v44 }
0x2f98   :  { %v7112_v45 = vpop.eup %7111 }
0x2f99   :  { %3075 = vrot.lane.b32.xlu0 %v7112_v45, %s7180_s23 }
0x300b   :  { %v3076_v46 = vpop.permute.xlu0 %3075 }
0x300c   :  { %v3078_v48 = vmul.f32 %v7110_v47, %v3076_v46 }
0x300e   :  { %v3080_v49 = vrot.slane %v3078_v48, 2 }
0x3010   :  { %3081 = vrot.lane.b32.xlu1 %v3080_v49, %s7181_s25 }
0x3082   :  { %v3082_v12 = vpop.permute.xlu1 %3081 }
0x3083   :  { %6332 = vmatmul.mubr.msk.f32.vlgmr.msra.gmra.mrb[28].mxu1 %vm144_vm1, %v3082_v12 }
0x3084   :  { %6806 = vmatpush3.bf16.msra.mxu1 %v7865_v11  ;;  %6356 = vmatprep.mubr.msk.f32.mxu1 %vm7178_vm0, %v7179_v6 }
0x3085   :  { %6807 = vmatprep.subr.bf16.mxu1 %v7176_v1 }
0x3088   :  { %6809 = vmatpush3.bf16.msra.mxu1 %v7875_v17 }
0x3089   :  { %6816 = vmatprep.subr.bf16.mxu1 %v7176_v1 }
0x308b   :  { %6357 = vmatmul.mubr.msk.f32.vlgmr.msra.gmra.mrb[30].mxu1 %vm144_vm1, %v3082_v12 }
0x308c   :  { %6818 = vmatpush3.bf16.msra.mxu1 %v7837_v39  ;;  %6378 = vmatprep.mubr.msk.f32.mxu1 %vm7178_vm0, %v7179_v6 }
0x308d   :  { %6819 = vmatprep.subr.bf16.mxu1 %v7176_v1 }
0x3090   :  { %6821 = vmatpush3.bf16.msra.mxu1 %v7852_v52 }
0x3091   :  { %6828 = vmatprep.subr.bf16.mxu1 %v7176_v1 }
0x3156   :  { %v3151_v26 = vpop.f32.mrb[28].mxu1 }
0x3157   :  { %v3152_v51 = vadd.f32 %v7913_v0, %v3151_v26  ;;  %v6333_v55 = vpop.f32.mrb[29].mxu1 }
0x3159   :  { %7113 = vtanh.f32 %v3152_v51 }
0x315e   :  { %v3371_v56 = vpop.f32.mrb[30].mxu1 }
0x315f   :  { %v6358_v57 = vpop.f32.mrb[31].mxu1 }
0x3163   :  { %v7114_v23 = vpop.eup %7113 }
0x3164   :  { %6339 = vmatmul.mubr.msk.f32.vlgmr.msra.gmra.mrb[32].mxu0 %vm2326_vm14, %v7114_v23 }
0x3165   :  { %6803 = vmatpush3.bf16.msra.mxu0 %v7891_v54  ;;  %6345 = vmatprep.mubr.msk.f32.mxu0 %vm7178_vm0, %v7179_v6 }
0x3166   :  { %6810 = vmatprep.subr.bf16.mxu0 %v7176_v1 }
0x3168   :  { %6346 = vmatmul.mubr.msk.f32.vlgmr.msra.gmra.mrb[34].mxu0 %vm2326_vm14, %v7114_v23 }
0x3169   :  { %6812 = vmatpush3.bf16.msra.mxu0 %v7906_v24  ;;  %6367 = vmatprep.mubr.msk.f32.mxu0 %vm7178_vm0, %v7179_v6 }
0x316a   :  { %6813 = vmatprep.subr.bf16.mxu0 %v7176_v1 }
0x316d   :  { %6815 = vmatpush3.bf16.msra.mxu0 %v7946_v38 }
0x316e   :  { %6822 = vmatprep.subr.bf16.mxu0 %v7176_v1 }
0x3237   :  { %v8061_v59 = vpop.f32.mrb[32].mxu0 }
0x3238   :  { %v6340_v61 = vpop.f32.mrb[33].mxu0 }
0x323b   :  { %v3301_v4 = vpop.f32.mrb[34].mxu0 }
0x323c   :  { %v3372_v9 = vadd.f32 %v3371_v56, %v3301_v4  ;;  %v6347_v63 = vpop.f32.mrb[35].mxu0 }
0x323e   :  { %v3375_v14 = vadd.f32 %v7953_v10, %v3372_v9 }
0x3240   :  { %6368 = vmatmul.mubr.msk.f32.vlgmr.msra.gmra.mrb[36].mxu0 %vm144_vm1, %v3375_v14  ;;  %v3460_v15 = vrot.slane %v3375_v14, 4 }
0x3241   :  { %6824 = vmatpush3.bf16.msra.mxu0 %v7996_v20  ;;  %6385 = vmatprep.mubr.msk.f32.mxu0 %vm7178_vm0, %v7179_v6 }
0x3242   :  { %3461 = vrot.lane.b32.xlu1 %v3460_v15, %s7181_s25  ;;  %6825 = vmatprep.subr.bf16.mxu0 %v7176_v1 }
0x32b4   :  { %v3462_v2 = vpop.permute.xlu1 %3461 }
0x3313   :  { %v3445_v18 = vpop.f32.mrb[36].mxu0 }
0x3314   :  { %v3450_v19 = vrot.slane %v3445_v18, 4  ;;  %v6369_v13 = vpop.f32.mrb[37].mxu0 }
0x3316   :  { %v3452_v3 = vadd.f32 %v3450_v19, %v7969_v7 }
0x3318   :  { %7115 = vtanh.f32 %v3452_v3  ;;  %v5713_v58 = vmul.f32 -1.442695, %v3452_v3 }
0x331a   :  { %7117 = vpow2.f32 %v5713_v58 }
0x3322   :  { %v7116_v22 = vpop.eup %7115 }
0x3323   :  { %3466 = vrot.lane.b32.xlu0 %v7116_v22, %s7180_s23 }
0x3324   :  { %v7118_v42 = vpop.eup %7117 }
0x3325   :  { %v3456_v25 = vadd.f32 1.0, %v7118_v42 }
0x3327   :  { %7119 = vrcp.f32 %v3456_v25 }
0x3331   :  { %v7120_v27 = vpop.eup %7119 }
0x3332   :  { %v3464_v30 = vmul.f32 %v7120_v27, %v3462_v2 }
0x3395   :  { %v3467_v5 = vpop.permute.xlu0 %3466 }
0x3396   :  { %v3469_v16 = vmul.f32 %v7120_v27, %v3467_v5 }
0x3398   :  { %3471 = vrot.lane.b32.xlu0 %v3469_v16, %s7181_s25 }
0x340a   :  { %v3472_v31 = vpop.permute.xlu0 %3471 }
0x340b   :  { %v3474_v28 = vadd.f32 %v3472_v31, %v3464_v30 }
0x340d   :  { %7121 = vtanh.f32 %v3474_v28 }
0x3417   :  { %v7122_v29 = vpop.eup %7121 }
0x3418   :  { %3477 = vrot.lane.b32.xlu1 %v7122_v29, %s7180_s23 }
0x348a   :  { %v3478_v32 = vpop.permute.xlu1 %3477 }
0x348b   :  { %v3480_v50 = vmul.f32 %v7120_v27, %v3478_v32 }
0x348d   :  { %v3482_v36 = vrot.slane %v3480_v50, 4 }
0x348f   :  { %3483 = vrot.lane.b32.xlu0 %v3482_v36, %s7181_s25 }
0x3501   :  { %v3484_v34 = vpop.permute.xlu0 %3483 }
0x3502   :  { %6379 = vmatmul.mubr.msk.f32.vlgmr.msra.gmra.mrb[32].mxu1 %vm144_vm1, %v3484_v34 }
0x3503   :  { %6830 = vmatpush3.bf16.msra.mxu1 %v7865_v11  ;;  %6403 = vmatprep.mubr.msk.f32.mxu1 %vm7178_vm0, %v7179_v6 }
0x3504   :  { %6831 = vmatprep.subr.bf16.mxu1 %v7176_v1 }
0x3507   :  { %6833 = vmatpush3.bf16.msra.mxu1 %v7875_v17 }
0x3508   :  { %6840 = vmatprep.subr.bf16.mxu1 %v7176_v1 }
0x350a   :  { %6404 = vmatmul.mubr.msk.f32.vlgmr.msra.gmra.mrb[34].mxu1 %vm144_vm1, %v3484_v34 }
0x350b   :  { %6842 = vmatpush3.bf16.msra.mxu1 %v7837_v39  ;;  %6425 = vmatprep.mubr.msk.f32.mxu1 %vm7178_vm0, %v7179_v6 }
0x350c   :  { %6843 = vmatprep.subr.bf16.mxu1 %v7176_v1 }
0x350f   :  { %6845 = vmatpush3.bf16.msra.mxu1 %v7852_v52 }
0x3510   :  { %6852 = vmatprep.subr.bf16.mxu1 %v7176_v1 }
0x35d5   :  { %v3553_v41 = vpop.f32.mrb[32].mxu1 }
0x35d6   :  { %v3554_v37 = vadd.f32 %v7913_v0, %v3553_v41  ;;  %v6380_v35 = vpop.f32.mrb[33].mxu1 }
0x35d8   :  { %7123 = vtanh.f32 %v3554_v37 }
0x35dd   :  { %v3773_v53 = vpop.f32.mrb[34].mxu1 }
0x35de   :  { %v6405_v47 = vpop.f32.mrb[35].mxu1 }
0x35e2   :  { %v7124_v62 = vpop.eup %7123 }
0x35e3   :  { %6386 = vmatmul.mubr.msk.f32.vlgmr.msra.gmra.mrb[38].mxu0 %vm2326_vm14, %v7124_v62 }
0x35e4   :  { %6827 = vmatpush3.bf16.msra.mxu0 %v7891_v54  ;;  %6392 = vmatprep.mubr.msk.f32.mxu0 %vm7178_vm0, %v7179_v6 }
0x35e5   :  { %6834 = vmatprep.subr.bf16.mxu0 %v7176_v1 }
0x35e7   :  { %6393 = vmatmul.mubr.msk.f32.vlgmr.msra.gmra.mrb[40].mxu0 %vm2326_vm14, %v7124_v62 }
0x35e8   :  { %6836 = vmatpush3.bf16.msra.mxu0 %v7906_v24  ;;  %6414 = vmatprep.mubr.msk.f32.mxu0 %vm7178_vm0, %v7179_v6 }
0x35e9   :  { %6837 = vmatprep.subr.bf16.mxu0 %v7176_v1 }
0x35ec   :  { %6839 = vmatpush3.bf16.msra.mxu0 %v7946_v38 }
0x35ed   :  { %6846 = vmatprep.subr.bf16.mxu0 %v7176_v1 }
0x36b6   :  { %v8102_v60 = vpop.f32.mrb[38].mxu0 }
0x36b7   :  { %v6387_v43 = vpop.f32.mrb[39].mxu0 }
0x36ba   :  { %v3703_v33 = vpop.f32.mrb[40].mxu0 }
0x36bb   :  { %v3774_v8 = vadd.f32 %v3773_v53, %v3703_v33  ;;  %v6394_v44 = vpop.f32.mrb[41].mxu0 }
0x36bd   :  { %v3777_v45 = vadd.f32 %v7953_v10, %v3774_v8 }
0x36bf   :  { %v3862_v46 = vrot.slane %v3777_v45, 2  ;;  %6415 = vmatmul.mubr.msk.f32.vlgmr.msra.gmra.mrb[42].mxu0 %vm144_vm1, %v3777_v45 }
0x36c0   :  { %6848 = vmatpush3.bf16.msra.mxu0 %v7996_v20  ;;  %6432 = vmatprep.mubr.msk.f32.mxu0 %vm7178_vm0, %v7179_v6 }
0x36c1   :  { %3863 = vrot.lane.b32.xlu0 %v3862_v46, %s7181_s25  ;;  %6849 = vmatprep.subr.bf16.mxu0 %v7176_v1 }
0x3733   :  { %v3864_v9 = vpop.permute.xlu0 %3863 }
0x3792   :  { %v3847_v48 = vpop.f32.mrb[42].mxu0 }
0x3793   :  { %v3852_v49 = vrot.slane %v3847_v48, 2  ;;  %v6416_v12 = vpop.f32.mrb[43].mxu0 }
0x3795   :  { %v3854_v26 = vadd.f32 %v3852_v49, %v7969_v7 }
0x3797   :  { %7125 = vtanh.f32 %v3854_v26  ;;  %v5719_v55 = vmul.f32 -1.442695, %v3854_v26 }
0x3799   :  { %7127 = vpow2.f32 %v5719_v55 }
0x37a1   :  { %v7126_v51 = vpop.eup %7125 }
0x37a2   :  { %3868 = vrot.lane.b32.xlu1 %v7126_v51, %s7180_s23 }
0x37a3   :  { %v7128_v56 = vpop.eup %7127 }
0x37a4   :  { %v3858_v57 = vadd.f32 1.0, %v7128_v56 }
0x37a6   :  { %7129 = vrcp.f32 %v3858_v57 }
0x37b0   :  { %v7130_v23 = vpop.eup %7129 }
0x37b1   :  { %v3866_v63 = vmul.f32 %v7130_v23, %v3864_v9 }
0x3814   :  { %v3869_v61 = vpop.permute.xlu1 %3868 }
0x3815   :  { %v3871_v4 = vmul.f32 %v7130_v23, %v3869_v61 }
0x3817   :  { %3873 = vrot.lane.b32.xlu1 %v3871_v4, %s7181_s25 }
0x3889   :  { %v3874_v14 = vpop.permute.xlu1 %3873 }
0x388a   :  { %v3876_v15 = vadd.f32 %v3874_v14, %v3866_v63 }
0x388c   :  { %7131 = vtanh.f32 %v3876_v15 }
0x3896   :  { %v7132_v7 = vpop.eup %7131 }
0x3897   :  { %3879 = vrot.lane.b32.xlu0 %v7132_v7, %s7180_s23 }
0x3909   :  { %v3880_v18 = vpop.permute.xlu0 %3879 }
0x390a   :  { %v3882_v19 = vmul.f32 %v7130_v23, %v3880_v18 }
0x390c   :  { %v3884_v13 = vrot.slane %v3882_v19, 6 }
0x390e   :  { %3885 = vrot.lane.b32.xlu1 %v3884_v13, %s7181_s25 }
0x3980   :  { %v3886_v3 = vpop.permute.xlu1 %3885 }
0x3981   :  { %6426 = vmatmul.mubr.msk.f32.vlgmr.msra.gmra.mrb[36].mxu1 %vm144_vm1, %v3886_v3 }
0x3982   :  { %6854 = vmatpush3.bf16.msra.mxu1 %v7865_v11  ;;  %6450 = vmatprep.mubr.msk.f32.mxu1 %vm7178_vm0, %v7179_v6 }
0x3983   :  { %6855 = vmatprep.subr.bf16.mxu1 %v7176_v1 }
0x3986   :  { %6857 = vmatpush3.bf16.msra.mxu1 %v7875_v17 }
0x3987   :  { %6864 = vmatprep.subr.bf16.mxu1 %v7176_v1 }
0x3989   :  { %6451 = vmatmul.mubr.msk.f32.vlgmr.msra.gmra.mrb[38].mxu1 %vm144_vm1, %v3886_v3 }
0x398a   :  { %6866 = vmatpush3.bf16.msra.mxu1 %v7837_v39  ;;  %6472 = vmatprep.mubr.msk.f32.mxu1 %vm7178_vm0, %v7179_v6 }
0x398b   :  { %6867 = vmatprep.subr.bf16.mxu1 %v7176_v1 }
0x398e   :  { %6869 = vmatpush3.bf16.msra.mxu1 %v7852_v52 }
0x398f   :  { %6876 = vmatprep.subr.bf16.mxu1 %v7176_v1 }
0x3a54   :  { %v3955_v22 = vpop.f32.mrb[36].mxu1 }
0x3a55   :  { %v3956_v58 = vadd.f32 %v7913_v0, %v3955_v22  ;;  %v6427_v42 = vpop.f32.mrb[37].mxu1 }
0x3a57   :  { %7133 = vtanh.f32 %v3956_v58 }
0x3a5c   :  { %v4175_v25 = vpop.f32.mrb[38].mxu1 }
0x3a5d   :  { %v6452_v27 = vpop.f32.mrb[39].mxu1 }
0x3a61   :  { %v7134_v5 = vpop.eup %7133 }
0x3a62   :  { %6433 = vmatmul.mubr.msk.f32.vlgmr.msra.gmra.mrb[44].mxu0 %vm2326_vm14, %v7134_v5 }
0x3a63   :  { %6851 = vmatpush3.bf16.msra.mxu0 %v7891_v54  ;;  %6439 = vmatprep.mubr.msk.f32.mxu0 %vm7178_vm0, %v7179_v6 }
0x3a64   :  { %6858 = vmatprep.subr.bf16.mxu0 %v7176_v1 }
0x3a66   :  { %6440 = vmatmul.mubr.msk.f32.vlgmr.msra.gmra.mrb[46].mxu0 %vm2326_vm14, %v7134_v5 }
0x3a67   :  { %6860 = vmatpush3.bf16.msra.mxu0 %v7906_v24  ;;  %6461 = vmatprep.mubr.msk.f32.mxu0 %vm7178_vm0, %v7179_v6 }
0x3a68   :  { %6861 = vmatprep.subr.bf16.mxu0 %v7176_v1 }
0x3a6b   :  { %6863 = vmatpush3.bf16.msra.mxu0 %v7946_v38 }
0x3a6c   :  { %6870 = vmatprep.subr.bf16.mxu0 %v7176_v1 }
0x3b35   :  { %v8143_v16 = vpop.f32.mrb[44].mxu0 }
0x3b36   :  { %v6434_v2 = vpop.f32.mrb[45].mxu0 }
0x3b39   :  { %v4105_v30 = vpop.f32.mrb[46].mxu0 }
0x3b3a   :  { %v4176_v31 = vadd.f32 %v4175_v25, %v4105_v30  ;;  %v6441_v28 = vpop.f32.mrb[47].mxu0 }
0x3b3c   :  { %v4179_v29 = vadd.f32 %v7953_v10, %v4176_v31 }
0x3b3e   :  { %4261 = vrot.lane.b32.xlu1 %v4179_v29, %s7181_s25  ;;  %6462 = vmatmul.mubr.msk.f32.vlgmr.msra.gmra.mrb[48].mxu0 %vm144_vm1, %v4179_v29 }
0x3b3f   :  { %6872 = vmatpush3.bf16.msra.mxu0 %v7996_v20  ;;  %6479 = vmatprep.mubr.msk.f32.mxu0 %vm7178_vm0, %v7179_v6 }
0x3b40   :  { %6873 = vmatprep.subr.bf16.mxu0 %v7176_v1 }
0x3bb0   :  { %v4262_v43 = vpop.permute.xlu1 %4261 }
0x3c11   :  { %v4249_v32 = vpop.f32.mrb[48].mxu0 }
0x3c12   :  { %v4253_v50 = vadd.f32 %v4249_v32, %v7967_v40  ;;  %v6463_v36 = vpop.f32.mrb[49].mxu0 }
0x3c14   :  { %7135 = vtanh.f32 %v4253_v50  ;;  %v5725_v41 = vmul.f32 -1.442695, %v4253_v50 }
0x3c16   :  { %7137 = vpow2.f32 %v5725_v41 }
0x3c1e   :  { %v7136_v34 = vpop.eup %7135 }
0x3c1f   :  { %4266 = vrot.lane.b32.xlu0 %v7136_v34, %s7180_s23 }
0x3c20   :  { %v7138_v37 = vpop.eup %7137 }
0x3c21   :  { %v4257_v35 = vadd.f32 1.0, %v7138_v37 }
0x3c23   :  { %7139 = vrcp.f32 %v4257_v35 }
0x3c2d   :  { %v7140_v53 = vpop.eup %7139 }
0x3c2e   :  { %v4264_v33 = vmul.f32 %v7140_v53, %v4262_v43 }
0x3c91   :  { %v4267_v47 = vpop.permute.xlu0 %4266 }
0x3c92   :  { %v4269_v62 = vmul.f32 %v7140_v53, %v4267_v47 }
0x3c94   :  { %4271 = vrot.lane.b32.xlu0 %v4269_v62, %s7181_s25 }
0x3d06   :  { %v4272_v8 = vpop.permute.xlu0 %4271 }
0x3d07   :  { %v4274_v44 = vadd.f32 %v4272_v8, %v4264_v33 }
0x3d09   :  { %7141 = vtanh.f32 %v4274_v44 }
0x3d13   :  { %v7142_v45 = vpop.eup %7141 }
0x3d14   :  { %4277 = vrot.lane.b32.xlu1 %v7142_v45, %s7180_s23 }
0x3d86   :  { %v4278_v46 = vpop.permute.xlu1 %4277 }
0x3d87   :  { %v4280_v48 = vmul.f32 %v7140_v53, %v4278_v46 }
0x3d89   :  { %4282 = vrot.lane.b32.xlu0 %v4280_v48, %s7181_s25 }
0x3dfb   :  { %v4283_v49 = vpop.permute.xlu0 %4282 }
0x3dfc   :  { %6473 = vmatmul.mubr.msk.f32.vlgmr.msra.gmra.mrb[40].mxu1 %vm144_vm1, %v4283_v49 }
0x3dfd   :  { %6878 = vmatpush3.bf16.msra.mxu1 %v7865_v11  ;;  %6497 = vmatprep.mubr.msk.f32.mxu1 %vm7178_vm0, %v7179_v6 }
0x3dfe   :  { %6879 = vmatprep.subr.bf16.mxu1 %v7176_v1 }
0x3e01   :  { %6881 = vmatpush3.bf16.msra.mxu1 %v7875_v17 }
0x3e02   :  { %6888 = vmatprep.subr.bf16.mxu1 %v7176_v1 }
0x3e04   :  { %6498 = vmatmul.mubr.msk.f32.vlgmr.msra.gmra.mrb[42].mxu1 %vm144_vm1, %v4283_v49 }
0x3e05   :  { %6890 = vmatpush3.bf16.msra.mxu1 %v7837_v39  ;;  %6519 = vmatprep.mubr.msk.f32.mxu1 %vm7178_vm0, %v7179_v6 }
0x3e06   :  { %6891 = vmatprep.subr.bf16.mxu1 %v7176_v1 }
0x3e09   :  { %6893 = vmatpush3.bf16.msra.mxu1 %v7852_v52 }
0x3e0a   :  { %6900 = vmatprep.subr.bf16.mxu1 %v7176_v1 }
0x3ecf   :  { %v4352_v12 = vpop.f32.mrb[40].mxu1 }
0x3ed0   :  { %v4353_v26 = vadd.f32 %v7913_v0, %v4352_v12  ;;  %v6474_v51 = vpop.f32.mrb[41].mxu1 }
0x3ed2   :  { %7143 = vtanh.f32 %v4353_v26 }
0x3ed7   :  { %v4572_v55 = vpop.f32.mrb[42].mxu1 }
0x3ed8   :  { %v6499_v56 = vpop.f32.mrb[43].mxu1 }
0x3edc   :  { %v7144_v57 = vpop.eup %7143 }
0x3edd   :  { %6480 = vmatmul.mubr.msk.f32.vlgmr.msra.gmra.mrb[50].mxu0 %vm2326_vm14, %v7144_v57 }
0x3ede   :  { %6875 = vmatpush3.bf16.msra.mxu0 %v7891_v54  ;;  %6486 = vmatprep.mubr.msk.f32.mxu0 %vm7178_vm0, %v7179_v6 }
0x3edf   :  { %6882 = vmatprep.subr.bf16.mxu0 %v7176_v1 }
0x3ee1   :  { %6487 = vmatmul.mubr.msk.f32.vlgmr.msra.gmra.mrb[52].mxu0 %vm2326_vm14, %v7144_v57 }
0x3ee2   :  { %6884 = vmatpush3.bf16.msra.mxu0 %v7906_v24  ;;  %6508 = vmatprep.mubr.msk.f32.mxu0 %vm7178_vm0, %v7179_v6 }
0x3ee3   :  { %6885 = vmatprep.subr.bf16.mxu0 %v7176_v1 }
0x3ee6   :  { %6887 = vmatpush3.bf16.msra.mxu0 %v7946_v38 }
0x3ee7   :  { %6894 = vmatprep.subr.bf16.mxu0 %v7176_v1 }
0x3fb0   :  { %v8184_v23 = vpop.f32.mrb[50].mxu0 }
0x3fb1   :  { %v6481_v61 = vpop.f32.mrb[51].mxu0 }
0x3fb4   :  { %v4502_v4 = vpop.f32.mrb[52].mxu0 }
0x3fb5   :  { %v4573_v9 = vadd.f32 %v4572_v55, %v4502_v4  ;;  %v6488_v63 = vpop.f32.mrb[53].mxu0 }
0x3fb7   :  { %v4576_v14 = vadd.f32 %v7953_v10, %v4573_v9 }
0x3fb9   :  { %v4661_v15 = vrot.slane %v4576_v14, 6  ;;  %6509 = vmatmul.mubr.msk.f32.vlgmr.msra.gmra.mrb[54].mxu0 %vm144_vm1, %v4576_v14 }
0x3fba   :  { %6896 = vmatpush3.bf16.msra.mxu0 %v7996_v20  ;;  %6526 = vmatprep.mubr.msk.f32.mxu0 %vm7178_vm0, %v7179_v6 }
0x3fbb   :  { %4662 = vrot.lane.b32.xlu0 %v4661_v15, %s7181_s25  ;;  %6897 = vmatprep.subr.bf16.mxu0 %v7176_v1 }
0x402d   :  { %v4663_v2 = vpop.permute.xlu0 %4662 }
0x408c   :  { %v4646_v7 = vpop.f32.mrb[54].mxu0 }
0x408d   :  { %v4651_v18 = vrot.slane %v4646_v7, 6  ;;  %v6510_v19 = vpop.f32.mrb[55].mxu0 }
0x408f   :  { %v4653_v13 = vadd.f32 %v4651_v18, %v7967_v40 }
0x4091   :  { %7145 = vtanh.f32 %v4653_v13  ;;  %v5731_v22 = vmul.f32 -1.442695, %v4653_v13 }
0x4093   :  { %7147 = vpow2.f32 %v5731_v22 }
0x409b   :  { %v7146_v3 = vpop.eup %7145 }
0x409c   :  { %4667 = vrot.lane.b32.xlu1 %v7146_v3, %s7180_s23 }
0x409d   :  { %v7148_v58 = vpop.eup %7147 }
0x409e   :  { %v4657_v42 = vadd.f32 1.0, %v7148_v58  ;;  %v8255_v58 = vld [vmem:[%s8336_s12] ss:$0 sm:$0xff]  ;;  %s7183_s12 = smov 16  }
0x40a0   :  { %7149 = vrcp.f32 %v4657_v42 }
0x40aa   :  { %v7150_v25 = vpop.eup %7149 }
0x40ab   :  { %v4665_v30 = vmul.f32 %v7150_v25, %v4663_v2 }
0x410e   :  { %v4668_v27 = vpop.permute.xlu1 %4667 }
0x410f   :  { %v4670_v5 = vmul.f32 %v7150_v25, %v4668_v27 }
0x4111   :  { %4672 = vrot.lane.b32.xlu1 %v4670_v5, %s7181_s25 }
0x4183   :  { %v4673_v31 = vpop.permute.xlu1 %4672 }
0x4184   :  { %v4675_v28 = vadd.f32 %v4673_v31, %v4665_v30 }
0x4186   :  { %7151 = vtanh.f32 %v4675_v28 }
0x4190   :  { %v7152_v29 = vpop.eup %7151 }
0x4191   :  { %4678 = vrot.lane.b32.xlu0 %v7152_v29, %s7180_s23 }
0x4203   :  { %v4679_v32 = vpop.permute.xlu0 %4678 }
0x4204   :  { %v4681_v50 = vmul.f32 %v7150_v25, %v4679_v32 }
0x4206   :  { %v4683_v36 = vrot.slane %v4681_v50, 2 }
0x4208   :  { %4684 = vrot.lane.b32.xlu1 %v4683_v36, %s7181_s25 }
0x427a   :  { %v4685_v34 = vpop.permute.xlu1 %4684 }
0x427b   :  { %6520 = vmatmul.mubr.msk.f32.vlgmr.msra.gmra.mrb[44].mxu1 %vm144_vm1, %v4685_v34 }
0x427c   :  { %6902 = vmatpush3.bf16.msra.mxu1 %v7865_v11  ;;  %6544 = vmatprep.mubr.msk.f32.mxu1 %vm7178_vm0, %v7179_v6 }
0x427d   :  { %6903 = vmatprep.subr.bf16.mxu1 %v7176_v1 }
0x4280   :  { %6905 = vmatpush3.bf16.msra.mxu1 %v7875_v17 }
0x4281   :  { %6912 = vmatprep.subr.bf16.mxu1 %v7176_v1 }
0x4283   :  { %6545 = vmatmul.mubr.msk.f32.vlgmr.msra.gmra.mrb[46].mxu1 %vm144_vm1, %v4685_v34 }
0x4284   :  { %6914 = vmatpush3.bf16.msra.mxu1 %v7837_v39  ;;  %6566 = vmatprep.mubr.msk.f32.mxu1 %vm7178_vm0, %v7179_v6 }
0x4285   :  { %6915 = vmatprep.subr.bf16.mxu1 %v7176_v1 }
0x4288   :  { %6917 = vmatpush3.bf16.msra.mxu1 %v7852_v52 }
0x4289   :  { %6924 = vmatprep.subr.bf16.mxu1 %v7176_v1 }
0x434e   :  { %v4754_v41 = vpop.f32.mrb[44].mxu1 }
0x434f   :  { %v4755_v37 = vadd.f32 %v7913_v0, %v4754_v41  ;;  %v6521_v35 = vpop.f32.mrb[45].mxu1 }
0x4351   :  { %7153 = vtanh.f32 %v4755_v37 }
0x4356   :  { %v4974_v53 = vpop.f32.mrb[46].mxu1 }
0x4357   :  { %v6546_v47 = vpop.f32.mrb[47].mxu1 }
0x4358   :  { %v3226_v47 = vadd.f32 %v8016_v21, %v8061_v59  ;;  %v3628_v59 = vadd.f32 %v8016_v21, %v8102_v60 }
0x435b   :  { %v7154_v62 = vpop.eup %7153 }
0x435c   :  { %6527 = vmatmul.mubr.msk.f32.vlgmr.msra.gmra.mrb[56].mxu0 %vm2326_vm14, %v7154_v62 }
0x435d   :  { %6899 = vmatpush3.bf16.msra.mxu0 %v7891_v54  ;;  %6533 = vmatprep.mubr.msk.f32.mxu0 %vm7178_vm0, %v7179_v6 }
0x435e   :  { %6906 = vmatprep.subr.bf16.mxu0 %v7176_v1 }
0x4360   :  { %6534 = vmatmul.mubr.msk.f32.vlgmr.msra.gmra.mrb[58].mxu0 %vm2326_vm14, %v7154_v62  ;;  %v4030_v62 = vadd.f32 %v8016_v21, %v8143_v16  ;;  %v4427_v16 = vadd.f32 %v8016_v21, %v8184_v23 }
0x4361   :  { %6908 = vmatpush3.bf16.msra.mxu0 %v7906_v24  ;;  %6555 = vmatprep.mubr.msk.f32.mxu0 %vm7178_vm0, %v7179_v6 }
0x4362   :  { %6909 = vmatprep.subr.bf16.mxu0 %v7176_v1 }
0x4365   :  { %6911 = vmatpush3.bf16.msra.mxu0 %v7946_v38 }
0x4366   :  { %6918 = vmatprep.subr.bf16.mxu0 %v7176_v1 }
0x442f   :  { %v8225_v0 = vpop.f32.mrb[56].mxu0 }
0x4430   :  { %v6528_v43 = vpop.f32.mrb[57].mxu0 }
0x4431   :  { %v4829_v43 = vadd.f32 %v8016_v21, %v8225_v0 }
0x4433   :  { %v4904_v33 = vpop.f32.mrb[58].mxu0 }
0x4434   :  { %v4975_v8 = vadd.f32 %v4974_v53, %v4904_v33  ;;  %v6535_v44 = vpop.f32.mrb[59].mxu0 }
0x4436   :  { %v4978_v45 = vadd.f32 %v7953_v10, %v4975_v8 }
0x4438   :  { %v5063_v46 = vrot.slane %v4978_v45, 4  ;;  %6556 = vmatmul.mubr.msk.f32.vlgmr.msra.gmra.mrb[60].mxu0 %vm144_vm1, %v4978_v45 }
0x4439   :  { %6920 = vmatpush3.bf16.msra.mxu0 %v7996_v20  ;;  %6573 = vmatprep.mubr.msk.f32.mxu0 %vm7178_vm0, %v7179_v6 }
0x443a   :  { %5064 = vrot.lane.b32.xlu1 %v5063_v46, %s7181_s25  ;;  %6921 = vmatprep.subr.bf16.mxu0 %v7176_v1 }
0x44ac   :  { %v5065_v63 = vpop.permute.xlu1 %5064 }
0x450b   :  { %v5048_v48 = vpop.f32.mrb[60].mxu0 }
0x450c   :  { %v5053_v49 = vrot.slane %v5048_v48, 4  ;;  %v6557_v12 = vpop.f32.mrb[61].mxu0 }
0x450e   :  { %v5055_v26 = vadd.f32 %v5053_v49, %v7967_v40 }
0x4510   :  { %7155 = vtanh.f32 %v5055_v26  ;;  %v5737_v55 = vmul.f32 -1.442695, %v5055_v26 }
0x4512   :  { %7157 = vpow2.f32 %v5737_v55 }
0x451a   :  { %v7156_v51 = vpop.eup %7155 }
0x451b   :  { %5069 = vrot.lane.b32.xlu0 %v7156_v51, %s7180_s23 }
0x451c   :  { %v7158_v56 = vpop.eup %7157 }
0x451d   :  { %v5059_v57 = vadd.f32 1.0, %v7158_v56 }
0x451f   :  { %7159 = vrcp.f32 %v5059_v57 }
0x4529   :  { %v7160_v61 = vpop.eup %7159 }
0x452a   :  { %v5067_v14 = vmul.f32 %v7160_v61, %v5065_v63 }
0x458d   :  { %v5070_v4 = vpop.permute.xlu0 %5069 }
0x458e   :  { %v5072_v9 = vmul.f32 %v7160_v61, %v5070_v4 }
0x4590   :  { %5074 = vrot.lane.b32.xlu0 %v5072_v9, %s7181_s25 }
0x4602   :  { %v5075_v15 = vpop.permute.xlu0 %5074 }
0x4603   :  { %v5077_v7 = vadd.f32 %v5075_v15, %v5067_v14 }
0x4605   :  { %7161 = vtanh.f32 %v5077_v7 }
0x460f   :  { %v7162_v18 = vpop.eup %7161 }
0x4610   :  { %5080 = vrot.lane.b32.xlu1 %v7162_v18, %s7180_s23 }
0x4682   :  { %v5081_v19 = vpop.permute.xlu1 %5080 }
0x4683   :  { %v5083_v13 = vmul.f32 %v7160_v61, %v5081_v19 }
0x4685   :  { %v5085_v3 = vrot.slane %v5083_v13, 4 }
0x4687   :  { %5086 = vrot.lane.b32.xlu0 %v5085_v3, %s7181_s25 }
0x46f9   :  { %v5087_v22 = vpop.permute.xlu0 %5086 }
0x46fa   :  { %6567 = vmatmul.mubr.msk.f32.vlgmr.msra.gmra.mrb[48].mxu1 %vm144_vm1, %v5087_v22 }
0x46fb   :  { %6926 = vmatpush3.bf16.msra.mxu1 %v7865_v11  ;;  %6591 = vmatprep.mubr.msk.f32.mxu1 %vm7178_vm0, %v7179_v6 }
0x46fc   :  { %6927 = vmatprep.subr.bf16.mxu1 %v7176_v1 }
0x46ff   :  { %6929 = vmatpush3.bf16.msra.mxu1 %v7875_v17 }
0x4700   :  { %6936 = vmatprep.subr.bf16.mxu1 %v7176_v1 }
0x4702   :  { %6592 = vmatmul.mubr.msk.f32.vlgmr.msra.gmra.mrb[50].mxu1 %vm144_vm1, %v5087_v22 }
0x4703   :  { %6938 = vmatpush3.bf16.msra.mxu1 %v7837_v39  ;;  %6613 = vmatprep.mubr.msk.f32.mxu1 %vm7178_vm0, %v7179_v6 }
0x4704   :  { %6939 = vmatprep.subr.bf16.mxu1 %v7176_v1 }
0x4707   :  { %6941 = vmatpush3.bf16.msra.mxu1 %v7852_v52 }
0x47cd   :  { %v5156_v11 = vpop.f32.mrb[48].mxu1 }
0x47ce   :  { %v5157_v17 = vadd.f32 %v8255_v58, %v5156_v11  ;;  %v6568_v42 = vpop.f32.mrb[49].mxu1 }
0x47d0   :  { %7163 = vtanh.f32 %v5157_v17 }
0x47d5   :  { %v5376_v25 = vpop.f32.mrb[50].mxu1 }
0x47d6   :  { %v6593_v27 = vpop.f32.mrb[51].mxu1 }
0x47da   :  { %v7164_v39 = vpop.eup %7163 }
0x47db   :  { %6574 = vmatmul.mubr.msk.f32.vlgmr.msra.gmra.mrb[62].mxu0 %vm2326_vm14, %v7164_v39 }
0x47dc   :  { %6923 = vmatpush3.bf16.msra.mxu0 %v7891_v54  ;;  %6580 = vmatprep.mubr.msk.f32.mxu0 %vm7178_vm0, %v7179_v6 }
0x47dd   :  { %6930 = vmatprep.subr.bf16.mxu0 %v7176_v1 }
0x47df   :  { %6581 = vmatmul.mubr.msk.f32.vlgmr.msra.gmra.mrb[64].mxu0 %vm2326_vm14, %v7164_v39 }
0x47e0   :  { %6932 = vmatpush3.bf16.msra.mxu0 %v7906_v24  ;;  %6602 = vmatprep.mubr.msk.f32.mxu0 %vm7178_vm0, %v7179_v6 }
0x47e1   :  { %6933 = vmatprep.subr.bf16.mxu0 %v7176_v1 }
0x47e4   :  { %6935 = vmatpush3.bf16.msra.mxu0 %v7946_v38 }
0x47e5   :  { %6942 = vmatprep.subr.bf16.mxu0 %v7176_v1 }
0x48ae   :  { %v5230_v52 = vpop.f32.mrb[62].mxu0 }
0x48af   :  { %v6575_v54 = vpop.f32.mrb[63].mxu0  ;;  %v5231_v0 = vadd.f32 %v8016_v21, %v5230_v52 }
0x48b2   :  { %v5306_v5 = vpop.f32.mrb[64].mxu0 }
0x48b3   :  { %v5377_v2 = vadd.f32 %v5376_v25, %v5306_v5  ;;  %v6582_v30 = vpop.f32.mrb[65].mxu0 }
0x48b5   :  { %v5380_v31 = vadd.f32 %v7953_v10, %v5377_v2 }
0x48b7   :  { %v5465_v28 = vrot.slane %v5380_v31, 2  ;;  %6603 = vmatmul.mubr.msk.f32.vlgmr.msra.gmra.mrb[66].mxu0 %vm144_vm1, %v5380_v31 }
0x48b8   :  { %6944 = vmatpush3.bf16.msra.mxu0 %v7996_v20  ;;  %6620 = vmatprep.mubr.msk.f32.mxu0 %vm7178_vm0, %v7179_v6  ;;  %vm3233_vm0 = vcmask 255104  }
0x48b9   :  { %5466 = vrot.lane.b32.xlu0 %v5465_v28, %s7181_s25 }
0x492b   :  { %v5467_v6 = vpop.permute.xlu0 %5466 }
0x498a   :  { %v5450_v24 = vpop.f32.mrb[66].mxu0 }
0x498b   :  { %v5455_v38 = vrot.slane %v5450_v24, 2  ;;  %v6604_v1 = vpop.f32.mrb[67].mxu0 }
0x498d   :  { %v5457_v29 = vadd.f32 %v5455_v38, %v7967_v40 }
0x498f   :  { %7165 = vtanh.f32 %v5457_v29  ;;  %v5743_v10 = vmul.f32 -1.442695, %v5457_v29 }
0x4991   :  { %7167 = vpow2.f32 %v5743_v10 }
0x4999   :  { %v7166_v32 = vpop.eup %7165 }
0x499a   :  { %5471 = vrot.lane.b32.xlu1 %v7166_v32, %s7180_s23 }
0x499b   :  { %v7168_v50 = vpop.eup %7167 }
0x499c   :  { %v5461_v36 = vadd.f32 1.0, %v7168_v50 }
0x499e   :  { %7169 = vrcp.f32 %v5461_v36 }
0x49a8   :  { %v7170_v20 = vpop.eup %7169 }
0x49a9   :  { %v5469_v37 = vmul.f32 %v7170_v20, %v5467_v6 }
0x4a0c   :  { %v5472_v34 = vpop.permute.xlu1 %5471 }
0x4a0d   :  { %v5474_v41 = vmul.f32 %v7170_v20, %v5472_v34 }
0x4a0f   :  { %5476 = vrot.lane.b32.xlu1 %v5474_v41, %s7181_s25 }
0x4a81   :  { %v5477_v35 = vpop.permute.xlu1 %5476 }
0x4a82   :  { %v5479_v53 = vadd.f32 %v5477_v35, %v5469_v37 }
0x4a84   :  { %7171 = vtanh.f32 %v5479_v53 }
0x4a8e   :  { %v7172_v40 = vpop.eup %7171 }
0x4a8f   :  { %5482 = vrot.lane.b32.xlu0 %v7172_v40, %s7180_s23 }
0x4a93   :  { %3230 = vrot.lane.b32.xlu0 %v3226_v47, %s7183_s12 }
0x4a97   :  { %4034 = vrot.lane.b32.xlu0 %v4030_v62, %s7184_s0 }
0x4a9b   :  { %4833 = vrot.lane.b32.xlu0 %v4829_v43, %s7185_s9 }
0x4b01   :  { %v5483_v33 = vpop.permute.xlu0 %5482 }
0x4b02   :  { %v5485_v8 = vmul.f32 %v7170_v20, %v5483_v33 }
0x4b04   :  { %v5487_v44 = vrot.slane %v5485_v8, 6 }
0x4b05   :  { %v3231_v45 = vpop.permute.xlu0 %3230 }
0x4b06   :  { %3234 = vst.msk [vmem:[%s8341_s21] sm:$0x3] %vm3233_vm0, %v3231_v45  ;;  %5488 = vrot.lane.b32.xlu1 %v5487_v44, %s7181_s25 }
0x4b09   :  { %v4035_v48 = vpop.permute.xlu0 %4034 }
0x4b0a   :  { %3632 = vrot.lane.b32.xlu1 %v3628_v59, %s7181_s25 }
0x4b0d   :  { %v4834_v23 = vpop.permute.xlu0 %4833 }
0x4b0e   :  { %4431 = vrot.lane.b32.xlu1 %v4427_v16, %s7180_s23 }
0x4b12   :  { %5235 = vrot.lane.b32.xlu1 %v5231_v0, %s7182_s28 }
0x4b78   :  { %v5489_v46 = vpop.permute.xlu1 %5488 }
0x4b79   :  { %6614 = vmatmul.mubr.msk.f32.vlgmr.msra.gmra.mrb[52].mxu1 %vm144_vm1, %v5489_v46  ;;  %vm5238_vm1 = vcmask 911104  }
0x4b7c   :  { %v3633_v49 = vpop.permute.xlu1 %3632 }
0x4b7d   :  { %3636 = vst.msk [vmem:[%s8341_s21] sm:$0x3] %vm3635_vm3, %v3633_v49 }
0x4b7e   :  { %4038 = vst.msk [vmem:[%s8341_s21] sm:$0x3] %vm4037_vm4, %v4035_v48 }
0x4b80   :  { %v4432_v60 = vpop.permute.xlu1 %4431 }
0x4b81   :  { %4435 = vst.msk [vmem:[%s8341_s21] sm:$0x3] %vm4434_vm5, %v4432_v60 }
0x4b82   :  { %4837 = vst.msk [vmem:[%s8341_s21] sm:$0x3] %vm4836_vm6, %v4834_v23 }
0x4b84   :  { %v5236_v12 = vpop.permute.xlu1 %5235 }
0x4b85   :  { %5239 = vst.msk [vmem:[%s8341_s21] sm:$0x3] %vm5238_vm1, %v5236_v12 }
0x4c4c   :  { %v5558_v26 = vpop.f32.mrb[52].mxu1 }
0x4c4d   :  { %v5559_v51 = vadd.f32 %v8255_v58, %v5558_v26  ;;  %v6615_v55 = vpop.f32.mrb[53].mxu1 }
0x4c4f   :  { %7173 = vtanh.f32 %v5559_v51 }
0x4c59   :  { %v7174_v56 = vpop.eup %7173 }
0x4c5a   :  { %6621 = vmatmul.mubr.msk.f32.vlgmr.msra.gmra.mrb[68].mxu0 %vm2326_vm14, %v7174_v56 }
0x4d2d   :  { %v5632_v57 = vpop.f32.mrb[68].mxu0 }
0x4d2e   :  { %v5633_v61 = vadd.f32 %v8016_v21, %v5632_v57  ;;  %v6622_v4 = vpop.f32.mrb[69].mxu0 }
0x4d30   :  { %5637 = vrot.lane.b32.xlu0 %v5633_v61, %s7186_s16 }
0x4da2   :  { %v5638_v9 = vpop.permute.xlu0 %5637 }
0x4da3   :  { %5641 = vst.msk [vmem:[%s8341_s21] sm:$0x3] %vm5640_vm7, %v5638_v9 }

</bundles_post_ra>
